<compile_context>
chip_gen: v7x
topology: tpu7x:2x2x1
jax: 0.10.0
libtpu: 0.0.40
codegen_flags: <defaults>
</compile_context>

<pallas_src>
import jax
import jax.numpy as jnp
from jax.experimental import pallas as pl
from jax.experimental.pallas import tpu as pltpu

IN_DIM = 32
H_LSTM = 64
HIDDEN = 1024
OUT_DIM = 32
GP = 128          # per-gate lane-padded width (64 real + 64 zero lanes)
OP = 128          # lane-padded output width (32 real + 96 zero lanes)


def _sigmoid(x):
    # sigmoid(x) == 0.5 * tanh(0.5 * x) + 0.5  (single EUP tanh, no divide, no overflow)
    return 0.5 * jnp.tanh(0.5 * x) + 0.5


def net_forward(x, params):
    wih, whh, bih, bhh, w1, b1, w2, b2 = params
    seq, batch, _ = x.shape
    BP = -(-batch // 8) * 8          # batch padded to the 8-sublane tile
    SBP = seq * BP

    # ---- wrapper-side weight / input prep (plain JAX, outside the kernel) --------
    def pad_gate_cols(w_t):
        # (K, 4*H) -> (K, 4*GP): pad each 64-wide gate block to 128 lanes with zeros.
        K = w_t.shape[0]
        w4 = w_t.reshape(K, 4, H_LSTM)
        w4 = jnp.pad(w4, ((0, 0), (0, 0), (0, GP - H_LSTM)))
        return w4.reshape(K, 4 * GP)

    wih_p = pad_gate_cols(wih.T)                                      # (32, 512)
    whh_p = pad_gate_cols(whh.T)                                      # (64, 512)  K=64, no zero rows
    b_p = pad_gate_cols((bih + bhh).reshape(1, -1))                   # (1, 512)   b_ih + b_hh folded
    w1_p = jnp.pad(w1.T, ((0, GP - H_LSTM), (0, 0)))                  # (128, 1024), zero rows 64:128
    b1r = b1.reshape(1, -1)                                           # (1, 1024)
    w2_p = jnp.pad(w2.T, ((0, 0), (0, OP - OUT_DIM)))                 # (1024, 128), zero cols 32:128
    b2_p = jnp.pad(b2.reshape(1, -1), ((0, 0), (0, OP - OUT_DIM)))    # (1, 128)

    x_pad = jnp.pad(x, ((0, 0), (0, BP - batch), (0, 0)))             # (seq, BP, 32), zero rows
    x2d = x_pad.reshape(SBP, IN_DIM)                                  # (seq*BP, 32)

    # ---- kernel ------------------------------------------------------------------
    def kernel(x_ref, wih_ref, whh_ref, b_ref, w1_ref, b1_ref, w2_ref, b2_ref,
               out_ref, hs_scr):
        # (1) Batched input projection for ALL timesteps, bias folded in (one matmul,
        #     off the serial recurrence path).
        xg = (jnp.dot(x_ref[...], wih_ref[...], preferred_element_type=jnp.float32)
              + b_ref[...])                                           # (SBP, 4*GP)
        whh_v = whh_ref[...]                                          # (64, 4*GP)

        h = jnp.zeros((BP, GP), jnp.float32)
        c = jnp.zeros((BP, GP), jnp.float32)

        # (2) Fully-unrolled recurrence: only h[:, :64] @ W_hh + elementwise gate math
        #     per step.  BP=8 sublanes => the xg slice and hs_scr store are full-tile;
        #     gate slices are full-vreg (128-lane) slices thanks to the column padding.
        #     Padded lanes stay exactly zero: gate_pad = 0 -> g=tanh(0)=0 -> c_pad = 0
        #     -> h_pad = 0, so the K=64 slice of h is exactly the unpadded hidden state.
        for t in range(seq):
            gates = (xg[t * BP:(t + 1) * BP, :]
                     + jnp.dot(h[:, :H_LSTM], whh_v,
                               preferred_element_type=jnp.float32))   # (BP, 4*GP)
            i = _sigmoid(gates[:, 0:GP])              # input gate
            f = _sigmoid(gates[:, GP:2 * GP])         # forget gate
            g = jnp.tanh(gates[:, 2 * GP:3 * GP])     # cell candidate
            o = _sigmoid(gates[:, 3 * GP:4 * GP])     # output gate
            c = f * c + i * g
            h = o * jnp.tanh(c)
            hs_scr[t * BP:(t + 1) * BP, :] = h        # full-tile static store of h_t

        # (3) MLP head hoisted out of the loop: one big matmul pair over seq*BP rows,
        #     biases added once, single lane-dense (128-wide) unmasked output store.
        hs = hs_scr[...]                                              # (SBP, GP)
        hid = jnp.dot(hs, w1_ref[...], preferred_element_type=jnp.float32) + b1_ref[...]
        hid = jnp.maximum(hid, 0.01 * hid)                            # leaky_relu, slope 0.01
        logits = jnp.dot(hid, w2_ref[...], preferred_element_type=jnp.float32) + b2_ref[...]
        out_ref[...] = _sigmoid(logits)                               # (SBP, 128)

    args = (x2d, wih_p, whh_p, b_p, w1_p, b1r, w2_p, b2_p)

    def full_spec(shape):
        return pl.BlockSpec(shape, lambda i: (0,) * len(shape))

    out2d = pl.pallas_call(
        kernel,
        out_shape=jax.ShapeDtypeStruct((SBP, OP), jnp.float32),
        grid=(1,),
        in_specs=[full_spec(a.shape) for a in args],
        out_specs=full_spec((SBP, OP)),
        scratch_shapes=[pltpu.VMEM((SBP, GP), jnp.float32)],          # per-step h_t collection
        compiler_params=pltpu.CompilerParams(
            dimension_semantics=("arbitrary",)),
    )(*args)

    # Strip batch-sublane and output-lane padding.
    return out2d.reshape(seq, BP, OP)[:, :batch, :OUT_DIM]


def net_reference(x, params):
    # Pure-JAX reference matching PyTorch semantics exactly.
    wih, whh, bih, bhh, w1, b1, w2, b2 = params
    seq, batch, _ = x.shape
    H = H_LSTM

    def step(carry, x_t):
        h, c = carry
        gates = x_t @ wih.T + bih + h @ whh.T + bhh
        i = jax.nn.sigmoid(gates[:, 0:H])
        f = jax.nn.sigmoid(gates[:, H:2 * H])
        g = jnp.tanh(gates[:, 2 * H:3 * H])
        o = jax.nn.sigmoid(gates[:, 3 * H:4 * H])
        c = f * c + i * g
        h = o * jnp.tanh(c)
        return (h, c), h

    init = (jnp.zeros((batch, H), jnp.float32), jnp.zeros((batch, H), jnp.float32))
    _, hs = jax.lax.scan(step, init, x)                               # (seq, batch, H)
    hid = jax.nn.leaky_relu(hs @ w1.T + b1, negative_slope=0.01)
    return jax.nn.sigmoid(hid @ w2.T + b2)


def init_params(key):
    # Deterministic PyTorch-style uniform init U(-k, k).
    ks = jax.random.split(key, 8)
    k_lstm = 1.0 / jnp.sqrt(H_LSTM)
    k_h = 1.0 / jnp.sqrt(H_LSTM)     # Linear(64 -> 1024): k = 1/sqrt(fan_in=64)
    k_o = 1.0 / jnp.sqrt(HIDDEN)     # Linear(1024 -> 32): k = 1/sqrt(fan_in=1024)

    def u(k, shape, bound):
        return jax.random.uniform(k, shape, jnp.float32, -bound, bound)

    wih = u(ks[0], (4 * H_LSTM, IN_DIM), k_lstm)
    whh = u(ks[1], (4 * H_LSTM, H_LSTM), k_lstm)
    bih = u(ks[2], (4 * H_LSTM,), k_lstm)
    bhh = u(ks[3], (4 * H_LSTM,), k_lstm)
    w1 = u(ks[4], (HIDDEN, H_LSTM), k_h)
    b1 = u(ks[5], (HIDDEN,), k_h)
    w2 = u(ks[6], (OUT_DIM, HIDDEN), k_o)
    b2 = u(ks[7], (OUT_DIM,), k_o)
    return (wih, whh, bih, bhh, w1, b1, w2, b2)


if __name__ == "__main__":
    key = jax.random.PRNGKey(0)
    k_params, k_x = jax.random.split(key)
    params = init_params(k_params)

    seq, batch = 8, 2
    x = jax.random.normal(k_x, (seq, batch, IN_DIM), jnp.float32)

    out = net_forward(x, params)
    jax.block_until_ready(out)

    ref = net_reference(x, params)
    assert out.shape == (seq, batch, OUT_DIM), out.shape
    assert jnp.allclose(out, ref, atol=1e-4, rtol=1e-4), float(jnp.max(jnp.abs(out - ref)))

    print("KERNEL_OK")
</pallas_src>

<mosaic_0001>
module attributes {stable_mosaic.version = 11 : i64} {
  func.func @kernel(%arg0: i32, %arg1: memref<64x32xf32, #tpu.memory_space<vmem>>, %arg2: memref<32x512xf32, #tpu.memory_space<vmem>>, %arg3: memref<64x512xf32, #tpu.memory_space<vmem>>, %arg4: memref<1x512xf32, #tpu.memory_space<vmem>>, %arg5: memref<128x1024xf32, #tpu.memory_space<vmem>>, %arg6: memref<1x1024xf32, #tpu.memory_space<vmem>>, %arg7: memref<1024x128xf32, #tpu.memory_space<vmem>>, %arg8: memref<1x128xf32, #tpu.memory_space<vmem>>, %arg9: memref<64x128xf32, #tpu.memory_space<vmem>>, %arg10: memref<64x128xf32, #tpu.memory_space<vmem>>) attributes {dimension_semantics = [#tpu.dimension_semantics<arbitrary>], iteration_bounds = array<i64: 1>, scalar_prefetch = 0 : i64, scratch_operands = 1 : i64, tpu.core_type = #tpu.core_type<tc>, window_params = [{pipeline_mode = #tpu.pipeline_mode<synchronous>, transform_indices = @transform_0, window_bounds = array<i64: 64, 32>}, {pipeline_mode = #tpu.pipeline_mode<synchronous>, transform_indices = @transform_1, window_bounds = array<i64: 32, 512>}, {pipeline_mode = #tpu.pipeline_mode<synchronous>, transform_indices = @transform_2, window_bounds = array<i64: 64, 512>}, {pipeline_mode = #tpu.pipeline_mode<synchronous>, transform_indices = @transform_3, window_bounds = array<i64: 1, 512>}, {pipeline_mode = #tpu.pipeline_mode<synchronous>, transform_indices = @transform_4, window_bounds = array<i64: 128, 1024>}, {pipeline_mode = #tpu.pipeline_mode<synchronous>, transform_indices = @transform_5, window_bounds = array<i64: 1, 1024>}, {pipeline_mode = #tpu.pipeline_mode<synchronous>, transform_indices = @transform_6, window_bounds = array<i64: 1024, 128>}, {pipeline_mode = #tpu.pipeline_mode<synchronous>, transform_indices = @transform_7, window_bounds = array<i64: 1, 128>}, {pipeline_mode = #tpu.pipeline_mode<synchronous>, transform_indices = @transform_8, window_bounds = array<i64: 64, 128>}]} {
    %c0 = arith.constant 0 : index
    %c0_0 = arith.constant 0 : index
    %0 = vector.load %arg1[%c0, %c0_0] : memref<64x32xf32, #tpu.memory_space<vmem>>, vector<64x32xf32>
    %c0_1 = arith.constant 0 : index
    %c0_2 = arith.constant 0 : index
    %1 = vector.load %arg2[%c0_1, %c0_2] : memref<32x512xf32, #tpu.memory_space<vmem>>, vector<32x512xf32>
    %cst = arith.constant dense<0.000000e+00> : vector<64x512xf32>
    %2 = tpu.matmul %0, %1, %cst {dimension_numbers = #tpu.dot_dimension_numbers<[1], [0], [0], [1], [0, 0, 1, 1], [], []>} : vector<64x32xf32>, vector<32x512xf32>, vector<64x512xf32> -> vector<64x512xf32>
    %c0_3 = arith.constant 0 : index
    %c0_4 = arith.constant 0 : index
    %3 = vector.load %arg4[%c0_3, %c0_4] : memref<1x512xf32, #tpu.memory_space<vmem>>, vector<1x512xf32>
    %4 = vector.broadcast %3 : vector<1x512xf32> to vector<64x512xf32>
    %5 = arith.addf %2, %4 : vector<64x512xf32>
    %c0_5 = arith.constant 0 : index
    %c0_6 = arith.constant 0 : index
    %6 = vector.load %arg3[%c0_5, %c0_6] : memref<64x512xf32, #tpu.memory_space<vmem>>, vector<64x512xf32>
    %cst_7 = arith.constant 0.000000e+00 : f32
    %7 = vector.broadcast %cst_7 : f32 to vector<8x128xf32>
    %cst_8 = arith.constant 0.000000e+00 : f32
    %8 = vector.broadcast %cst_8 : f32 to vector<8x128xf32>
    %9 = vector.extract_strided_slice %5 {offsets = [0, 0], sizes = [8, 512], strides = [1, 1]} : vector<64x512xf32> to vector<8x512xf32>
    %10 = vector.extract_strided_slice %7 {offsets = [0, 0], sizes = [8, 64], strides = [1, 1]} : vector<8x128xf32> to vector<8x64xf32>
    %cst_9 = arith.constant dense<0.000000e+00> : vector<8x512xf32>
    %11 = tpu.matmul %10, %6, %cst_9 {dimension_numbers = #tpu.dot_dimension_numbers<[1], [0], [0], [1], [0, 0, 1, 1], [], []>} : vector<8x64xf32>, vector<64x512xf32>, vector<8x512xf32> -> vector<8x512xf32>
    %12 = arith.addf %9, %11 : vector<8x512xf32>
    %13 = vector.extract_strided_slice %12 {offsets = [0, 0], sizes = [8, 128], strides = [1, 1]} : vector<8x512xf32> to vector<8x128xf32>
    %cst_10 = arith.constant 5.000000e-01 : f32
    %14 = vector.broadcast %cst_10 : f32 to vector<8x128xf32>
    %15 = arith.mulf %14, %13 : vector<8x128xf32>
    %16 = math.tanh %15 : vector<8x128xf32>
    %cst_11 = arith.constant 5.000000e-01 : f32
    %17 = vector.broadcast %cst_11 : f32 to vector<8x128xf32>
    %18 = arith.mulf %17, %16 : vector<8x128xf32>
    %cst_12 = arith.constant 5.000000e-01 : f32
    %19 = vector.broadcast %cst_12 : f32 to vector<8x128xf32>
    %20 = arith.addf %18, %19 : vector<8x128xf32>
    %21 = vector.extract_strided_slice %12 {offsets = [0, 128], sizes = [8, 128], strides = [1, 1]} : vector<8x512xf32> to vector<8x128xf32>
    %cst_13 = arith.constant 5.000000e-01 : f32
    %22 = vector.broadcast %cst_13 : f32 to vector<8x128xf32>
    %23 = arith.mulf %22, %21 : vector<8x128xf32>
    %24 = math.tanh %23 : vector<8x128xf32>
    %cst_14 = arith.constant 5.000000e-01 : f32
    %25 = vector.broadcast %cst_14 : f32 to vector<8x128xf32>
    %26 = arith.mulf %25, %24 : vector<8x128xf32>
    %cst_15 = arith.constant 5.000000e-01 : f32
    %27 = vector.broadcast %cst_15 : f32 to vector<8x128xf32>
    %28 = arith.addf %26, %27 : vector<8x128xf32>
    %29 = vector.extract_strided_slice %12 {offsets = [0, 256], sizes = [8, 128], strides = [1, 1]} : vector<8x512xf32> to vector<8x128xf32>
    %30 = math.tanh %29 : vector<8x128xf32>
    %31 = vector.extract_strided_slice %12 {offsets = [0, 384], sizes = [8, 128], strides = [1, 1]} : vector<8x512xf32> to vector<8x128xf32>
    %cst_16 = arith.constant 5.000000e-01 : f32
    %32 = vector.broadcast %cst_16 : f32 to vector<8x128xf32>
    %33 = arith.mulf %32, %31 : vector<8x128xf32>
    %34 = math.tanh %33 : vector<8x128xf32>
    %cst_17 = arith.constant 5.000000e-01 : f32
    %35 = vector.broadcast %cst_17 : f32 to vector<8x128xf32>
    %36 = arith.mulf %35, %34 : vector<8x128xf32>
    %cst_18 = arith.constant 5.000000e-01 : f32
    %37 = vector.broadcast %cst_18 : f32 to vector<8x128xf32>
    %38 = arith.addf %36, %37 : vector<8x128xf32>
    %39 = arith.mulf %28, %8 : vector<8x128xf32>
    %40 = arith.mulf %20, %30 : vector<8x128xf32>
    %41 = arith.addf %39, %40 : vector<8x128xf32>
    %42 = math.tanh %41 : vector<8x128xf32>
    %43 = arith.mulf %38, %42 : vector<8x128xf32>
    %c0_19 = arith.constant 0 : index
    %c0_20 = arith.constant 0 : index
    %44 = vector.load %arg10[%c0_19, %c0_20] : memref<64x128xf32, #tpu.memory_space<vmem>>, vector<8x128xf32>
    tpu.vector_store %arg10[%c0_19, %c0_20], %43 {strides = array<i32>} : memref<64x128xf32, #tpu.memory_space<vmem>>, vector<8x128xf32>,
    %45 = vector.extract_strided_slice %5 {offsets = [8, 0], sizes = [8, 512], strides = [1, 1]} : vector<64x512xf32> to vector<8x512xf32>
    %46 = vector.extract_strided_slice %43 {offsets = [0, 0], sizes = [8, 64], strides = [1, 1]} : vector<8x128xf32> to vector<8x64xf32>
    %cst_21 = arith.constant dense<0.000000e+00> : vector<8x512xf32>
    %47 = tpu.matmul %46, %6, %cst_21 {dimension_numbers = #tpu.dot_dimension_numbers<[1], [0], [0], [1], [0, 0, 1, 1], [], []>} : vector<8x64xf32>, vector<64x512xf32>, vector<8x512xf32> -> vector<8x512xf32>
    %48 = arith.addf %45, %47 : vector<8x512xf32>
    %49 = vector.extract_strided_slice %48 {offsets = [0, 0], sizes = [8, 128], strides = [1, 1]} : vector<8x512xf32> to vector<8x128xf32>
    %cst_22 = arith.constant 5.000000e-01 : f32
    %50 = vector.broadcast %cst_22 : f32 to vector<8x128xf32>
    %51 = arith.mulf %50, %49 : vector<8x128xf32>
    %52 = math.tanh %51 : vector<8x128xf32>
    %cst_23 = arith.constant 5.000000e-01 : f32
    %53 = vector.broadcast %cst_23 : f32 to vector<8x128xf32>
    %54 = arith.mulf %53, %52 : vector<8x128xf32>
    %cst_24 = arith.constant 5.000000e-01 : f32
    %55 = vector.broadcast %cst_24 : f32 to vector<8x128xf32>
    %56 = arith.addf %54, %55 : vector<8x128xf32>
    %57 = vector.extract_strided_slice %48 {offsets = [0, 128], sizes = [8, 128], strides = [1, 1]} : vector<8x512xf32> to vector<8x128xf32>
    %cst_25 = arith.constant 5.000000e-01 : f32
    %58 = vector.broadcast %cst_25 : f32 to vector<8x128xf32>
    %59 = arith.mulf %58, %57 : vector<8x128xf32>
    %60 = math.tanh %59 : vector<8x128xf32>
    %cst_26 = arith.constant 5.000000e-01 : f32
    %61 = vector.broadcast %cst_26 : f32 to vector<8x128xf32>
    %62 = arith.mulf %61, %60 : vector<8x128xf32>
    %cst_27 = arith.constant 5.000000e-01 : f32
    %63 = vector.broadcast %cst_27 : f32 to vector<8x128xf32>
    %64 = arith.addf %62, %63 : vector<8x128xf32>
    %65 = vector.extract_strided_slice %48 {offsets = [0, 256], sizes = [8, 128], strides = [1, 1]} : vector<8x512xf32> to vector<8x128xf32>
    %66 = math.tanh %65 : vector<8x128xf32>
    %67 = vector.extract_strided_slice %48 {offsets = [0, 384], sizes = [8, 128], strides = [1, 1]} : vector<8x512xf32> to vector<8x128xf32>
    %cst_28 = arith.constant 5.000000e-01 : f32
    %68 = vector.broadcast %cst_28 : f32 to vector<8x128xf32>
    %69 = arith.mulf %68, %67 : vector<8x128xf32>
    %70 = math.tanh %69 : vector<8x128xf32>
    %cst_29 = arith.constant 5.000000e-01 : f32
    %71 = vector.broadcast %cst_29 : f32 to vector<8x128xf32>
    %72 = arith.mulf %71, %70 : vector<8x128xf32>
    %cst_30 = arith.constant 5.000000e-01 : f32
    %73 = vector.broadcast %cst_30 : f32 to vector<8x128xf32>
    %74 = arith.addf %72, %73 : vector<8x128xf32>
    %75 = arith.mulf %64, %41 : vector<8x128xf32>
    %76 = arith.mulf %56, %66 : vector<8x128xf32>
    %77 = arith.addf %75, %76 : vector<8x128xf32>
    %78 = math.tanh %77 : vector<8x128xf32>
    %79 = arith.mulf %74, %78 : vector<8x128xf32>
    %c8 = arith.constant 8 : index
    %c0_31 = arith.constant 0 : index
    %80 = vector.load %arg10[%c8, %c0_31] : memref<64x128xf32, #tpu.memory_space<vmem>>, vector<8x128xf32>
    tpu.vector_store %arg10[%c8, %c0_31], %79 {strides = array<i32>} : memref<64x128xf32, #tpu.memory_space<vmem>>, vector<8x128xf32>,
    %81 = vector.extract_strided_slice %5 {offsets = [16, 0], sizes = [8, 512], strides = [1, 1]} : vector<64x512xf32> to vector<8x512xf32>
    %82 = vector.extract_strided_slice %79 {offsets = [0, 0], sizes = [8, 64], strides = [1, 1]} : vector<8x128xf32> to vector<8x64xf32>
    %cst_32 = arith.constant dense<0.000000e+00> : vector<8x512xf32>
    %83 = tpu.matmul %82, %6, %cst_32 {dimension_numbers = #tpu.dot_dimension_numbers<[1], [0], [0], [1], [0, 0, 1, 1], [], []>} : vector<8x64xf32>, vector<64x512xf32>, vector<8x512xf32> -> vector<8x512xf32>
    %84 = arith.addf %81, %83 : vector<8x512xf32>
    %85 = vector.extract_strided_slice %84 {offsets = [0, 0], sizes = [8, 128], strides = [1, 1]} : vector<8x512xf32> to vector<8x128xf32>
    %cst_33 = arith.constant 5.000000e-01 : f32
    %86 = vector.broadcast %cst_33 : f32 to vector<8x128xf32>
    %87 = arith.mulf %86, %85 : vector<8x128xf32>
    %88 = math.tanh %87 : vector<8x128xf32>
    %cst_34 = arith.constant 5.000000e-01 : f32
    %89 = vector.broadcast %cst_34 : f32 to vector<8x128xf32>
    %90 = arith.mulf %89, %88 : vector<8x128xf32>
    %cst_35 = arith.constant 5.000000e-01 : f32
    %91 = vector.broadcast %cst_35 : f32 to vector<8x128xf32>
    %92 = arith.addf %90, %91 : vector<8x128xf32>
    %93 = vector.extract_strided_slice %84 {offsets = [0, 128], sizes = [8, 128], strides = [1, 1]} : vector<8x512xf32> to vector<8x128xf32>
    %cst_36 = arith.constant 5.000000e-01 : f32
    %94 = vector.broadcast %cst_36 : f32 to vector<8x128xf32>
    %95 = arith.mulf %94, %93 : vector<8x128xf32>
    %96 = math.tanh %95 : vector<8x128xf32>
    %cst_37 = arith.constant 5.000000e-01 : f32
    %97 = vector.broadcast %cst_37 : f32 to vector<8x128xf32>
    %98 = arith.mulf %97, %96 : vector<8x128xf32>
    %cst_38 = arith.constant 5.000000e-01 : f32
    %99 = vector.broadcast %cst_38 : f32 to vector<8x128xf32>
    %100 = arith.addf %98, %99 : vector<8x128xf32>
    %101 = vector.extract_strided_slice %84 {offsets = [0, 256], sizes = [8, 128], strides = [1, 1]} : vector<8x512xf32> to vector<8x128xf32>
    %102 = math.tanh %101 : vector<8x128xf32>
    %103 = vector.extract_strided_slice %84 {offsets = [0, 384], sizes = [8, 128], strides = [1, 1]} : vector<8x512xf32> to vector<8x128xf32>
    %cst_39 = arith.constant 5.000000e-01 : f32
    %104 = vector.broadcast %cst_39 : f32 to vector<8x128xf32>
    %105 = arith.mulf %104, %103 : vector<8x128xf32>
    %106 = math.tanh %105 : vector<8x128xf32>
    %cst_40 = arith.constant 5.000000e-01 : f32
    %107 = vector.broadcast %cst_40 : f32 to vector<8x128xf32>
    %108 = arith.mulf %107, %106 : vector<8x128xf32>
    %cst_41 = arith.constant 5.000000e-01 : f32
    %109 = vector.broadcast %cst_41 : f32 to vector<8x128xf32>
    %110 = arith.addf %108, %109 : vector<8x128xf32>
    %111 = arith.mulf %100, %77 : vector<8x128xf32>
    %112 = arith.mulf %92, %102 : vector<8x128xf32>
    %113 = arith.addf %111, %112 : vector<8x128xf32>
    %114 = math.tanh %113 : vector<8x128xf32>
    %115 = arith.mulf %110, %114 : vector<8x128xf32>
    %c16 = arith.constant 16 : index
    %c0_42 = arith.constant 0 : index
    %116 = vector.load %arg10[%c16, %c0_42] : memref<64x128xf32, #tpu.memory_space<vmem>>, vector<8x128xf32>
    tpu.vector_store %arg10[%c16, %c0_42], %115 {strides = array<i32>} : memref<64x128xf32, #tpu.memory_space<vmem>>, vector<8x128xf32>,
    %117 = vector.extract_strided_slice %5 {offsets = [24, 0], sizes = [8, 512], strides = [1, 1]} : vector<64x512xf32> to vector<8x512xf32>
    %118 = vector.extract_strided_slice %115 {offsets = [0, 0], sizes = [8, 64], strides = [1, 1]} : vector<8x128xf32> to vector<8x64xf32>
    %cst_43 = arith.constant dense<0.000000e+00> : vector<8x512xf32>
    %119 = tpu.matmul %118, %6, %cst_43 {dimension_numbers = #tpu.dot_dimension_numbers<[1], [0], [0], [1], [0, 0, 1, 1], [], []>} : vector<8x64xf32>, vector<64x512xf32>, vector<8x512xf32> -> vector<8x512xf32>
    %120 = arith.addf %117, %119 : vector<8x512xf32>
    %121 = vector.extract_strided_slice %120 {offsets = [0, 0], sizes = [8, 128], strides = [1, 1]} : vector<8x512xf32> to vector<8x128xf32>
    %cst_44 = arith.constant 5.000000e-01 : f32
    %122 = vector.broadcast %cst_44 : f32 to vector<8x128xf32>
    %123 = arith.mulf %122, %121 : vector<8x128xf32>
    %124 = math.tanh %123 : vector<8x128xf32>
    %cst_45 = arith.constant 5.000000e-01 : f32
    %125 = vector.broadcast %cst_45 : f32 to vector<8x128xf32>
    %126 = arith.mulf %125, %124 : vector<8x128xf32>
    %cst_46 = arith.constant 5.000000e-01 : f32
    %127 = vector.broadcast %cst_46 : f32 to vector<8x128xf32>
    %128 = arith.addf %126, %127 : vector<8x128xf32>
    %129 = vector.extract_strided_slice %120 {offsets = [0, 128], sizes = [8, 128], strides = [1, 1]} : vector<8x512xf32> to vector<8x128xf32>
    %cst_47 = arith.constant 5.000000e-01 : f32
    %130 = vector.broadcast %cst_47 : f32 to vector<8x128xf32>
    %131 = arith.mulf %130, %129 : vector<8x128xf32>
    %132 = math.tanh %131 : vector<8x128xf32>
    %cst_48 = arith.constant 5.000000e-01 : f32
    %133 = vector.broadcast %cst_48 : f32 to vector<8x128xf32>
    %134 = arith.mulf %133, %132 : vector<8x128xf32>
    %cst_49 = arith.constant 5.000000e-01 : f32
    %135 = vector.broadcast %cst_49 : f32 to vector<8x128xf32>
    %136 = arith.addf %134, %135 : vector<8x128xf32>
    %137 = vector.extract_strided_slice %120 {offsets = [0, 256], sizes = [8, 128], strides = [1, 1]} : vector<8x512xf32> to vector<8x128xf32>
    %138 = math.tanh %137 : vector<8x128xf32>
    %139 = vector.extract_strided_slice %120 {offsets = [0, 384], sizes = [8, 128], strides = [1, 1]} : vector<8x512xf32> to vector<8x128xf32>
    %cst_50 = arith.constant 5.000000e-01 : f32
    %140 = vector.broadcast %cst_50 : f32 to vector<8x128xf32>
    %141 = arith.mulf %140, %139 : vector<8x128xf32>
    %142 = math.tanh %141 : vector<8x128xf32>
    %cst_51 = arith.constant 5.000000e-01 : f32
    %143 = vector.broadcast %cst_51 : f32 to vector<8x128xf32>
    %144 = arith.mulf %143, %142 : vector<8x128xf32>
    %cst_52 = arith.constant 5.000000e-01 : f32
    %145 = vector.broadcast %cst_52 : f32 to vector<8x128xf32>
    %146 = arith.addf %144, %145 : vector<8x128xf32>
    %147 = arith.mulf %136, %113 : vector<8x128xf32>
    %148 = arith.mulf %128, %138 : vector<8x128xf32>
    %149 = arith.addf %147, %148 : vector<8x128xf32>
    %150 = math.tanh %149 : vector<8x128xf32>
    %151 = arith.mulf %146, %150 : vector<8x128xf32>
    %c24 = arith.constant 24 : index
    %c0_53 = arith.constant 0 : index
    %152 = vector.load %arg10[%c24, %c0_53] : memref<64x128xf32, #tpu.memory_space<vmem>>, vector<8x128xf32>
    tpu.vector_store %arg10[%c24, %c0_53], %151 {strides = array<i32>} : memref<64x128xf32, #tpu.memory_space<vmem>>, vector<8x128xf32>,
    %153 = vector.extract_strided_slice %5 {offsets = [32, 0], sizes = [8, 512], strides = [1, 1]} : vector<64x512xf32> to vector<8x512xf32>
    %154 = vector.extract_strided_slice %151 {offsets = [0, 0], sizes = [8, 64], strides = [1, 1]} : vector<8x128xf32> to vector<8x64xf32>
    %cst_54 = arith.constant dense<0.000000e+00> : vector<8x512xf32>
    %155 = tpu.matmul %154, %6, %cst_54 {dimension_numbers = #tpu.dot_dimension_numbers<[1], [0], [0], [1], [0, 0, 1, 1], [], []>} : vector<8x64xf32>, vector<64x512xf32>, vector<8x512xf32> -> vector<8x512xf32>
    %156 = arith.addf %153, %155 : vector<8x512xf32>
    %157 = vector.extract_strided_slice %156 {offsets = [0, 0], sizes = [8, 128], strides = [1, 1]} : vector<8x512xf32> to vector<8x128xf32>
    %cst_55 = arith.constant 5.000000e-01 : f32
    %158 = vector.broadcast %cst_55 : f32 to vector<8x128xf32>
    %159 = arith.mulf %158, %157 : vector<8x128xf32>
    %160 = math.tanh %159 : vector<8x128xf32>
    %cst_56 = arith.constant 5.000000e-01 : f32
    %161 = vector.broadcast %cst_56 : f32 to vector<8x128xf32>
    %162 = arith.mulf %161, %160 : vector<8x128xf32>
    %cst_57 = arith.constant 5.000000e-01 : f32
    %163 = vector.broadcast %cst_57 : f32 to vector<8x128xf32>
    %164 = arith.addf %162, %163 : vector<8x128xf32>
    %165 = vector.extract_strided_slice %156 {offsets = [0, 128], sizes = [8, 128], strides = [1, 1]} : vector<8x512xf32> to vector<8x128xf32>
    %cst_58 = arith.constant 5.000000e-01 : f32
    %166 = vector.broadcast %cst_58 : f32 to vector<8x128xf32>
    %167 = arith.mulf %166, %165 : vector<8x128xf32>
    %168 = math.tanh %167 : vector<8x128xf32>
    %cst_59 = arith.constant 5.000000e-01 : f32
    %169 = vector.broadcast %cst_59 : f32 to vector<8x128xf32>
    %170 = arith.mulf %169, %168 : vector<8x128xf32>
    %cst_60 = arith.constant 5.000000e-01 : f32
    %171 = vector.broadcast %cst_60 : f32 to vector<8x128xf32>
    %172 = arith.addf %170, %171 : vector<8x128xf32>
    %173 = vector.extract_strided_slice %156 {offsets = [0, 256], sizes = [8, 128], strides = [1, 1]} : vector<8x512xf32> to vector<8x128xf32>
    %174 = math.tanh %173 : vector<8x128xf32>
    %175 = vector.extract_strided_slice %156 {offsets = [0, 384], sizes = [8, 128], strides = [1, 1]} : vector<8x512xf32> to vector<8x128xf32>
    %cst_61 = arith.constant 5.000000e-01 : f32
    %176 = vector.broadcast %cst_61 : f32 to vector<8x128xf32>
    %177 = arith.mulf %176, %175 : vector<8x128xf32>
    %178 = math.tanh %177 : vector<8x128xf32>
    %cst_62 = arith.constant 5.000000e-01 : f32
    %179 = vector.broadcast %cst_62 : f32 to vector<8x128xf32>
    %180 = arith.mulf %179, %178 : vector<8x128xf32>
    %cst_63 = arith.constant 5.000000e-01 : f32
    %181 = vector.broadcast %cst_63 : f32 to vector<8x128xf32>
    %182 = arith.addf %180, %181 : vector<8x128xf32>
    %183 = arith.mulf %172, %149 : vector<8x128xf32>
    %184 = arith.mulf %164, %174 : vector<8x128xf32>
    %185 = arith.addf %183, %184 : vector<8x128xf32>
    %186 = math.tanh %185 : vector<8x128xf32>
    %187 = arith.mulf %182, %186 : vector<8x128xf32>
    %c32 = arith.constant 32 : index
    %c0_64 = arith.constant 0 : index
    %188 = vector.load %arg10[%c32, %c0_64] : memref<64x128xf32, #tpu.memory_space<vmem>>, vector<8x128xf32>
    tpu.vector_store %arg10[%c32, %c0_64], %187 {strides = array<i32>} : memref<64x128xf32, #tpu.memory_space<vmem>>, vector<8x128xf32>,
    %189 = vector.extract_strided_slice %5 {offsets = [40, 0], sizes = [8, 512], strides = [1, 1]} : vector<64x512xf32> to vector<8x512xf32>
    %190 = vector.extract_strided_slice %187 {offsets = [0, 0], sizes = [8, 64], strides = [1, 1]} : vector<8x128xf32> to vector<8x64xf32>
    %cst_65 = arith.constant dense<0.000000e+00> : vector<8x512xf32>
    %191 = tpu.matmul %190, %6, %cst_65 {dimension_numbers = #tpu.dot_dimension_numbers<[1], [0], [0], [1], [0, 0, 1, 1], [], []>} : vector<8x64xf32>, vector<64x512xf32>, vector<8x512xf32> -> vector<8x512xf32>
    %192 = arith.addf %189, %191 : vector<8x512xf32>
    %193 = vector.extract_strided_slice %192 {offsets = [0, 0], sizes = [8, 128], strides = [1, 1]} : vector<8x512xf32> to vector<8x128xf32>
    %cst_66 = arith.constant 5.000000e-01 : f32
    %194 = vector.broadcast %cst_66 : f32 to vector<8x128xf32>
    %195 = arith.mulf %194, %193 : vector<8x128xf32>
    %196 = math.tanh %195 : vector<8x128xf32>
    %cst_67 = arith.constant 5.000000e-01 : f32
    %197 = vector.broadcast %cst_67 : f32 to vector<8x128xf32>
    %198 = arith.mulf %197, %196 : vector<8x128xf32>
    %cst_68 = arith.constant 5.000000e-01 : f32
    %199 = vector.broadcast %cst_68 : f32 to vector<8x128xf32>
    %200 = arith.addf %198, %199 : vector<8x128xf32>
    %201 = vector.extract_strided_slice %192 {offsets = [0, 128], sizes = [8, 128], strides = [1, 1]} : vector<8x512xf32> to vector<8x128xf32>
    %cst_69 = arith.constant 5.000000e-01 : f32
    %202 = vector.broadcast %cst_69 : f32 to vector<8x128xf32>
    %203 = arith.mulf %202, %201 : vector<8x128xf32>
    %204 = math.tanh %203 : vector<8x128xf32>
    %cst_70 = arith.constant 5.000000e-01 : f32
    %205 = vector.broadcast %cst_70 : f32 to vector<8x128xf32>
    %206 = arith.mulf %205, %204 : vector<8x128xf32>
    %cst_71 = arith.constant 5.000000e-01 : f32
    %207 = vector.broadcast %cst_71 : f32 to vector<8x128xf32>
    %208 = arith.addf %206, %207 : vector<8x128xf32>
    %209 = vector.extract_strided_slice %192 {offsets = [0, 256], sizes = [8, 128], strides = [1, 1]} : vector<8x512xf32> to vector<8x128xf32>
    %210 = math.tanh %209 : vector<8x128xf32>
    %211 = vector.extract_strided_slice %192 {offsets = [0, 384], sizes = [8, 128], strides = [1, 1]} : vector<8x512xf32> to vector<8x128xf32>
    %cst_72 = arith.constant 5.000000e-01 : f32
    %212 = vector.broadcast %cst_72 : f32 to vector<8x128xf32>
    %213 = arith.mulf %212, %211 : vector<8x128xf32>
    %214 = math.tanh %213 : vector<8x128xf32>
    %cst_73 = arith.constant 5.000000e-01 : f32
    %215 = vector.broadcast %cst_73 : f32 to vector<8x128xf32>
    %216 = arith.mulf %215, %214 : vector<8x128xf32>
    %cst_74 = arith.constant 5.000000e-01 : f32
    %217 = vector.broadcast %cst_74 : f32 to vector<8x128xf32>
    %218 = arith.addf %216, %217 : vector<8x128xf32>
    %219 = arith.mulf %208, %185 : vector<8x128xf32>
    %220 = arith.mulf %200, %210 : vector<8x128xf32>
    %221 = arith.addf %219, %220 : vector<8x128xf32>
    %222 = math.tanh %221 : vector<8x128xf32>
    %223 = arith.mulf %218, %222 : vector<8x128xf32>
    %c40 = arith.constant 40 : index
    %c0_75 = arith.constant 0 : index
    %224 = vector.load %arg10[%c40, %c0_75] : memref<64x128xf32, #tpu.memory_space<vmem>>, vector<8x128xf32>
    tpu.vector_store %arg10[%c40, %c0_75], %223 {strides = array<i32>} : memref<64x128xf32, #tpu.memory_space<vmem>>, vector<8x128xf32>,
    %225 = vector.extract_strided_slice %5 {offsets = [48, 0], sizes = [8, 512], strides = [1, 1]} : vector<64x512xf32> to vector<8x512xf32>
    %226 = vector.extract_strided_slice %223 {offsets = [0, 0], sizes = [8, 64], strides = [1, 1]} : vector<8x128xf32> to vector<8x64xf32>
    %cst_76 = arith.constant dense<0.000000e+00> : vector<8x512xf32>
    %227 = tpu.matmul %226, %6, %cst_76 {dimension_numbers = #tpu.dot_dimension_numbers<[1], [0], [0], [1], [0, 0, 1, 1], [], []>} : vector<8x64xf32>, vector<64x512xf32>, vector<8x512xf32> -> vector<8x512xf32>
    %228 = arith.addf %225, %227 : vector<8x512xf32>
    %229 = vector.extract_strided_slice %228 {offsets = [0, 0], sizes = [8, 128], strides = [1, 1]} : vector<8x512xf32> to vector<8x128xf32>
    %cst_77 = arith.constant 5.000000e-01 : f32
    %230 = vector.broadcast %cst_77 : f32 to vector<8x128xf32>
    %231 = arith.mulf %230, %229 : vector<8x128xf32>
    %232 = math.tanh %231 : vector<8x128xf32>
    %cst_78 = arith.constant 5.000000e-01 : f32
    %233 = vector.broadcast %cst_78 : f32 to vector<8x128xf32>
    %234 = arith.mulf %233, %232 : vector<8x128xf32>
    %cst_79 = arith.constant 5.000000e-01 : f32
    %235 = vector.broadcast %cst_79 : f32 to vector<8x128xf32>
    %236 = arith.addf %234, %235 : vector<8x128xf32>
    %237 = vector.extract_strided_slice %228 {offsets = [0, 128], sizes = [8, 128], strides = [1, 1]} : vector<8x512xf32> to vector<8x128xf32>
    %cst_80 = arith.constant 5.000000e-01 : f32
    %238 = vector.broadcast %cst_80 : f32 to vector<8x128xf32>
    %239 = arith.mulf %238, %237 : vector<8x128xf32>
    %240 = math.tanh %239 : vector<8x128xf32>
    %cst_81 = arith.constant 5.000000e-01 : f32
    %241 = vector.broadcast %cst_81 : f32 to vector<8x128xf32>
    %242 = arith.mulf %241, %240 : vector<8x128xf32>
    %cst_82 = arith.constant 5.000000e-01 : f32
    %243 = vector.broadcast %cst_82 : f32 to vector<8x128xf32>
    %244 = arith.addf %242, %243 : vector<8x128xf32>
    %245 = vector.extract_strided_slice %228 {offsets = [0, 256], sizes = [8, 128], strides = [1, 1]} : vector<8x512xf32> to vector<8x128xf32>
    %246 = math.tanh %245 : vector<8x128xf32>
    %247 = vector.extract_strided_slice %228 {offsets = [0, 384], sizes = [8, 128], strides = [1, 1]} : vector<8x512xf32> to vector<8x128xf32>
    %cst_83 = arith.constant 5.000000e-01 : f32
    %248 = vector.broadcast %cst_83 : f32 to vector<8x128xf32>
    %249 = arith.mulf %248, %247 : vector<8x128xf32>
    %250 = math.tanh %249 : vector<8x128xf32>
    %cst_84 = arith.constant 5.000000e-01 : f32
    %251 = vector.broadcast %cst_84 : f32 to vector<8x128xf32>
    %252 = arith.mulf %251, %250 : vector<8x128xf32>
    %cst_85 = arith.constant 5.000000e-01 : f32
    %253 = vector.broadcast %cst_85 : f32 to vector<8x128xf32>
    %254 = arith.addf %252, %253 : vector<8x128xf32>
    %255 = arith.mulf %244, %221 : vector<8x128xf32>
    %256 = arith.mulf %236, %246 : vector<8x128xf32>
    %257 = arith.addf %255, %256 : vector<8x128xf32>
    %258 = math.tanh %257 : vector<8x128xf32>
    %259 = arith.mulf %254, %258 : vector<8x128xf32>
    %c48 = arith.constant 48 : index
    %c0_86 = arith.constant 0 : index
    %260 = vector.load %arg10[%c48, %c0_86] : memref<64x128xf32, #tpu.memory_space<vmem>>, vector<8x128xf32>
    tpu.vector_store %arg10[%c48, %c0_86], %259 {strides = array<i32>} : memref<64x128xf32, #tpu.memory_space<vmem>>, vector<8x128xf32>,
    %261 = vector.extract_strided_slice %5 {offsets = [56, 0], sizes = [8, 512], strides = [1, 1]} : vector<64x512xf32> to vector<8x512xf32>
    %262 = vector.extract_strided_slice %259 {offsets = [0, 0], sizes = [8, 64], strides = [1, 1]} : vector<8x128xf32> to vector<8x64xf32>
    %cst_87 = arith.constant dense<0.000000e+00> : vector<8x512xf32>
    %263 = tpu.matmul %262, %6, %cst_87 {dimension_numbers = #tpu.dot_dimension_numbers<[1], [0], [0], [1], [0, 0, 1, 1], [], []>} : vector<8x64xf32>, vector<64x512xf32>, vector<8x512xf32> -> vector<8x512xf32>
    %264 = arith.addf %261, %263 : vector<8x512xf32>
    %265 = vector.extract_strided_slice %264 {offsets = [0, 0], sizes = [8, 128], strides = [1, 1]} : vector<8x512xf32> to vector<8x128xf32>
    %cst_88 = arith.constant 5.000000e-01 : f32
    %266 = vector.broadcast %cst_88 : f32 to vector<8x128xf32>
    %267 = arith.mulf %266, %265 : vector<8x128xf32>
    %268 = math.tanh %267 : vector<8x128xf32>
    %cst_89 = arith.constant 5.000000e-01 : f32
    %269 = vector.broadcast %cst_89 : f32 to vector<8x128xf32>
    %270 = arith.mulf %269, %268 : vector<8x128xf32>
    %cst_90 = arith.constant 5.000000e-01 : f32
    %271 = vector.broadcast %cst_90 : f32 to vector<8x128xf32>
    %272 = arith.addf %270, %271 : vector<8x128xf32>
    %273 = vector.extract_strided_slice %264 {offsets = [0, 128], sizes = [8, 128], strides = [1, 1]} : vector<8x512xf32> to vector<8x128xf32>
    %cst_91 = arith.constant 5.000000e-01 : f32
    %274 = vector.broadcast %cst_91 : f32 to vector<8x128xf32>
    %275 = arith.mulf %274, %273 : vector<8x128xf32>
    %276 = math.tanh %275 : vector<8x128xf32>
    %cst_92 = arith.constant 5.000000e-01 : f32
    %277 = vector.broadcast %cst_92 : f32 to vector<8x128xf32>
    %278 = arith.mulf %277, %276 : vector<8x128xf32>
    %cst_93 = arith.constant 5.000000e-01 : f32
    %279 = vector.broadcast %cst_93 : f32 to vector<8x128xf32>
    %280 = arith.addf %278, %279 : vector<8x128xf32>
    %281 = vector.extract_strided_slice %264 {offsets = [0, 256], sizes = [8, 128], strides = [1, 1]} : vector<8x512xf32> to vector<8x128xf32>
    %282 = math.tanh %281 : vector<8x128xf32>
    %283 = vector.extract_strided_slice %264 {offsets = [0, 384], sizes = [8, 128], strides = [1, 1]} : vector<8x512xf32> to vector<8x128xf32>
    %cst_94 = arith.constant 5.000000e-01 : f32
    %284 = vector.broadcast %cst_94 : f32 to vector<8x128xf32>
    %285 = arith.mulf %284, %283 : vector<8x128xf32>
    %286 = math.tanh %285 : vector<8x128xf32>
    %cst_95 = arith.constant 5.000000e-01 : f32
    %287 = vector.broadcast %cst_95 : f32 to vector<8x128xf32>
    %288 = arith.mulf %287, %286 : vector<8x128xf32>
    %cst_96 = arith.constant 5.000000e-01 : f32
    %289 = vector.broadcast %cst_96 : f32 to vector<8x128xf32>
    %290 = arith.addf %288, %289 : vector<8x128xf32>
    %291 = arith.mulf %280, %257 : vector<8x128xf32>
    %292 = arith.mulf %272, %282 : vector<8x128xf32>
    %293 = arith.addf %291, %292 : vector<8x128xf32>
    %294 = math.tanh %293 : vector<8x128xf32>
    %295 = arith.mulf %290, %294 : vector<8x128xf32>
    %c56 = arith.constant 56 : index
    %c0_97 = arith.constant 0 : index
    %296 = vector.load %arg10[%c56, %c0_97] : memref<64x128xf32, #tpu.memory_space<vmem>>, vector<8x128xf32>
    tpu.vector_store %arg10[%c56, %c0_97], %295 {strides = array<i32>} : memref<64x128xf32, #tpu.memory_space<vmem>>, vector<8x128xf32>,
    %c0_98 = arith.constant 0 : index
    %c0_99 = arith.constant 0 : index
    %297 = vector.load %arg10[%c0_98, %c0_99] : memref<64x128xf32, #tpu.memory_space<vmem>>, vector<64x128xf32>
    %c0_100 = arith.constant 0 : index
    %c0_101 = arith.constant 0 : index
    %298 = vector.load %arg5[%c0_100, %c0_101] : memref<128x1024xf32, #tpu.memory_space<vmem>>, vector<128x1024xf32>
    %cst_102 = arith.constant dense<0.000000e+00> : vector<64x1024xf32>
    %299 = tpu.matmul %297, %298, %cst_102 {dimension_numbers = #tpu.dot_dimension_numbers<[1], [0], [0], [1], [0, 0, 1, 1], [], []>} : vector<64x128xf32>, vector<128x1024xf32>, vector<64x1024xf32> -> vector<64x1024xf32>
    %c0_103 = arith.constant 0 : index
    %c0_104 = arith.constant 0 : index
    %300 = vector.load %arg6[%c0_103, %c0_104] : memref<1x1024xf32, #tpu.memory_space<vmem>>, vector<1x1024xf32>
    %301 = vector.broadcast %300 : vector<1x1024xf32> to vector<64x1024xf32>
    %302 = arith.addf %299, %301 : vector<64x1024xf32>
    %cst_105 = arith.constant 0.00999999977 : f32
    %303 = vector.broadcast %cst_105 : f32 to vector<64x1024xf32>
    %304 = arith.mulf %303, %302 : vector<64x1024xf32>
    %305 = arith.maximumf %302, %304 : vector<64x1024xf32>
    %c0_106 = arith.constant 0 : index
    %c0_107 = arith.constant 0 : index
    %306 = vector.load %arg7[%c0_106, %c0_107] : memref<1024x128xf32, #tpu.memory_space<vmem>>, vector<1024x128xf32>
    %cst_108 = arith.constant dense<0.000000e+00> : vector<64x128xf32>
    %307 = tpu.matmul %305, %306, %cst_108 {dimension_numbers = #tpu.dot_dimension_numbers<[1], [0], [0], [1], [0, 0, 1, 1], [], []>} : vector<64x1024xf32>, vector<1024x128xf32>, vector<64x128xf32> -> vector<64x128xf32>
    %c0_109 = arith.constant 0 : index
    %c0_110 = arith.constant 0 : index
    %308 = vector.load %arg8[%c0_109, %c0_110] : memref<1x128xf32, #tpu.memory_space<vmem>>, vector<1x128xf32>
    %309 = vector.broadcast %308 : vector<1x128xf32> to vector<64x128xf32>
    %310 = arith.addf %307, %309 : vector<64x128xf32>
    %cst_111 = arith.constant 5.000000e-01 : f32
    %311 = vector.broadcast %cst_111 : f32 to vector<64x128xf32>
    %312 = arith.mulf %311, %310 : vector<64x128xf32>
    %313 = math.tanh %312 : vector<64x128xf32>
    %cst_112 = arith.constant 5.000000e-01 : f32
    %314 = vector.broadcast %cst_112 : f32 to vector<64x128xf32>
    %315 = arith.mulf %314, %313 : vector<64x128xf32>
    %cst_113 = arith.constant 5.000000e-01 : f32
    %316 = vector.broadcast %cst_113 : f32 to vector<64x128xf32>
    %317 = arith.addf %315, %316 : vector<64x128xf32>
    %c0_114 = arith.constant 0 : index
    %c0_115 = arith.constant 0 : index
    %318 = vector.load %arg9[%c0_114, %c0_115] : memref<64x128xf32, #tpu.memory_space<vmem>>, vector<64x128xf32>
    tpu.vector_store %arg9[%c0_114, %c0_115], %317 {strides = array<i32>} : memref<64x128xf32, #tpu.memory_space<vmem>>, vector<64x128xf32>,
    return
  }
  func.func @transform_0(%arg0: i32) -> (i32, i32) {
    %c0_i32 = arith.constant 0 : i32
    %c0_i32_0 = arith.constant 0 : i32
    %c0_i32_1 = arith.constant 0 : i32
    return %c0_i32, %c0_i32_0 : i32, i32
  }
  func.func @transform_1(%arg0: i32) -> (i32, i32) {
    %c0_i32 = arith.constant 0 : i32
    %c0_i32_0 = arith.constant 0 : i32
    %c0_i32_1 = arith.constant 0 : i32
    return %c0_i32, %c0_i32_0 : i32, i32
  }
  func.func @transform_2(%arg0: i32) -> (i32, i32) {
    %c0_i32 = arith.constant 0 : i32
    %c0_i32_0 = arith.constant 0 : i32
    %c0_i32_1 = arith.constant 0 : i32
    return %c0_i32, %c0_i32_0 : i32, i32
  }
  func.func @transform_3(%arg0: i32) -> (i32, i32) {
    %c0_i32 = arith.constant 0 : i32
    %c0_i32_0 = arith.constant 0 : i32
    %c0_i32_1 = arith.constant 0 : i32
    return %c0_i32, %c0_i32_0 : i32, i32
  }
  func.func @transform_4(%arg0: i32) -> (i32, i32) {
    %c0_i32 = arith.constant 0 : i32
    %c0_i32_0 = arith.constant 0 : i32
    %c0_i32_1 = arith.constant 0 : i32
    return %c0_i32, %c0_i32_0 : i32, i32
  }
  func.func @transform_5(%arg0: i32) -> (i32, i32) {
    %c0_i32 = arith.constant 0 : i32
    %c0_i32_0 = arith.constant 0 : i32
    %c0_i32_1 = arith.constant 0 : i32
    return %c0_i32, %c0_i32_0 : i32, i32
  }
  func.func @transform_6(%arg0: i32) -> (i32, i32) {
    %c0_i32 = arith.constant 0 : i32
    %c0_i32_0 = arith.constant 0 : i32
    %c0_i32_1 = arith.constant 0 : i32
    return %c0_i32, %c0_i32_0 : i32, i32
  }
  func.func @transform_7(%arg0: i32) -> (i32, i32) {
    %c0_i32 = arith.constant 0 : i32
    %c0_i32_0 = arith.constant 0 : i32
    %c0_i32_1 = arith.constant 0 : i32
    return %c0_i32, %c0_i32_0 : i32, i32
  }
  func.func @transform_8(%arg0: i32) -> (i32, i32) {
    %c0_i32 = arith.constant 0 : i32
    %c0_i32_0 = arith.constant 0 : i32
    %c0_i32_1 = arith.constant 0 : i32
    return %c0_i32, %c0_i32_0 : i32, i32
  }
}

</mosaic_0001>

<bundles_post_ra>
// kernel: tpu_custom_call.1
= control target key start
LH: loop header
LB: loop body
LE: loop exit
PB: predicated region body
PF: predicated region fallthrough
CT: control target
= control target key end

     0   :  { %13 = vsyncpa [#allocation4], 0  ;;  %s5145_s0 = inlined_call_operand.vmem [shape: f32[64,32], index: 0, kind: input, shape index: {}]   ;;  %s5146_s1 = inlined_call_operand.hbm [shape: f32[32,512], index: 1, kind: input, shape index: {}]   ;;  %s5147_s2 = inlined_call_operand.hbm [shape: f32[64,512], index: 2, kind: input, shape index: {}]   ;;  %s5148_s3 = inlined_call_operand.vmem [shape: f32[1,512], index: 3, kind: input, shape index: {}]   ;;  %s5149_s4 = inlined_call_operand.hbm [shape: f32[128,1024], index: 4, kind: input, shape index: {}]   ;;  %s5150_s5 = inlined_call_operand.vmem [shape: f32[1,1024], index: 5, kind: input, shape index: {}]   ;;  %s5151_s6 = inlined_call_operand.hbm [shape: f32[1024,128], index: 6, kind: input, shape index: {}]   ;;  %s5152_s7 = inlined_call_operand.vmem [shape: f32[1,128], index: 7, kind: input, shape index: {}]   ;;  %s5153_s8 = inlined_call_operand.hbm [shape: f32[64,128], index: 8, kind: output, shape index: {}]  }
   0x1   :  { %14 = vsyncpa [#allocation7], 0 }
   0x2   :  { %15 = vsyncpa [#allocation10], 0 }
   0x3   :  { %16 = vsyncpa [#allocation5], 0  ;;  %s4204_s27 = smov [#allocation6]   ;;  %s4205_s29 = smov [#allocation3]  }
   0x4   :  { %s36_s28 = sshll.u32 %s4204_s27, 4  ;;  %s24_s30 = sshll.u32 %s4205_s29, 4  ;;  %s37_s28 = int_to_ptr.vmem [resolvable:$true] %s36_s28  ;;  %s4261_s30 = int_to_ptr.vmem [resolvable:$true] %s24_s30 }
   0x5   :  { %s4086_s11 = scalar_lea.hbm %s5147_s2, 4096 }
   0x6   :  { %p4087_p0 = scmp.ne.s32.totalorder %s5147_s2, %s4086_s11  ;;  %p4090_p1 = scmp.lt.u32.totalorder %s4086_s11, %s5147_s2 }
   0x8   :  { %p4092_p2 = pnand %p4090_p1, %p4087_p0 }
   0xa   :  { %4095 = shalt.err (!%p4092_p2)
}
   0xb   :  { %s4096_s16 = scalar_lea.vmem %s37_s28, 4096  ;;  %p4101_p4 = scmp.lt.s32.totalorder %s37_s28, %s37_s28 }
   0xc   :  { %p4097_p3 = scmp.ne.s32.totalorder %s37_s28, %s4096_s16  ;;  %p4102_p5 = scmp.lt.s32.totalorder %s4096_s16, %s4096_s16 }
   0xe   :  { %p4103_p6 = por %p4102_p5, %p4101_p4 }
  0x10   :  { %p4104_p7 = pnand %p4103_p6, %p4097_p3 }
  0x12   :  { %4107 = shalt.err (!%p4104_p7)
}
  0x13   :  { %s4206_s17 = smov 512   ;;  %s4207_s18 = smov 32  }
  0x14   :  { %42 = dma.hbm_to_vmem [thread:$0]  %s5147_s2, 4096, %s37_s28, [#allocation7], %s4206_s17, %s4206_s17, %s4207_s18  }
  0x15   :  { %s4108_s23 = scalar_lea.hbm %s5146_s1, 2048 }
  0x16   :  { %p4109_p8 = scmp.ne.s32.totalorder %s5146_s1, %s4108_s23  ;;  %p4112_p9 = scmp.lt.u32.totalorder %s4108_s23, %s5146_s1 }
  0x18   :  { %p4114_p10 = pnand %p4112_p9, %p4109_p8 }
  0x1a   :  { %4117 = shalt.err (!%p4114_p10)
}
  0x1b   :  { %s4118_s29 = scalar_lea.vmem %s4261_s30, 2048  ;;  %p4123_p12 = scmp.lt.s32.totalorder %s4261_s30, %s4261_s30 }
  0x1c   :  { %p4119_p11 = scmp.ne.s32.totalorder %s4261_s30, %s4118_s29  ;;  %p4124_p13 = scmp.lt.s32.totalorder %s4118_s29, %s4118_s29 }
  0x1e   :  { %p4125_p0 = por %p4124_p13, %p4123_p12 }
  0x20   :  { %p4126_p1 = pnand %p4125_p0, %p4119_p11 }
  0x22   :  { %4129 = shalt.err (!%p4126_p1)
}
  0x23   :  { %30 = dma.hbm_to_vmem [thread:$0]  %s5146_s1, 2048, %s4261_s30, [#allocation4], %s4206_s17, %s4206_s17, %s4207_s18  }
  0x24   :  { %s4208_s9 = smov [#allocation8]   ;;  %s4130_s13 = scalar_lea.hbm %s5149_s4, 16384 }
  0x25   :  { %s50_s10 = sshll.u32 %s4208_s9, 4  ;;  %p4131_p2 = scmp.ne.s32.totalorder %s5149_s4, %s4130_s13  ;;  %s51_s10 = int_to_ptr.vmem [resolvable:$true] %s50_s10 }
  0x26   :  { %p4134_p3 = scmp.lt.u32.totalorder %s4130_s13, %s5149_s4 }
  0x28   :  { %p4136_p4 = pnand %p4134_p3, %p4131_p2 }
  0x2a   :  { %4139 = shalt.err (!%p4136_p4)
}
  0x2b   :  { %s4140_s20 = scalar_lea.vmem %s51_s10, 16384  ;;  %p4145_p6 = scmp.lt.s32.totalorder %s51_s10, %s51_s10 }
  0x2c   :  { %p4141_p5 = scmp.ne.s32.totalorder %s51_s10, %s4140_s20  ;;  %p4146_p7 = scmp.lt.s32.totalorder %s4140_s20, %s4140_s20 }
  0x2e   :  { %p4147_p8 = por %p4146_p7, %p4145_p6 }
  0x30   :  { %p4148_p9 = pnand %p4147_p8, %p4141_p5 }
  0x32   :  { %4151 = shalt.err (!%p4148_p9)
}
  0x33   :  { %s4209_s1 = smov 1024   ;;  %s4210_s30 = smov 64  }
  0x34   :  { %56 = dma.hbm_to_vmem [thread:$0]  %s5149_s4, 16384, %s51_s10, [#allocation7], %s4209_s1, %s4209_s1, %s4210_s30  }
  0x35   :  { %s4211_s21 = smov [#allocation9]   ;;  %s4152_s25 = scalar_lea.hbm %s5151_s6, 16384 }
  0x36   :  { %s64_s22 = sshll.u32 %s4211_s21, 4  ;;  %p4153_p10 = scmp.ne.s32.totalorder %s5151_s6, %s4152_s25  ;;  %s65_s22 = int_to_ptr.vmem [resolvable:$true] %s64_s22 }
  0x37   :  { %p4156_p11 = scmp.lt.u32.totalorder %s4152_s25, %s5151_s6 }
  0x39   :  { %p4158_p12 = pnand %p4156_p11, %p4153_p10 }
  0x3b   :  { %4161 = shalt.err (!%p4158_p12)
}
  0x3c   :  { %s4162_s28 = scalar_lea.vmem %s65_s22, 16384  ;;  %p4167_p0 = scmp.lt.s32.totalorder %s65_s22, %s65_s22 }
  0x3d   :  { %p4163_p13 = scmp.ne.s32.totalorder %s65_s22, %s4162_s28  ;;  %p4168_p1 = scmp.lt.s32.totalorder %s4162_s28, %s4162_s28 }
  0x3f   :  { %p4169_p2 = por %p4168_p1, %p4167_p0 }
  0x41   :  { %p4170_p3 = pnand %p4169_p2, %p4163_p13 }
  0x43   :  { %4173 = shalt.err (!%p4170_p3)
}
  0x44   :  { %s4212_s4 = smov 128   ;;  %s4213_s9 = smov 8  }
  0x45   :  { %70 = dma.hbm_to_vmem [thread:$0]  %s5151_s6, 16384, %s65_s22, [#allocation10], %s4212_s4, %s4212_s4, %s4213_s9  }
  0x46   :  { %4196 = dma.done.wait [#allocation4], 2048  }
  0x47   :  { %4197 = vsyncadd [#allocation4], 4294965248 }
  0x48   :  { %4198 = dma.done.wait [#allocation7], 20480  }
  0x49   :  { %4199 = vsyncadd [#allocation7], 4294946816 }
  0x4a   :  { %4200 = dma.done.wait [#allocation10], 16384  }
  0x4b   :  { %4201 = vsyncadd [#allocation10], 4294950912  ;;  %v4214_v0 = vmov 0.0   ;;  %v94_v1 = vld [vmem:[#allocation3 + $0x8] sm:$0xff]  ;;  %v96_v3 = vld [vmem:[#allocation3 + $0x18] sm:$0xff]  ;;  %vm131_vm0 = vcmask 261120  }
  0x4c   :  { %220 = vmatprep.mubr.f32.mxu0 %v4214_v0  ;;  %333 = vmatprep.mubr.f32.mxu1 %v4214_v0  ;;  %v98_v2 = vld [vmem:[#allocation3 + $0x28] sm:$0xff]  ;;  %v100_v5 = vld [vmem:[#allocation3 + $0x38] sm:$0xff]  ;;  %v93_v6 = vld [vmem:[#allocation3] sm:$0xff]  ;;  %vm414_vm1 = vcmask 523264  }
  0x4d   :  { %v3386_v4 = vpack.c.bf16 %v98_v2, %v94_v1  ;;  %v97_v7 = vld [vmem:[#allocation3 + $0x20] sm:$0xff]  ;;  %v3394_v8 = vpack.c.bf16 %v100_v5, %v96_v3  ;;  %v95_v10 = vld [vmem:[#allocation3 + $0x10] sm:$0xff]  ;;  %v102_v12 = vld [vmem:[#allocation3 + $0x48] sm:$0xff] }
  0x4e   :  { %v3388_v9 = vpack.c.bf16 %v97_v7, %v93_v6  ;;  %v99_v11 = vld [vmem:[#allocation3 + $0x30] sm:$0xff]  ;;  %v106_v14 = vld [vmem:[#allocation3 + $0x68] sm:$0xff]  ;;  %v104_v15 = vld [vmem:[#allocation3 + $0x58] sm:$0xff] }
  0x4f   :  { %3387 = vmatprep.subr.bf16.mxu0 %v3386_v4  ;;  %v3396_v13 = vpack.c.bf16 %v99_v11, %v95_v10  ;;  %v108_v16 = vld [vmem:[#allocation3 + $0x78] sm:$0xff]  ;;  %3395 = vmatprep.subr.bf16.mxu1 %v3394_v8  ;;  %v3390_v17 = vpack.c.bf16 %v106_v14, %v102_v12  ;;  %v101_v19 = vld [vmem:[#allocation3 + $0x40] sm:$0xff]  ;;  %v103_v21 = vld [vmem:[#allocation3 + $0x50] sm:$0xff] }
  0x50   :  { %3389 = vmatpush1.bf16.msra.mxu0 %v3388_v9  ;;  %v3398_v18 = vpack.c.bf16 %v108_v16, %v104_v15  ;;  %v105_v20 = vld [vmem:[#allocation3 + $0x60] sm:$0xff]  ;;  %v107_v23 = vld [vmem:[#allocation3 + $0x70] sm:$0xff]  ;;  %v383_v24 = vld [vmem:[#allocation6 + $0x8] sm:$0xff] }
  0x51   :  { %3397 = vmatpush1.bf16.msra.mxu1 %v3396_v13  ;;  %v3392_v22 = vpack.c.bf16 %v105_v20, %v101_v19  ;;  %3391 = vmatprep.subr.bf16.mxu0 %v3390_v17  ;;  %v3400_v25 = vpack.c.bf16 %v107_v23, %v103_v21  ;;  %v387_v26 = vld [vmem:[#allocation6 + $0x28] sm:$0xff]  ;;  %v382_v27 = vld [vmem:[#allocation6] sm:$0xff]  ;;  %v385_v30 = vld [vmem:[#allocation6 + $0x18] sm:$0xff] }
  0x52   :  { %3399 = vmatprep.subr.bf16.mxu1 %v3398_v18  ;;  %v386_v28 = vld [vmem:[#allocation6 + $0x20] sm:$0xff]  ;;  %v4321_v29 = vpack.c.bf16 %v387_v26, %v383_v24  ;;  %v389_v31 = vld [vmem:[#allocation6 + $0x38] sm:$0xff]  ;;  %v391_v35 = vld [vmem:[#allocation6 + $0x48] sm:$0xff]  ;;  %v111_v18 = vlaneseq }
  0x53   :  { %v85_v32 = vld [vmem:[%s5145_s0] sm:$0xff]  ;;  %v4326_v33 = vpack.c.bf16 %v386_v28, %v382_v27  ;;  %v4328_v34 = vpack.c.bf16 %v389_v31, %v385_v30  ;;  %v395_v36 = vld [vmem:[#allocation6 + $0x68] sm:$0xff]  ;;  %v384_v37 = vld [vmem:[#allocation6 + $0x10] sm:$0xff] }
  0x54   :  { %3393 = vmatpush1.bf16.msra.mxu0 %v3392_v22  ;;  %v388_v38 = vld [vmem:[#allocation6 + $0x30] sm:$0xff]  ;;  %v4332_v39 = vpack.c.bf16 %v395_v36, %v391_v35  ;;  %v390_v41 = vld [vmem:[#allocation6 + $0x40] sm:$0xff]  ;;  %v393_v43 = vld [vmem:[#allocation6 + $0x58] sm:$0xff]  ;;  %v4447_v19 = vshrl.u32 %v111_v18, 7 }
  0x55   :  { %3401 = vmatpush1.bf16.msra.mxu1 %v3400_v25  ;;  %3403 = vmatprep.subr.bf16.mxu0 %v4321_v29  ;;  %v4334_v40 = vpack.c.bf16 %v388_v38, %v384_v37  ;;  %v394_v42 = vld [vmem:[#allocation6 + $0x60] sm:$0xff]  ;;  %v86_v44 = vld [vmem:[%s5145_s0 + $0x8] sm:$0xff]  ;;  %v397_v45 = vld [vmem:[#allocation6 + $0x78] sm:$0xff] }
  0x56   :  { %3419 = vmatprep.subr.bf16.mxu1 %v4328_v34  ;;  %v399_v46 = vld [vmem:[#allocation6 + $0x88] sm:$0xff]  ;;  %v4342_v47 = vpack.c.bf16 %v397_v45, %v393_v43  ;;  %v392_v49 = vld [vmem:[#allocation6 + $0x50] sm:$0xff]  ;;  %v4346_v51 = vpack.c.bf16 %v394_v42, %v390_v41  ;;  %v398_v52 = vld [vmem:[#allocation6 + $0x80] sm:$0xff]  ;;  %v113_v20 = vsub.s32 0, %v4447_v19  ;;  %v117_v22 = vsub.s32 1, %v4447_v19 }
  0x57   :  { %3131 = vmatmul.mubr.msk.f32.vlgmr.msra.gmra.mrb[0].mxu0 %vm131_vm0, %v85_v32  ;;  %v403_v48 = vld [vmem:[#allocation6 + $0xa8] sm:$0xff]  ;;  %v396_v50 = vld [vmem:[#allocation6 + $0x70] sm:$0xff]  ;;  %v402_v55 = vld [vmem:[#allocation6 + $0xa0] sm:$0xff]  ;;  %v121_v24 = vsub.s32 2, %v4447_v19 }
  0x58   :  { %3139 = vmatmul.mubr.msk.f32.vlgmr.msra.gmra.mrb[0].mxu1 %vm131_vm0, %v85_v32  ;;  %3405 = vmatpush1.bf16.msra.mxu0 %v4326_v33  ;;  %v4350_v53 = vpack.c.bf16 %v403_v48, %v399_v46  ;;  %v4352_v54 = vpack.c.bf16 %v396_v50, %v392_v49  ;;  %v401_v56 = vld [vmem:[#allocation6 + $0x98] sm:$0xff]  ;;  %v407_v59 = vld [vmem:[#allocation6 + $0xc8] sm:$0xff]  ;;  %v400_v61 = vld [vmem:[#allocation6 + $0x90] sm:$0xff]  ;;  %v4365_v1 = vpack.c.bf16 %v402_v55, %v398_v52  ;;  %v125_v32 = vsub.s32 3, %v4447_v19 }
  0x59   :  { %226 = vmatprep.mubr.f32.mxu0 %v4214_v0  ;;  %339 = vmatprep.mubr.f32.mxu1 %v4214_v0  ;;  %v405_v57 = vld [vmem:[#allocation6 + $0xb8] sm:$0xff]  ;;  %v411_v60 = vld [vmem:[#allocation6 + $0xe8] sm:$0xff]  ;;  %v87_v62 = vld [vmem:[%s5145_s0 + $0x10] sm:$0xff] }
  0x5a   :  { %3407 = vmatprep.subr.bf16.mxu0 %v4332_v39  ;;  %3421 = vmatpush1.bf16.msra.mxu1 %v4334_v40  ;;  %v4356_v58 = vpack.c.bf16 %v405_v57, %v401_v56  ;;  %v404_v63 = vld [vmem:[#allocation6 + $0xb0] sm:$0xff]  ;;  %v409_v2 = vld [vmem:[#allocation6 + $0xd8] sm:$0xff]  ;;  %v4369_v4 = vpack.c.bf16 %v411_v60, %v407_v59  ;;  %v406_v6 = vld [vmem:[#allocation6 + $0xc0] sm:$0xff] }
  0x5b   :  { %3132 = vmatmul.mubr.msk.f32.gmra.mrb[2].mxu0 %vm131_vm0, %v86_v44  ;;  %3423 = vmatprep.subr.bf16.mxu1 %v4342_v47  ;;  %v413_v3 = vld [vmem:[#allocation6 + $0xf8] sm:$0xff]  ;;  %v4371_v5 = vpack.c.bf16 %v404_v63, %v400_v61  ;;  %v410_v7 = vld [vmem:[#allocation6 + $0xe0] sm:$0xff]  ;;  %v408_v9 = vld [vmem:[#allocation6 + $0xd0] sm:$0xff] }
  0x5c   :  { %3140 = vmatmul.mubr.msk.f32.gmra.mrb[2].mxu1 %vm131_vm0, %v86_v44  ;;  %232 = vmatprep.mubr.f32.mxu0 %v4214_v0  ;;  %v4375_v8 = vpack.c.bf16 %v413_v3, %v409_v2  ;;  %v412_v10 = vld [vmem:[#allocation6 + $0xf0] sm:$0xff]  ;;  %v88_v11 = vld [vmem:[%s5145_s0 + $0x18] sm:$0xff]  ;;  %v4384_v12 = vpack.c.bf16 %v410_v7, %v406_v6  ;;  %v89_v14 = vld [vmem:[%s5145_s0 + $0x20] sm:$0xff] }
  0x5d   :  { %345 = vmatprep.mubr.f32.mxu1 %v4214_v0  ;;  %3409 = vmatpush1.bf16.msra.mxu0 %v4346_v51  ;;  %v4388_v13 = vpack.c.bf16 %v412_v10, %v408_v9  ;;  %v90_v15 = vld [vmem:[%s5145_s0 + $0x28] sm:$0xff]  ;;  %v91_v16 = vld [vmem:[%s5145_s0 + $0x30] sm:$0xff]  ;;  %v92_v17 = vld [vmem:[%s5145_s0 + $0x38] sm:$0xff] }
  0x5e   :  { %3411 = vmatprep.subr.bf16.mxu0 %v4350_v53  ;;  %3425 = vmatpush1.bf16.msra.mxu1 %v4352_v54  ;;  %v109_v21 = vld [vmem:[%s5148_s3] sm:$0xf] }
  0x5f   :  { %3133 = vmatmul.mubr.msk.f32.gmra.mrb[4].mxu0 %vm131_vm0, %v87_v62  ;;  %3427 = vmatprep.subr.bf16.mxu1 %v4356_v58  ;;  %v4456_v23 = vrot.slane %v109_v21, %v113_v20  ;;  %v4461_v25 = vrot.slane %v109_v21, %v117_v22  ;;  %v4466_v28 = vrot.slane %v109_v21, %v121_v24 }
  0x60   :  { %3141 = vmatmul.mubr.msk.f32.gmra.mrb[4].mxu1 %vm131_vm0, %v87_v62  ;;  %238 = vmatprep.mubr.f32.mxu0 %v4214_v0  ;;  %v4473_v42 = vrot.slane %v109_v21, %v125_v32 }
  0x61   :  { %351 = vmatprep.mubr.f32.mxu1 %v4214_v0  ;;  %3413 = vmatpush1.bf16.msra.mxu0 %v4365_v1 }
  0x62   :  { %3415 = vmatprep.subr.bf16.mxu0 %v4369_v4  ;;  %3429 = vmatpush1.bf16.msra.mxu1 %v4371_v5 }
  0x63   :  { %3134 = vmatmul.mubr.msk.f32.gmra.mrb[6].mxu0 %vm131_vm0, %v88_v11  ;;  %3431 = vmatprep.subr.bf16.mxu1 %v4375_v8 }
  0x64   :  { %3142 = vmatmul.mubr.msk.f32.gmra.mrb[6].mxu1 %vm131_vm0, %v88_v11  ;;  %244 = vmatprep.mubr.f32.mxu0 %v4214_v0 }
  0x65   :  { %357 = vmatprep.mubr.f32.mxu1 %v4214_v0  ;;  %3417 = vmatpush1.bf16.msra.mxu0 %v4384_v12 }
  0x66   :  { %3433 = vmatpush1.bf16.msra.mxu1 %v4388_v13  ;;  %3435 = vmatprep.subr.bf16.mxu0 %v4321_v29 }
  0x67   :  { %3135 = vmatmul.mubr.msk.f32.gmra.mrb[8].mxu0 %vm131_vm0, %v89_v14  ;;  %3451 = vmatprep.subr.bf16.mxu1 %v4328_v34 }
  0x68   :  { %3143 = vmatmul.mubr.msk.f32.gmra.mrb[8].mxu1 %vm131_vm0, %v89_v14  ;;  %250 = vmatprep.mubr.f32.mxu0 %v4214_v0 }
  0x69   :  { %363 = vmatprep.mubr.f32.mxu1 %v4214_v0 }
  0x6b   :  { %3136 = vmatmul.mubr.msk.f32.gmra.mrb[10].mxu0 %vm131_vm0, %v90_v15 }
  0x6c   :  { %3144 = vmatmul.mubr.msk.f32.gmra.mrb[10].mxu1 %vm131_vm0, %v90_v15  ;;  %256 = vmatprep.mubr.f32.mxu0 %v4214_v0 }
  0x6d   :  { %369 = vmatprep.mubr.f32.mxu1 %v4214_v0 }
  0x6f   :  { %3137 = vmatmul.mubr.msk.f32.gmra.mrb[12].mxu0 %vm131_vm0, %v91_v16 }
  0x70   :  { %3145 = vmatmul.mubr.msk.f32.gmra.mrb[12].mxu1 %vm131_vm0, %v91_v16  ;;  %262 = vmatprep.mubr.f32.mxu0 %v4214_v0 }
  0x71   :  { %375 = vmatprep.mubr.f32.mxu1 %v4214_v0 }
  0x73   :  { %3138 = vmatmul.mubr.msk.f32.gmra.mrb[14].mxu0 %vm131_vm0, %v92_v17 }
  0x74   :  { %3146 = vmatmul.mubr.msk.f32.gmra.mrb[14].mxu1 %vm131_vm0, %v92_v17  ;;  %482 = vmatprep.mubr.f32.mxu0 %v4214_v0 }
  0x75   :  { %553 = vmatprep.mubr.f32.mxu1 %v4214_v0 }
  0x77   :  { %483 = vmatmul.mubr.f32.vlgmr.msra.gmra.mrb[0].mxu0 %v4214_v0 }
  0x78   :  { %554 = vmatmul.mubr.f32.vlgmr.msra.gmra.mrb[0].mxu1 %v4214_v0  ;;  %3437 = vmatpush1.bf16.msra.mxu0 %v4326_v33 }
  0x79   :  { %3453 = vmatpush1.bf16.msra.mxu1 %v4334_v40  ;;  %3439 = vmatprep.subr.bf16.mxu0 %v4332_v39 }
  0x7a   :  { %3455 = vmatprep.subr.bf16.mxu1 %v4342_v47  ;;  %650 = vmatprep.mubr.f32.mxu0 %v4214_v0 }
  0x7b   :  { %721 = vmatprep.mubr.f32.mxu1 %v4214_v0 }
  0x7c   :  { %3441 = vmatpush1.bf16.msra.mxu0 %v4346_v51 }
  0x7d   :  { %3457 = vmatpush1.bf16.msra.mxu1 %v4352_v54  ;;  %3443 = vmatprep.subr.bf16.mxu0 %v4350_v53 }
  0x7e   :  { %3459 = vmatprep.subr.bf16.mxu1 %v4356_v58 }
  0x80   :  { %3445 = vmatpush1.bf16.msra.mxu0 %v4365_v1 }
  0x81   :  { %3461 = vmatpush1.bf16.msra.mxu1 %v4371_v5  ;;  %3447 = vmatprep.subr.bf16.mxu0 %v4369_v4 }
  0x82   :  { %3463 = vmatprep.subr.bf16.mxu1 %v4375_v8 }
  0x84   :  { %3449 = vmatpush1.bf16.msra.mxu0 %v4384_v12 }
  0x85   :  { %3465 = vmatpush1.bf16.msra.mxu1 %v4388_v13  ;;  %3467 = vmatprep.subr.bf16.mxu0 %v4321_v29 }
  0x86   :  { %3483 = vmatprep.subr.bf16.mxu1 %v4328_v34 }
 0x14a   :  { %v484_v26 = vpop.f32.mrb[0].mxu0 }
 0x14b   :  { %v3914_v27 = vadd.f32 %v484_v26, %v4456_v23  ;;  %v555_v30 = vpop.f32.mrb[0].mxu1  ;;  %v486_v31 = vpop.f32.mrb[1].mxu0 }
 0x14c   :  { %v3915_v35 = vadd.f32 %v486_v31, %v4461_v25  ;;  %v557_v36 = vpop.f32.mrb[1].mxu1  ;;  %v3930_v41 = vadd.f32 %v555_v30, %v4466_v28 }
 0x14d   :  { %v564_v37 = vmul.f32 0.5, %v3914_v27  ;;  %v3931_v43 = vadd.f32 %v557_v36, %v4473_v42 }
 0x14e   :  { %v568_v38 = vmul.f32 0.5, %v3915_v35 }
 0x14f   :  { %3990 = vtanh.f32 %v564_v37  ;;  %v573_v44 = vmul.f32 0.5, %v3931_v43 }
 0x150   :  { %3992 = vtanh.f32 %v568_v38 }
 0x151   :  { %3994 = vtanh.f32 %v3930_v41 }
 0x152   :  { %3996 = vtanh.f32 %v573_v44 }
 0x159   :  { %v3991_v45 = vpop.eup %3990 }
 0x15a   :  { %v3993_v46 = vpop.eup %3992  ;;  %v566_v48 = vmul.f32 0.5, %v3991_v45 }
 0x15b   :  { %v570_v49 = vmul.f32 0.5, %v3993_v46  ;;  %v3995_v52 = vpop.eup %3994 }
 0x15c   :  { %v567_v50 = vadd.f32 0.5, %v566_v48  ;;  %v3997_v60 = vpop.eup %3996 }
 0x15d   :  { %v571_v55 = vadd.f32 0.5, %v570_v49  ;;  %v575_v61 = vmul.f32 0.5, %v3997_v60 }
 0x15e   :  { %v578_v56 = vmul.f32 %v3995_v52, %v567_v50 }
 0x15f   :  { %v577_v57 = vmul.f32 0.0, %v571_v55  ;;  %v576_v62 = vadd.f32 0.5, %v575_v61 }
 0x161   :  { %v579_v59 = vadd.f32 %v578_v56, %v577_v57 }
 0x163   :  { %3998 = vtanh.f32 %v579_v59 }
 0x16d   :  { %v3999_v63 = vpop.eup %3998 }
 0x16e   :  { %v4476_v2 = vmul.f32 %v3999_v63, %v576_v62 }
 0x170   :  { %3147 = vmatmul.mubr.msk.f32.vlgmr.msra.gmra.mrb[2].mxu0 %vm414_vm1, %v4476_v2  ;;  %3148 = vmatmul.mubr.msk.f32.vlgmr.msra.gmra.mrb[2].mxu1 %vm414_vm1, %v4476_v2 }
 0x171   :  { %3469 = vmatpush1.bf16.msra.mxu0 %v4326_v33  ;;  %3485 = vmatpush1.bf16.msra.mxu1 %v4334_v40 }
 0x172   :  { %3471 = vmatprep.subr.bf16.mxu0 %v4332_v39  ;;  %3487 = vmatprep.subr.bf16.mxu1 %v4342_v47 }
 0x173   :  { %818 = vmatprep.mubr.f32.mxu0 %v4214_v0  ;;  %889 = vmatprep.mubr.f32.mxu1 %v4214_v0 }
 0x175   :  { %3473 = vmatpush1.bf16.msra.mxu0 %v4346_v51  ;;  %3489 = vmatpush1.bf16.msra.mxu1 %v4352_v54 }
 0x176   :  { %3475 = vmatprep.subr.bf16.mxu0 %v4350_v53  ;;  %3491 = vmatprep.subr.bf16.mxu1 %v4356_v58 }
 0x179   :  { %3477 = vmatpush1.bf16.msra.mxu0 %v4365_v1  ;;  %3493 = vmatpush1.bf16.msra.mxu1 %v4371_v5 }
 0x17a   :  { %3479 = vmatprep.subr.bf16.mxu0 %v4369_v4  ;;  %3495 = vmatprep.subr.bf16.mxu1 %v4375_v8 }
 0x17d   :  { %3481 = vmatpush1.bf16.msra.mxu0 %v4384_v12  ;;  %3497 = vmatpush1.bf16.msra.mxu1 %v4388_v13 }
 0x17e   :  { %3499 = vmatprep.subr.bf16.mxu0 %v4321_v29  ;;  %3515 = vmatprep.subr.bf16.mxu1 %v4328_v34 }
 0x243   :  { %v652_v3 = vpop.f32.mrb[2].mxu0  ;;  %v723_v6 = vpop.f32.mrb[2].mxu1 }
 0x244   :  { %v3916_v7 = vadd.f32 %v652_v3, %v4456_v23  ;;  %v654_v9 = vpop.f32.mrb[3].mxu0  ;;  %v725_v10 = vpop.f32.mrb[3].mxu1  ;;  %v3932_v16 = vadd.f32 %v723_v6, %v4466_v28 }
 0x245   :  { %v3917_v11 = vadd.f32 %v654_v9, %v4461_v25  ;;  %v3933_v17 = vadd.f32 %v725_v10, %v4473_v42 }
 0x246   :  { %v732_v14 = vmul.f32 0.5, %v3916_v7 }
 0x247   :  { %v736_v15 = vmul.f32 0.5, %v3917_v11  ;;  %v741_v18 = vmul.f32 0.5, %v3933_v17 }
 0x248   :  { %4000 = vtanh.f32 %v732_v14 }
 0x249   :  { %4002 = vtanh.f32 %v736_v15 }
 0x24a   :  { %4004 = vtanh.f32 %v3932_v16 }
 0x24b   :  { %4006 = vtanh.f32 %v741_v18 }
 0x252   :  { %v4001_v21 = vpop.eup %4000 }
 0x253   :  { %v4003_v26 = vpop.eup %4002  ;;  %v734_v27 = vmul.f32 0.5, %v4001_v21 }
 0x254   :  { %v738_v30 = vmul.f32 0.5, %v4003_v26  ;;  %v4005_v35 = vpop.eup %4004 }
 0x255   :  { %v735_v31 = vadd.f32 0.5, %v734_v27  ;;  %v4007_v43 = vpop.eup %4006 }
 0x256   :  { %v739_v36 = vadd.f32 0.5, %v738_v30  ;;  %v743_v44 = vmul.f32 0.5, %v4007_v43 }
 0x257   :  { %v746_v37 = vmul.f32 %v4005_v35, %v735_v31 }
 0x258   :  { %v745_v38 = vmul.f32 %v739_v36, %v579_v59  ;;  %v744_v45 = vadd.f32 0.5, %v743_v44 }
 0x25a   :  { %v747_v41 = vadd.f32 %v746_v37, %v745_v38 }
 0x25c   :  { %4008 = vtanh.f32 %v747_v41 }
 0x266   :  { %v4009_v46 = vpop.eup %4008 }
 0x267   :  { %v4504_v48 = vmul.f32 %v4009_v46, %v744_v45 }
 0x269   :  { %3149 = vmatmul.mubr.msk.f32.vlgmr.msra.gmra.mrb[4].mxu0 %vm414_vm1, %v4504_v48  ;;  %3150 = vmatmul.mubr.msk.f32.vlgmr.msra.gmra.mrb[4].mxu1 %vm414_vm1, %v4504_v48 }
 0x26a   :  { %3501 = vmatpush1.bf16.msra.mxu0 %v4326_v33  ;;  %3517 = vmatpush1.bf16.msra.mxu1 %v4334_v40 }
 0x26b   :  { %3503 = vmatprep.subr.bf16.mxu0 %v4332_v39  ;;  %3519 = vmatprep.subr.bf16.mxu1 %v4342_v47 }
 0x26c   :  { %986 = vmatprep.mubr.f32.mxu0 %v4214_v0  ;;  %1057 = vmatprep.mubr.f32.mxu1 %v4214_v0 }
 0x26e   :  { %3505 = vmatpush1.bf16.msra.mxu0 %v4346_v51  ;;  %3521 = vmatpush1.bf16.msra.mxu1 %v4352_v54 }
 0x26f   :  { %3507 = vmatprep.subr.bf16.mxu0 %v4350_v53  ;;  %3523 = vmatprep.subr.bf16.mxu1 %v4356_v58 }
 0x272   :  { %3509 = vmatpush1.bf16.msra.mxu0 %v4365_v1  ;;  %3525 = vmatpush1.bf16.msra.mxu1 %v4371_v5 }
 0x273   :  { %3511 = vmatprep.subr.bf16.mxu0 %v4369_v4  ;;  %3527 = vmatprep.subr.bf16.mxu1 %v4375_v8 }
 0x276   :  { %3513 = vmatpush1.bf16.msra.mxu0 %v4384_v12  ;;  %3529 = vmatpush1.bf16.msra.mxu1 %v4388_v13 }
 0x277   :  { %3531 = vmatprep.subr.bf16.mxu0 %v4321_v29  ;;  %3547 = vmatprep.subr.bf16.mxu1 %v4328_v34 }
 0x33c   :  { %v820_v49 = vpop.f32.mrb[4].mxu0  ;;  %v891_v50 = vpop.f32.mrb[4].mxu1 }
 0x33d   :  { %v3918_v52 = vadd.f32 %v820_v49, %v4456_v23  ;;  %v822_v55 = vpop.f32.mrb[5].mxu0  ;;  %v893_v56 = vpop.f32.mrb[5].mxu1  ;;  %v3934_v61 = vadd.f32 %v891_v50, %v4466_v28 }
 0x33e   :  { %v3919_v57 = vadd.f32 %v822_v55, %v4461_v25  ;;  %v3935_v62 = vadd.f32 %v893_v56, %v4473_v42 }
 0x33f   :  { %v900_v59 = vmul.f32 0.5, %v3918_v52 }
 0x340   :  { %v904_v60 = vmul.f32 0.5, %v3919_v57  ;;  %v909_v63 = vmul.f32 0.5, %v3935_v62 }
 0x341   :  { %4010 = vtanh.f32 %v900_v59 }
 0x342   :  { %4012 = vtanh.f32 %v904_v60 }
 0x343   :  { %4014 = vtanh.f32 %v3934_v61 }
 0x344   :  { %4016 = vtanh.f32 %v909_v63 }
 0x34b   :  { %v4011_v3 = vpop.eup %4010 }
 0x34c   :  { %v4013_v6 = vpop.eup %4012  ;;  %v902_v7 = vmul.f32 0.5, %v4011_v3 }
 0x34d   :  { %v906_v9 = vmul.f32 0.5, %v4013_v6  ;;  %v4015_v11 = vpop.eup %4014 }
 0x34e   :  { %v903_v10 = vadd.f32 0.5, %v902_v7  ;;  %v4017_v18 = vpop.eup %4016 }
 0x34f   :  { %v907_v14 = vadd.f32 0.5, %v906_v9  ;;  %v911_v21 = vmul.f32 0.5, %v4017_v18 }
 0x350   :  { %v914_v15 = vmul.f32 %v4015_v11, %v903_v10 }
 0x351   :  { %v913_v16 = vmul.f32 %v907_v14, %v747_v41  ;;  %v912_v26 = vadd.f32 0.5, %v911_v21 }
 0x353   :  { %v915_v17 = vadd.f32 %v914_v15, %v913_v16 }
 0x355   :  { %4018 = vtanh.f32 %v915_v17 }
 0x35f   :  { %v4019_v27 = vpop.eup %4018 }
 0x360   :  { %v4532_v30 = vmul.f32 %v4019_v27, %v912_v26 }
 0x362   :  { %3151 = vmatmul.mubr.msk.f32.vlgmr.msra.gmra.mrb[6].mxu0 %vm414_vm1, %v4532_v30  ;;  %3152 = vmatmul.mubr.msk.f32.vlgmr.msra.gmra.mrb[6].mxu1 %vm414_vm1, %v4532_v30 }
 0x363   :  { %3533 = vmatpush1.bf16.msra.mxu0 %v4326_v33  ;;  %3549 = vmatpush1.bf16.msra.mxu1 %v4334_v40 }
 0x364   :  { %3535 = vmatprep.subr.bf16.mxu0 %v4332_v39  ;;  %3551 = vmatprep.subr.bf16.mxu1 %v4342_v47 }
 0x365   :  { %1154 = vmatprep.mubr.f32.mxu0 %v4214_v0  ;;  %1225 = vmatprep.mubr.f32.mxu1 %v4214_v0 }
 0x367   :  { %3537 = vmatpush1.bf16.msra.mxu0 %v4346_v51  ;;  %3553 = vmatpush1.bf16.msra.mxu1 %v4352_v54 }
 0x368   :  { %3539 = vmatprep.subr.bf16.mxu0 %v4350_v53  ;;  %3555 = vmatprep.subr.bf16.mxu1 %v4356_v58 }
 0x36b   :  { %3541 = vmatpush1.bf16.msra.mxu0 %v4365_v1  ;;  %3557 = vmatpush1.bf16.msra.mxu1 %v4371_v5 }
 0x36c   :  { %3543 = vmatprep.subr.bf16.mxu0 %v4369_v4  ;;  %3559 = vmatprep.subr.bf16.mxu1 %v4375_v8 }
 0x36f   :  { %3545 = vmatpush1.bf16.msra.mxu0 %v4384_v12  ;;  %3561 = vmatpush1.bf16.msra.mxu1 %v4388_v13 }
 0x370   :  { %3563 = vmatprep.subr.bf16.mxu0 %v4321_v29  ;;  %3579 = vmatprep.subr.bf16.mxu1 %v4328_v34 }
 0x435   :  { %v988_v31 = vpop.f32.mrb[6].mxu0  ;;  %v1059_v35 = vpop.f32.mrb[6].mxu1 }
 0x436   :  { %v3920_v36 = vadd.f32 %v988_v31, %v4456_v23  ;;  %v990_v37 = vpop.f32.mrb[7].mxu0  ;;  %v1061_v38 = vpop.f32.mrb[7].mxu1  ;;  %v3936_v45 = vadd.f32 %v1059_v35, %v4466_v28 }
 0x437   :  { %v3921_v41 = vadd.f32 %v990_v37, %v4461_v25  ;;  %v3937_v46 = vadd.f32 %v1061_v38, %v4473_v42 }
 0x438   :  { %v1068_v43 = vmul.f32 0.5, %v3920_v36 }
 0x439   :  { %v1072_v44 = vmul.f32 0.5, %v3921_v41  ;;  %v1077_v49 = vmul.f32 0.5, %v3937_v46 }
 0x43a   :  { %4020 = vtanh.f32 %v1068_v43 }
 0x43b   :  { %4022 = vtanh.f32 %v1072_v44 }
 0x43c   :  { %4024 = vtanh.f32 %v3936_v45 }
 0x43d   :  { %4026 = vtanh.f32 %v1077_v49 }
 0x444   :  { %v4021_v50 = vpop.eup %4020 }
 0x445   :  { %v4023_v52 = vpop.eup %4022  ;;  %v1070_v55 = vmul.f32 0.5, %v4021_v50 }
 0x446   :  { %v1074_v56 = vmul.f32 0.5, %v4023_v52  ;;  %v4025_v59 = vpop.eup %4024 }
 0x447   :  { %v1071_v57 = vadd.f32 0.5, %v1070_v55  ;;  %v4027_v3 = vpop.eup %4026 }
 0x448   :  { %v1075_v60 = vadd.f32 0.5, %v1074_v56  ;;  %v1079_v6 = vmul.f32 0.5, %v4027_v3 }
 0x449   :  { %v1082_v61 = vmul.f32 %v4025_v59, %v1071_v57 }
 0x44a   :  { %v1081_v62 = vmul.f32 %v1075_v60, %v915_v17  ;;  %v1080_v7 = vadd.f32 0.5, %v1079_v6 }
 0x44c   :  { %v1083_v63 = vadd.f32 %v1082_v61, %v1081_v62 }
 0x44e   :  { %4028 = vtanh.f32 %v1083_v63 }
 0x458   :  { %v4029_v9 = vpop.eup %4028 }
 0x459   :  { %v4560_v10 = vmul.f32 %v4029_v9, %v1080_v7 }
 0x45b   :  { %3153 = vmatmul.mubr.msk.f32.vlgmr.msra.gmra.mrb[8].mxu0 %vm414_vm1, %v4560_v10  ;;  %3154 = vmatmul.mubr.msk.f32.vlgmr.msra.gmra.mrb[8].mxu1 %vm414_vm1, %v4560_v10 }
 0x45c   :  { %3565 = vmatpush1.bf16.msra.mxu0 %v4326_v33  ;;  %3581 = vmatpush1.bf16.msra.mxu1 %v4334_v40 }
 0x45d   :  { %3567 = vmatprep.subr.bf16.mxu0 %v4332_v39  ;;  %3583 = vmatprep.subr.bf16.mxu1 %v4342_v47 }
 0x45e   :  { %1322 = vmatprep.mubr.f32.mxu0 %v4214_v0  ;;  %1393 = vmatprep.mubr.f32.mxu1 %v4214_v0 }
 0x460   :  { %3569 = vmatpush1.bf16.msra.mxu0 %v4346_v51  ;;  %3585 = vmatpush1.bf16.msra.mxu1 %v4352_v54 }
 0x461   :  { %3571 = vmatprep.subr.bf16.mxu0 %v4350_v53  ;;  %3587 = vmatprep.subr.bf16.mxu1 %v4356_v58 }
 0x464   :  { %3573 = vmatpush1.bf16.msra.mxu0 %v4365_v1  ;;  %3589 = vmatpush1.bf16.msra.mxu1 %v4371_v5 }
 0x465   :  { %3575 = vmatprep.subr.bf16.mxu0 %v4369_v4  ;;  %3591 = vmatprep.subr.bf16.mxu1 %v4375_v8 }
 0x468   :  { %3577 = vmatpush1.bf16.msra.mxu0 %v4384_v12  ;;  %3593 = vmatpush1.bf16.msra.mxu1 %v4388_v13 }
 0x469   :  { %3595 = vmatprep.subr.bf16.mxu0 %v4321_v29  ;;  %3611 = vmatprep.subr.bf16.mxu1 %v4328_v34 }
 0x52e   :  { %v1156_v11 = vpop.f32.mrb[8].mxu0  ;;  %v1227_v14 = vpop.f32.mrb[8].mxu1 }
 0x52f   :  { %v3922_v15 = vadd.f32 %v1156_v11, %v4456_v23  ;;  %v1158_v16 = vpop.f32.mrb[9].mxu0  ;;  %v1229_v17 = vpop.f32.mrb[9].mxu1  ;;  %v3938_v27 = vadd.f32 %v1227_v14, %v4466_v28 }
 0x530   :  { %v3923_v18 = vadd.f32 %v1158_v16, %v4461_v25  ;;  %v3939_v31 = vadd.f32 %v1229_v17, %v4473_v42 }
 0x531   :  { %v1236_v21 = vmul.f32 0.5, %v3922_v15 }
 0x532   :  { %v1240_v26 = vmul.f32 0.5, %v3923_v18  ;;  %v1245_v35 = vmul.f32 0.5, %v3939_v31 }
 0x533   :  { %4030 = vtanh.f32 %v1236_v21 }
 0x534   :  { %4032 = vtanh.f32 %v1240_v26 }
 0x535   :  { %4034 = vtanh.f32 %v3938_v27 }
 0x536   :  { %4036 = vtanh.f32 %v1245_v35 }
 0x53d   :  { %v4031_v36 = vpop.eup %4030 }
 0x53e   :  { %v4033_v37 = vpop.eup %4032  ;;  %v1238_v38 = vmul.f32 0.5, %v4031_v36 }
 0x53f   :  { %v1242_v41 = vmul.f32 0.5, %v4033_v37  ;;  %v4035_v44 = vpop.eup %4034 }
 0x540   :  { %v1239_v43 = vadd.f32 0.5, %v1238_v38  ;;  %v4037_v52 = vpop.eup %4036 }
 0x541   :  { %v1243_v45 = vadd.f32 0.5, %v1242_v41  ;;  %v1247_v55 = vmul.f32 0.5, %v4037_v52 }
 0x542   :  { %v1250_v46 = vmul.f32 %v4035_v44, %v1239_v43 }
 0x543   :  { %v1249_v49 = vmul.f32 %v1243_v45, %v1083_v63  ;;  %v1248_v56 = vadd.f32 0.5, %v1247_v55 }
 0x545   :  { %v1251_v50 = vadd.f32 %v1250_v46, %v1249_v49 }
 0x547   :  { %4038 = vtanh.f32 %v1251_v50 }
 0x551   :  { %v4039_v57 = vpop.eup %4038 }
 0x552   :  { %v4588_v59 = vmul.f32 %v4039_v57, %v1248_v56 }
 0x554   :  { %3155 = vmatmul.mubr.msk.f32.vlgmr.msra.gmra.mrb[10].mxu0 %vm414_vm1, %v4588_v59  ;;  %3156 = vmatmul.mubr.msk.f32.vlgmr.msra.gmra.mrb[10].mxu1 %vm414_vm1, %v4588_v59 }
 0x555   :  { %3597 = vmatpush1.bf16.msra.mxu0 %v4326_v33  ;;  %3613 = vmatpush1.bf16.msra.mxu1 %v4334_v40 }
 0x556   :  { %3599 = vmatprep.subr.bf16.mxu0 %v4332_v39  ;;  %3615 = vmatprep.subr.bf16.mxu1 %v4342_v47 }
 0x557   :  { %1490 = vmatprep.mubr.f32.mxu0 %v4214_v0  ;;  %1561 = vmatprep.mubr.f32.mxu1 %v4214_v0 }
 0x559   :  { %3601 = vmatpush1.bf16.msra.mxu0 %v4346_v51  ;;  %3617 = vmatpush1.bf16.msra.mxu1 %v4352_v54 }
 0x55a   :  { %3603 = vmatprep.subr.bf16.mxu0 %v4350_v53  ;;  %3619 = vmatprep.subr.bf16.mxu1 %v4356_v58 }
 0x55d   :  { %3605 = vmatpush1.bf16.msra.mxu0 %v4365_v1  ;;  %3621 = vmatpush1.bf16.msra.mxu1 %v4371_v5 }
 0x55e   :  { %3607 = vmatprep.subr.bf16.mxu0 %v4369_v4  ;;  %3623 = vmatprep.subr.bf16.mxu1 %v4375_v8 }
 0x561   :  { %3609 = vmatpush1.bf16.msra.mxu0 %v4384_v12  ;;  %3625 = vmatpush1.bf16.msra.mxu1 %v4388_v13 }
 0x562   :  { %3627 = vmatprep.subr.bf16.mxu0 %v4321_v29  ;;  %3643 = vmatprep.subr.bf16.mxu1 %v4328_v34 }
 0x627   :  { %v1324_v60 = vpop.f32.mrb[10].mxu0  ;;  %v1395_v61 = vpop.f32.mrb[10].mxu1 }
 0x628   :  { %v3924_v62 = vadd.f32 %v1324_v60, %v4456_v23  ;;  %v1326_v63 = vpop.f32.mrb[11].mxu0  ;;  %v1397_v3 = vpop.f32.mrb[11].mxu1  ;;  %v3940_v11 = vadd.f32 %v1395_v61, %v4466_v28 }
 0x629   :  { %v3925_v6 = vadd.f32 %v1326_v63, %v4461_v25  ;;  %v3941_v14 = vadd.f32 %v1397_v3, %v4473_v42 }
 0x62a   :  { %v1404_v7 = vmul.f32 0.5, %v3924_v62 }
 0x62b   :  { %v1408_v9 = vmul.f32 0.5, %v3925_v6  ;;  %v1413_v29 = vmul.f32 0.5, %v3941_v14  ;;  %v1777_v14 = vld [vmem:[#allocation8 + $0x50] sm:$0xff] }
 0x62c   :  { %4040 = vtanh.f32 %v1404_v7  ;;  %v1767_v7 = vld [vmem:[#allocation8] sm:$0xff] }
 0x62d   :  { %4042 = vtanh.f32 %v1408_v9  ;;  %v1775_v9 = vld [vmem:[#allocation8 + $0x40] sm:$0xff] }
 0x62e   :  { %4044 = vtanh.f32 %v3940_v11  ;;  %v1769_v11 = vld [vmem:[#allocation8 + $0x10] sm:$0xff] }
 0x62f   :  { %4046 = vtanh.f32 %v1413_v29  ;;  %v1784_v29 = vld [vmem:[#allocation8 + $0x88] sm:$0xff] }
 0x636   :  { %v4041_v15 = vpop.eup %4040 }
 0x637   :  { %v4043_v34 = vpop.eup %4042  ;;  %v1406_v16 = vmul.f32 0.5, %v4041_v15  ;;  %v1792_v15 = vld [vmem:[#allocation8 + $0xc8] sm:$0xff] }
 0x638   :  { %v1410_v17 = vmul.f32 0.5, %v4043_v34  ;;  %v4045_v21 = vpop.eup %4044  ;;  %v1786_v34 = vld [vmem:[#allocation8 + $0x98] sm:$0xff] }
 0x639   :  { %v1407_v18 = vadd.f32 0.5, %v1406_v16  ;;  %v4047_v36 = vpop.eup %4046  ;;  %v1794_v16 = vld [vmem:[#allocation8 + $0xd8] sm:$0xff] }
 0x63a   :  { %v1411_v26 = vadd.f32 0.5, %v1410_v17  ;;  %v1415_v37 = vmul.f32 0.5, %v4047_v36  ;;  %v3662_v36 = vpack.c.bf16 %v1792_v15, %v1784_v29 }
 0x63b   :  { %v1418_v27 = vmul.f32 %v4045_v21, %v1407_v18  ;;  %v3660_v21 = vpack.c.bf16 %v1775_v9, %v1767_v7 }
 0x63c   :  { %v1417_v31 = vmul.f32 %v1411_v26, %v1251_v50  ;;  %v1416_v38 = vadd.f32 0.5, %v1415_v37  ;;  %v3692_v26 = vpack.c.bf16 %v1777_v14, %v1769_v11  ;;  %v3694_v37 = vpack.c.bf16 %v1794_v16, %v1786_v34  ;;  %v1831_v11 = vld [vmem:[#allocation8 + $0x200] sm:$0xff]  ;;  %v1833_v34 = vld [vmem:[#allocation8 + $0x210] sm:$0xff] }
 0x63d   :  { %v1839_v14 = vld [vmem:[#allocation8 + $0x240] sm:$0xff]  ;;  %v1841_v16 = vld [vmem:[#allocation8 + $0x250] sm:$0xff] }
 0x63e   :  { %v1419_v35 = vadd.f32 %v1418_v27, %v1417_v31  ;;  %v1783_v27 = vld [vmem:[#allocation8 + $0x80] sm:$0xff] }
 0x63f   :  { %v1791_v31 = vld [vmem:[#allocation8 + $0xc0] sm:$0xff] }
 0x640   :  { %4048 = vtanh.f32 %v1419_v35 }
 0x64a   :  { %v4049_v41 = vpop.eup %4048 }
 0x64b   :  { %v4616_v43 = vmul.f32 %v4049_v41, %v1416_v38  ;;  %v1785_v38 = vld [vmem:[#allocation8 + $0x90] sm:$0xff] }
 0x64c   :  { %v1793_v41 = vld [vmem:[#allocation8 + $0xd0] sm:$0xff] }
 0x64d   :  { %3157 = vmatmul.mubr.msk.f32.vlgmr.msra.gmra.mrb[12].mxu0 %vm414_vm1, %v4616_v43  ;;  %3158 = vmatmul.mubr.msk.f32.vlgmr.msra.gmra.mrb[12].mxu1 %vm414_vm1, %v4616_v43 }
 0x64e   :  { %3629 = vmatpush1.bf16.msra.mxu0 %v4326_v33  ;;  %3645 = vmatpush1.bf16.msra.mxu1 %v4334_v40  ;;  %v1768_v33 = vld [vmem:[#allocation8 + $0x8] sm:$0xff]  ;;  %v1770_v40 = vld [vmem:[#allocation8 + $0x18] sm:$0xff] }
 0x64f   :  { %3631 = vmatprep.subr.bf16.mxu0 %v4332_v39  ;;  %3647 = vmatprep.subr.bf16.mxu1 %v4342_v47  ;;  %v1776_v39 = vld [vmem:[#allocation8 + $0x48] sm:$0xff] }
 0x650   :  { %1658 = vmatprep.mubr.f32.mxu0 %v4214_v0  ;;  %1729 = vmatprep.mubr.f32.mxu1 %v4214_v0  ;;  %v3658_v47 = vpack.c.bf16 %v1776_v39, %v1768_v33  ;;  %v1800_v33 = vld [vmem:[#allocation8 + $0x108] sm:$0xff] }
 0x651   :  { %v1808_v39 = vld [vmem:[#allocation8 + $0x148] sm:$0xff] }
 0x652   :  { %3633 = vmatpush1.bf16.msra.mxu0 %v4346_v51  ;;  %3649 = vmatpush1.bf16.msra.mxu1 %v4352_v54  ;;  %v1778_v51 = vld [vmem:[#allocation8 + $0x58] sm:$0xff] }
 0x653   :  { %3635 = vmatprep.subr.bf16.mxu0 %v4350_v53  ;;  %3651 = vmatprep.subr.bf16.mxu1 %v4356_v58  ;;  %v3690_v53 = vpack.c.bf16 %v1778_v51, %v1770_v40  ;;  %v1802_v40 = vld [vmem:[#allocation8 + $0x118] sm:$0xff]  ;;  %v3664_v51 = vpack.c.bf16 %v1791_v31, %v1783_v27  ;;  %v3676_v27 = vpack.c.bf16 %v1839_v14, %v1831_v11 }
 0x654   :  { %v3708_v31 = vpack.c.bf16 %v1841_v16, %v1833_v34  ;;  %v1774_v11 = vld [vmem:[#allocation8 + $0x38] sm:$0xff]  ;;  %v1779_v34 = vld [vmem:[#allocation8 + $0x60] sm:$0xff] }
 0x656   :  { %3637 = vmatpush1.bf16.msra.mxu0 %v4365_v1  ;;  %3653 = vmatpush1.bf16.msra.mxu1 %v4371_v5 }
 0x657   :  { %3639 = vmatprep.subr.bf16.mxu0 %v4369_v4  ;;  %3655 = vmatprep.subr.bf16.mxu1 %v4375_v8 }
 0x65a   :  { %3641 = vmatpush1.bf16.msra.mxu0 %v4384_v12  ;;  %3657 = vmatpush1.bf16.msra.mxu1 %v4388_v13 }
 0x65b   :  { %3659 = vmatprep.subr.bf16.mxu0 %v3658_v47  ;;  %3691 = vmatprep.subr.bf16.mxu1 %v3690_v53  ;;  %v1810_v47 = vld [vmem:[#allocation8 + $0x158] sm:$0xff]  ;;  %v3696_v53 = vpack.c.bf16 %v1793_v41, %v1785_v38 }
 0x720   :  { %v1492_v54 = vpop.f32.mrb[12].mxu0  ;;  %v1563_v58 = vpop.f32.mrb[12].mxu1 }
 0x721   :  { %v3926_v1 = vadd.f32 %v1492_v54, %v4456_v23  ;;  %v1494_v5 = vpop.f32.mrb[13].mxu0  ;;  %v1565_v4 = vpop.f32.mrb[13].mxu1  ;;  %v3942_v13 = vadd.f32 %v1563_v58, %v4466_v28  ;;  %v1799_v54 = vld [vmem:[#allocation8 + $0x100] sm:$0xff] }
 0x722   :  { %v3927_v8 = vadd.f32 %v1494_v5, %v4461_v25  ;;  %v3943_v45 = vadd.f32 %v1565_v4, %v4473_v42  ;;  %v1807_v58 = vld [vmem:[#allocation8 + $0x140] sm:$0xff]  ;;  %v3698_v5 = vpack.c.bf16 %v1810_v47, %v1802_v40  ;;  %v1801_v4 = vld [vmem:[#allocation8 + $0x110] sm:$0xff]  ;;  %v1864_v40 = vld [vmem:[#allocation8 + $0x308] sm:$0xff] }
 0x723   :  { %v1572_v44 = vmul.f32 0.5, %v3926_v1  ;;  %v3666_v1 = vpack.c.bf16 %v1808_v39, %v1800_v33  ;;  %v1849_v33 = vld [vmem:[#allocation8 + $0x290] sm:$0xff]  ;;  %v1872_v47 = vld [vmem:[#allocation8 + $0x348] sm:$0xff] }
 0x724   :  { %v1576_v12 = vmul.f32 0.5, %v3927_v8  ;;  %v1581_v46 = vmul.f32 0.5, %v3943_v45  ;;  %v1809_v8 = vld [vmem:[#allocation8 + $0x150] sm:$0xff]  ;;  %v1826_v45 = vld [vmem:[#allocation8 + $0x1d8] sm:$0xff] }
 0x725   :  { %4050 = vtanh.f32 %v1572_v44  ;;  %v1816_v44 = vld [vmem:[#allocation8 + $0x188] sm:$0xff]  ;;  %v1857_v39 = vld [vmem:[#allocation8 + $0x2d0] sm:$0xff] }
 0x726   :  { %4052 = vtanh.f32 %v1576_v12  ;;  %v1824_v12 = vld [vmem:[#allocation8 + $0x1c8] sm:$0xff] }
 0x727   :  { %4054 = vtanh.f32 %v3942_v13  ;;  %v1818_v13 = vld [vmem:[#allocation8 + $0x198] sm:$0xff] }
 0x728   :  { %4056 = vtanh.f32 %v1581_v46  ;;  %v3668_v46 = vpack.c.bf16 %v1807_v58, %v1799_v54  ;;  %v3712_v58 = vpack.c.bf16 %v1857_v39, %v1849_v33  ;;  %v1795_v33 = vld [vmem:[#allocation8 + $0xe0] sm:$0xff] }
 0x72f   :  { %v4051_v49 = vpop.eup %4050 }
 0x730   :  { %v4053_v50 = vpop.eup %4052  ;;  %v1574_v52 = vmul.f32 0.5, %v4051_v49  ;;  %v3700_v49 = vpack.c.bf16 %v1809_v8, %v1801_v4  ;;  %v3682_v4 = vpack.c.bf16 %v1872_v47, %v1864_v40  ;;  %v1789_v47 = vld [vmem:[#allocation8 + $0xb0] sm:$0xff] }
 0x731   :  { %v1578_v55 = vmul.f32 0.5, %v4053_v50  ;;  %v4055_v57 = vpop.eup %4054  ;;  %v1815_v50 = vld [vmem:[#allocation8 + $0x180] sm:$0xff] }
 0x732   :  { %v1575_v56 = vadd.f32 0.5, %v1574_v52  ;;  %v4057_v3 = vpop.eup %4056  ;;  %v1823_v52 = vld [vmem:[#allocation8 + $0x1c0] sm:$0xff] }
 0x733   :  { %v1579_v60 = vadd.f32 0.5, %v1578_v55  ;;  %v1583_v6 = vmul.f32 0.5, %v4057_v3  ;;  %v3670_v55 = vpack.c.bf16 %v1824_v12, %v1816_v44  ;;  %v1834_v3 = vld [vmem:[#allocation8 + $0x218] sm:$0xff]  ;;  %v3672_v7 = vpack.c.bf16 %v1823_v52, %v1815_v50  ;;  %v1865_v44 = vld [vmem:[#allocation8 + $0x310] sm:$0xff] }
 0x734   :  { %v1586_v61 = vmul.f32 %v4055_v57, %v1575_v56  ;;  %v3702_v56 = vpack.c.bf16 %v1826_v45, %v1818_v13  ;;  %v1817_v57 = vld [vmem:[#allocation8 + $0x190] sm:$0xff]  ;;  %v1880_v13 = vld [vmem:[#allocation8 + $0x388] sm:$0xff] }
 0x735   :  { %v1585_v62 = vmul.f32 %v1579_v60, %v1419_v35  ;;  %v1584_v17 = vadd.f32 0.5, %v1583_v6  ;;  %v1825_v60 = vld [vmem:[#allocation8 + $0x1d0] sm:$0xff]  ;;  %v1842_v6 = vld [vmem:[#allocation8 + $0x258] sm:$0xff]  ;;  %v1888_v45 = vld [vmem:[#allocation8 + $0x3c8] sm:$0xff] }
 0x736   :  { %v3704_v9 = vpack.c.bf16 %v1825_v60, %v1817_v57  ;;  %v3706_v15 = vpack.c.bf16 %v1842_v6, %v1834_v3  ;;  %v1873_v12 = vld [vmem:[#allocation8 + $0x350] sm:$0xff]  ;;  %v1887_v60 = vld [vmem:[#allocation8 + $0x3c0] sm:$0xff] }
 0x737   :  { %v4642_v63 = vadd.f32 %v1586_v61, %v1585_v62  ;;  %v1832_v61 = vld [vmem:[#allocation8 + $0x208] sm:$0xff]  ;;  %v3716_v52 = vpack.c.bf16 %v1873_v12, %v1865_v44  ;;  %v1811_v44 = vld [vmem:[#allocation8 + $0x160] sm:$0xff] }
 0x738   :  { %v1840_v62 = vld [vmem:[#allocation8 + $0x248] sm:$0xff] }
 0x739   :  { %4058 = vtanh.f32 %v4642_v63  ;;  %v3674_v29 = vpack.c.bf16 %v1840_v62, %v1832_v61  ;;  %v1881_v61 = vld [vmem:[#allocation8 + $0x390] sm:$0xff] }
 0x73a   :  { %v1889_v62 = vld [vmem:[#allocation8 + $0x3d0] sm:$0xff] }
 0x73b   :  { %v3720_v6 = vpack.c.bf16 %v1889_v62, %v1881_v61  ;;  %v1827_v61 = vld [vmem:[#allocation8 + $0x1e0] sm:$0xff] }
 0x743   :  { %v4059_v18 = vpop.eup %4058 }
 0x744   :  { %v4645_v35 = vmul.f32 %v4059_v18, %v1584_v17  ;;  %v1848_v17 = vld [vmem:[#allocation8 + $0x288] sm:$0xff] }
 0x745   :  { %v1856_v18 = vld [vmem:[#allocation8 + $0x2c8] sm:$0xff] }
 0x746   :  { %3159 = vmatmul.mubr.msk.f32.vlgmr.msra.gmra.mrb[14].mxu0 %vm414_vm1, %v4645_v35  ;;  %3160 = vmatmul.mubr.msk.f32.vlgmr.msra.gmra.mrb[14].mxu1 %vm414_vm1, %v4645_v35  ;;  %v3678_v38 = vpack.c.bf16 %v1856_v18, %v1848_v17  ;;  %v1773_v18 = vld [vmem:[#allocation8 + $0x30] sm:$0xff] }
 0x747   :  { %3661 = vmatpush1.bf16.msra.mxu0 %v3660_v21  ;;  %3693 = vmatpush1.bf16.msra.mxu1 %v3692_v26  ;;  %v1850_v21 = vld [vmem:[#allocation8 + $0x298] sm:$0xff] }
 0x748   :  { %3663 = vmatprep.subr.bf16.mxu0 %v3662_v36  ;;  %3695 = vmatprep.subr.bf16.mxu1 %v3694_v37  ;;  %v1858_v26 = vld [vmem:[#allocation8 + $0x2d8] sm:$0xff]  ;;  %v1847_v36 = vld [vmem:[#allocation8 + $0x280] sm:$0xff] }
 0x749   :  { %2001 = vmatprep.mubr.f32.mxu0 %v4214_v0  ;;  %2114 = vmatprep.mubr.f32.mxu1 %v4214_v0  ;;  %v1855_v37 = vld [vmem:[#allocation8 + $0x2c0] sm:$0xff]  ;;  %v3710_v41 = vpack.c.bf16 %v1858_v26, %v1850_v21  ;;  %v1781_v21 = vld [vmem:[#allocation8 + $0x70] sm:$0xff] }
 0x74a   :  { %v3680_v54 = vpack.c.bf16 %v1855_v37, %v1847_v36  ;;  %v3756_v26 = vpack.c.bf16 %v1781_v21, %v1773_v18  ;;  %v1790_v36 = vld [vmem:[#allocation8 + $0xb8] sm:$0xff] }
 0x74b   :  { %3665 = vmatpush1.bf16.msra.mxu0 %v3664_v51  ;;  %3697 = vmatpush1.bf16.msra.mxu1 %v3696_v53  ;;  %v1866_v51 = vld [vmem:[#allocation8 + $0x318] sm:$0xff] }
 0x74c   :  { %3667 = vmatprep.subr.bf16.mxu0 %v3666_v1  ;;  %3699 = vmatprep.subr.bf16.mxu1 %v3698_v5  ;;  %v1874_v53 = vld [vmem:[#allocation8 + $0x358] sm:$0xff]  ;;  %v1863_v1 = vld [vmem:[#allocation8 + $0x300] sm:$0xff] }
 0x74d   :  { %v1871_v5 = vld [vmem:[#allocation8 + $0x340] sm:$0xff]  ;;  %v3714_v8 = vpack.c.bf16 %v1874_v53, %v1866_v51  ;;  %v1797_v51 = vld [vmem:[#allocation8 + $0xf0] sm:$0xff] }
 0x74e   :  { %v3684_v50 = vpack.c.bf16 %v1871_v5, %v1863_v1  ;;  %v3760_v53 = vpack.c.bf16 %v1797_v51, %v1789_v47  ;;  %v1806_v1 = vld [vmem:[#allocation8 + $0x138] sm:$0xff] }
 0x74f   :  { %3669 = vmatpush1.bf16.msra.mxu0 %v3668_v46  ;;  %3701 = vmatpush1.bf16.msra.mxu1 %v3700_v49  ;;  %v1882_v46 = vld [vmem:[#allocation8 + $0x398] sm:$0xff] }
 0x750   :  { %3671 = vmatprep.subr.bf16.mxu0 %v3670_v55  ;;  %3703 = vmatprep.subr.bf16.mxu1 %v3702_v56  ;;  %v1890_v49 = vld [vmem:[#allocation8 + $0x3d8] sm:$0xff]  ;;  %v1879_v55 = vld [vmem:[#allocation8 + $0x380] sm:$0xff]  ;;  %v3686_v56 = vpack.c.bf16 %v1888_v45, %v1880_v13  ;;  %v1805_v45 = vld [vmem:[#allocation8 + $0x130] sm:$0xff] }
 0x751   :  { %v3718_v57 = vpack.c.bf16 %v1890_v49, %v1882_v46  ;;  %v3688_v3 = vpack.c.bf16 %v1887_v60, %v1879_v55  ;;  %v1813_v46 = vld [vmem:[#allocation8 + $0x170] sm:$0xff]  ;;  %v1822_v55 = vld [vmem:[#allocation8 + $0x1b8] sm:$0xff]  ;;  %v1819_v60 = vld [vmem:[#allocation8 + $0x1a0] sm:$0xff] }
 0x752   :  { %v3764_v49 = vpack.c.bf16 %v1813_v46, %v1805_v45 }
 0x753   :  { %3673 = vmatpush1.bf16.msra.mxu0 %v3672_v7  ;;  %3705 = vmatpush1.bf16.msra.mxu1 %v3704_v9  ;;  %v1772_v7 = vld [vmem:[#allocation8 + $0x28] sm:$0xff] }
 0x754   :  { %3675 = vmatprep.subr.bf16.mxu0 %v3674_v29  ;;  %3707 = vmatprep.subr.bf16.mxu1 %v3706_v15  ;;  %v1780_v9 = vld [vmem:[#allocation8 + $0x68] sm:$0xff]  ;;  %v1782_v29 = vld [vmem:[#allocation8 + $0x78] sm:$0xff]  ;;  %v1771_v15 = vld [vmem:[#allocation8 + $0x20] sm:$0xff] }
 0x755   :  { %v3722_v14 = vpack.c.bf16 %v1780_v9, %v1772_v7  ;;  %v3754_v16 = vpack.c.bf16 %v1782_v29, %v1774_v11  ;;  %v3724_v17 = vpack.c.bf16 %v1779_v34, %v1771_v15  ;;  %v1829_v7 = vld [vmem:[#allocation8 + $0x1f0] sm:$0xff]  ;;  %v1836_v11 = vld [vmem:[#allocation8 + $0x228] sm:$0xff]  ;;  %v1838_v29 = vld [vmem:[#allocation8 + $0x238] sm:$0xff] }
 0x756   :  { %v1846_v34 = vld [vmem:[#allocation8 + $0x278] sm:$0xff] }
 0x757   :  { %3677 = vmatpush1.bf16.msra.mxu0 %v3676_v27  ;;  %3709 = vmatpush1.bf16.msra.mxu1 %v3708_v31  ;;  %v1788_v27 = vld [vmem:[#allocation8 + $0xa8] sm:$0xff]  ;;  %v3770_v18 = vpack.c.bf16 %v1846_v34, %v1838_v29  ;;  %v2533_v29 = vld [vmem:[#allocation9 + $0x80] sm:$0xff] }
 0x758   :  { %3679 = vmatprep.subr.bf16.mxu0 %v3678_v38  ;;  %3711 = vmatprep.subr.bf16.mxu1 %v3710_v41  ;;  %v1796_v31 = vld [vmem:[#allocation8 + $0xe8] sm:$0xff]  ;;  %v1798_v38 = vld [vmem:[#allocation8 + $0xf8] sm:$0xff]  ;;  %v1787_v41 = vld [vmem:[#allocation8 + $0xa0] sm:$0xff] }
 0x759   :  { %v3726_v37 = vpack.c.bf16 %v1796_v31, %v1788_v27  ;;  %v3758_v39 = vpack.c.bf16 %v1798_v38, %v1790_v36  ;;  %v3728_v40 = vpack.c.bf16 %v1795_v33, %v1787_v41  ;;  %v1845_v27 = vld [vmem:[#allocation8 + $0x270] sm:$0xff]  ;;  %v1852_v36 = vld [vmem:[#allocation8 + $0x2a8] sm:$0xff]  ;;  %v1854_v38 = vld [vmem:[#allocation8 + $0x2b8] sm:$0xff] }
 0x75a   :  { %v1862_v33 = vld [vmem:[#allocation8 + $0x2f8] sm:$0xff]  ;;  %v2565_v34 = vld [vmem:[#allocation9 + $0x180] sm:$0xff] }
 0x75b   :  { %3681 = vmatpush1.bf16.msra.mxu0 %v3680_v54  ;;  %3713 = vmatpush1.bf16.msra.mxu1 %v3712_v58  ;;  %v1804_v54 = vld [vmem:[#allocation8 + $0x128] sm:$0xff]  ;;  %v3774_v47 = vpack.c.bf16 %v1862_v33, %v1854_v38 }
 0x75c   :  { %3683 = vmatprep.subr.bf16.mxu0 %v3682_v4  ;;  %3715 = vmatprep.subr.bf16.mxu1 %v3714_v8  ;;  %v1812_v58 = vld [vmem:[#allocation8 + $0x168] sm:$0xff]  ;;  %v1814_v4 = vld [vmem:[#allocation8 + $0x178] sm:$0xff]  ;;  %v1803_v8 = vld [vmem:[#allocation8 + $0x120] sm:$0xff] }
 0x75d   :  { %v3730_v5 = vpack.c.bf16 %v1812_v58, %v1804_v54  ;;  %v3762_v12 = vpack.c.bf16 %v1814_v4, %v1806_v1  ;;  %v3732_v13 = vpack.c.bf16 %v1811_v44, %v1803_v8  ;;  %v1861_v54 = vld [vmem:[#allocation8 + $0x2f0] sm:$0xff]  ;;  %v1868_v1 = vld [vmem:[#allocation8 + $0x328] sm:$0xff]  ;;  %v1870_v4 = vld [vmem:[#allocation8 + $0x338] sm:$0xff] }
 0x75e   :  { %v1878_v44 = vld [vmem:[#allocation8 + $0x378] sm:$0xff] }
 0x75f   :  { %3685 = vmatpush1.bf16.msra.mxu0 %v3684_v50  ;;  %3717 = vmatpush1.bf16.msra.mxu1 %v3716_v52  ;;  %v1820_v50 = vld [vmem:[#allocation8 + $0x1a8] sm:$0xff]  ;;  %v3778_v45 = vpack.c.bf16 %v1878_v44, %v1870_v4 }
 0x760   :  { %3687 = vmatprep.subr.bf16.mxu0 %v3686_v56  ;;  %3719 = vmatprep.subr.bf16.mxu1 %v3718_v57  ;;  %v1828_v52 = vld [vmem:[#allocation8 + $0x1e8] sm:$0xff]  ;;  %v1830_v57 = vld [vmem:[#allocation8 + $0x1f8] sm:$0xff] }
 0x761   :  { %v3734_v56 = vpack.c.bf16 %v1828_v52, %v1820_v50  ;;  %v3766_v62 = vpack.c.bf16 %v1830_v57, %v1822_v55  ;;  %v1877_v50 = vld [vmem:[#allocation8 + $0x370] sm:$0xff]  ;;  %v1884_v55 = vld [vmem:[#allocation8 + $0x3a8] sm:$0xff]  ;;  %v1886_v57 = vld [vmem:[#allocation8 + $0x3b8] sm:$0xff] }
 0x763   :  { %3689 = vmatpush1.bf16.msra.mxu0 %v3688_v3  ;;  %3721 = vmatpush1.bf16.msra.mxu1 %v3720_v6  ;;  %v3736_v3 = vpack.c.bf16 %v1827_v61, %v1819_v60  ;;  %v1821_v6 = vld [vmem:[#allocation8 + $0x1b0] sm:$0xff]  ;;  %v1894_v61 = vld [vmem:[#allocation8 + $0x3f8] sm:$0xff] }
 0x764   :  { %3723 = vmatprep.subr.bf16.mxu0 %v3722_v14  ;;  %3755 = vmatprep.subr.bf16.mxu1 %v3754_v16  ;;  %v3768_v9 = vpack.c.bf16 %v1829_v7, %v1821_v6  ;;  %v1844_v14 = vld [vmem:[#allocation8 + $0x268] sm:$0xff]  ;;  %v1835_v16 = vld [vmem:[#allocation8 + $0x220] sm:$0xff]  ;;  %v3782_v6 = vpack.c.bf16 %v1894_v61, %v1886_v57 }
 0x765   :  { %v3738_v15 = vpack.c.bf16 %v1844_v14, %v1836_v11  ;;  %v1893_v11 = vld [vmem:[#allocation8 + $0x3f0] sm:$0xff]  ;;  %v2550_v61 = vld [vmem:[#allocation9 + $0x108] sm:$0xff] }
 0x766   :  { %2002 = vmatmul.mubr.f32.vlgmr.msra.gmra.mrb[16].mxu0 %v4476_v2  ;;  %2115 = vmatmul.mubr.f32.vlgmr.msra.gmra.mrb[16].mxu1 %v4476_v2 }
 0x767   :  { %2007 = vmatprep.mubr.f32.mxu0 %v4214_v0  ;;  %2120 = vmatprep.mubr.f32.mxu1 %v4214_v0 }
 0x768   :  { %3725 = vmatpush1.bf16.msra.mxu0 %v3724_v17  ;;  %3757 = vmatpush1.bf16.msra.mxu1 %v3756_v26  ;;  %v1843_v17 = vld [vmem:[#allocation8 + $0x260] sm:$0xff]  ;;  %v1837_v26 = vld [vmem:[#allocation8 + $0x230] sm:$0xff] }
 0x769   :  { %3727 = vmatprep.subr.bf16.mxu0 %v3726_v37  ;;  %3759 = vmatprep.subr.bf16.mxu1 %v3758_v39  ;;  %v3740_v21 = vpack.c.bf16 %v1843_v17, %v1835_v16  ;;  %v3772_v31 = vpack.c.bf16 %v1845_v27, %v1837_v26  ;;  %v1860_v37 = vld [vmem:[#allocation8 + $0x2e8] sm:$0xff]  ;;  %v1851_v39 = vld [vmem:[#allocation8 + $0x2a0] sm:$0xff] }
 0x76a   :  { %2008 = vmatmul.mubr.f32.gmra.mrb[18].mxu0 %v4504_v48  ;;  %2121 = vmatmul.mubr.f32.gmra.mrb[18].mxu1 %v4504_v48  ;;  %v3742_v41 = vpack.c.bf16 %v1860_v37, %v1852_v36  ;;  %v2566_v17 = vld [vmem:[#allocation9 + $0x188] sm:$0xff] }
 0x76b   :  { %2013 = vmatprep.mubr.f32.mxu0 %v4214_v0  ;;  %2126 = vmatprep.mubr.f32.mxu1 %v4214_v0 }
 0x76c   :  { %3729 = vmatpush1.bf16.msra.mxu0 %v3728_v40  ;;  %3761 = vmatpush1.bf16.msra.mxu1 %v3760_v53  ;;  %v1859_v40 = vld [vmem:[#allocation8 + $0x2e0] sm:$0xff]  ;;  %v1853_v53 = vld [vmem:[#allocation8 + $0x2b0] sm:$0xff] }
 0x76d   :  { %3731 = vmatprep.subr.bf16.mxu0 %v3730_v5  ;;  %3763 = vmatprep.subr.bf16.mxu1 %v3762_v12  ;;  %v3744_v51 = vpack.c.bf16 %v1859_v40, %v1851_v39  ;;  %v3776_v58 = vpack.c.bf16 %v1861_v54, %v1853_v53  ;;  %v1876_v5 = vld [vmem:[#allocation8 + $0x368] sm:$0xff]  ;;  %v1867_v12 = vld [vmem:[#allocation8 + $0x320] sm:$0xff] }
 0x76e   :  { %2014 = vmatmul.mubr.f32.gmra.mrb[20].mxu0 %v4532_v30  ;;  %2127 = vmatmul.mubr.f32.gmra.mrb[20].mxu1 %v4532_v30  ;;  %v3746_v8 = vpack.c.bf16 %v1876_v5, %v1868_v1 }
 0x76f   :  { %2019 = vmatprep.mubr.f32.mxu0 %v4214_v0  ;;  %2132 = vmatprep.mubr.f32.mxu1 %v4214_v0 }
 0x770   :  { %3733 = vmatpush1.bf16.msra.mxu0 %v3732_v13  ;;  %3765 = vmatpush1.bf16.msra.mxu1 %v3764_v49  ;;  %v1875_v13 = vld [vmem:[#allocation8 + $0x360] sm:$0xff]  ;;  %v1869_v49 = vld [vmem:[#allocation8 + $0x330] sm:$0xff] }
 0x771   :  { %3735 = vmatprep.subr.bf16.mxu0 %v3734_v56  ;;  %3767 = vmatprep.subr.bf16.mxu1 %v3766_v62  ;;  %v3748_v46 = vpack.c.bf16 %v1875_v13, %v1867_v12  ;;  %v3780_v52 = vpack.c.bf16 %v1877_v50, %v1869_v49  ;;  %v1892_v56 = vld [vmem:[#allocation8 + $0x3e8] sm:$0xff]  ;;  %v1883_v62 = vld [vmem:[#allocation8 + $0x3a0] sm:$0xff] }
 0x772   :  { %2020 = vmatmul.mubr.f32.gmra.mrb[22].mxu0 %v4560_v10  ;;  %2133 = vmatmul.mubr.f32.gmra.mrb[22].mxu1 %v4560_v10  ;;  %v3750_v60 = vpack.c.bf16 %v1892_v56, %v1884_v55  ;;  %v2518_v55 = vld [vmem:[#allocation9 + $0x8] sm:$0xff] }
 0x773   :  { %2025 = vmatprep.mubr.f32.mxu0 %v4214_v0  ;;  %2138 = vmatprep.mubr.f32.mxu1 %v4214_v0 }
 0x774   :  { %3737 = vmatpush1.bf16.msra.mxu0 %v3736_v3  ;;  %3769 = vmatpush1.bf16.msra.mxu1 %v3768_v9  ;;  %v1891_v3 = vld [vmem:[#allocation8 + $0x3e0] sm:$0xff]  ;;  %v1885_v9 = vld [vmem:[#allocation8 + $0x3b0] sm:$0xff] }
 0x775   :  { %3739 = vmatprep.subr.bf16.mxu0 %v3738_v15  ;;  %3771 = vmatprep.subr.bf16.mxu1 %v3770_v18  ;;  %v3752_v7 = vpack.c.bf16 %v1891_v3, %v1883_v62  ;;  %v3784_v14 = vpack.c.bf16 %v1893_v11, %v1885_v9  ;;  %v2534_v15 = vld [vmem:[#allocation9 + $0x88] sm:$0xff]  ;;  %v3818_v18 = vpack.c.bf16 %v2566_v17, %v2565_v34  ;;  %v2535_v9 = vld [vmem:[#allocation9 + $0x90] sm:$0xff]  ;;  %v2536_v11 = vld [vmem:[#allocation9 + $0x98] sm:$0xff] }
 0x776   :  { %2026 = vmatmul.mubr.f32.gmra.mrb[24].mxu0 %v4588_v59  ;;  %2139 = vmatmul.mubr.f32.gmra.mrb[24].mxu1 %v4588_v59  ;;  %v3786_v16 = vpack.c.bf16 %v2534_v15, %v2533_v29  ;;  %v2568_v34 = vld [vmem:[#allocation9 + $0x198] sm:$0xff] }
 0x777   :  { %2031 = vmatprep.mubr.f32.mxu0 %v4214_v0  ;;  %2144 = vmatprep.mubr.f32.mxu1 %v4214_v0  ;;  %v2520_v17 = vld [vmem:[#allocation9 + $0x18] sm:$0xff] }
 0x778   :  { %3741 = vmatpush1.bf16.msra.mxu0 %v3740_v21  ;;  %3773 = vmatpush1.bf16.msra.mxu1 %v3772_v31 }
 0x779   :  { %3743 = vmatprep.subr.bf16.mxu0 %v3742_v41  ;;  %3775 = vmatprep.subr.bf16.mxu1 %v3774_v47 }
 0x77a   :  { %2032 = vmatmul.mubr.f32.gmra.mrb[26].mxu0 %v4616_v43  ;;  %2145 = vmatmul.mubr.f32.gmra.mrb[26].mxu1 %v4616_v43 }
 0x77b   :  { %2037 = vmatprep.mubr.f32.mxu0 %v4214_v0  ;;  %2150 = vmatprep.mubr.f32.mxu1 %v4214_v0 }
 0x77c   :  { %3745 = vmatpush1.bf16.msra.mxu0 %v3744_v51  ;;  %3777 = vmatpush1.bf16.msra.mxu1 %v3776_v58 }
 0x77d   :  { %3747 = vmatprep.subr.bf16.mxu0 %v3746_v8  ;;  %3779 = vmatprep.subr.bf16.mxu1 %v3778_v45 }
 0x77e   :  { %2038 = vmatmul.mubr.f32.gmra.mrb[28].mxu0 %v4645_v35  ;;  %2151 = vmatmul.mubr.f32.gmra.mrb[28].mxu1 %v4645_v35 }
 0x77f   :  { %2043 = vmatprep.mubr.f32.mxu0 %v4214_v0  ;;  %2156 = vmatprep.mubr.f32.mxu1 %v4214_v0 }
 0x780   :  { %3749 = vmatpush1.bf16.msra.mxu0 %v3748_v46  ;;  %3781 = vmatpush1.bf16.msra.mxu1 %v3780_v52 }
 0x781   :  { %3751 = vmatprep.subr.bf16.mxu0 %v3750_v60  ;;  %3783 = vmatprep.subr.bf16.mxu1 %v3782_v6  ;;  %v2549_v60 = vld [vmem:[#allocation9 + $0x100] sm:$0xff] }
 0x784   :  { %3753 = vmatpush1.bf16.msra.mxu0 %v3752_v7  ;;  %3785 = vmatpush1.bf16.msra.mxu1 %v3784_v14  ;;  %v3820_v7 = vpack.c.bf16 %v2550_v61, %v2549_v60  ;;  %v2567_v14 = vld [vmem:[#allocation9 + $0x190] sm:$0xff]  ;;  %v2524_v61 = vld [vmem:[#allocation9 + $0x38] sm:$0xff] }
 0x785   :  { %3787 = vmatprep.subr.bf16.mxu0 %v3786_v16  ;;  %3819 = vmatprep.subr.bf16.mxu1 %v3818_v18  ;;  %v2519_v16 = vld [vmem:[#allocation9 + $0x10] sm:$0xff] }
 0x786   :  { %v2551_v18 = vld [vmem:[#allocation9 + $0x110] sm:$0xff] }
 0x787   :  { %v2523_v60 = vld [vmem:[#allocation9 + $0x30] sm:$0xff] }
 0x819   :  { %v1660_v21 = vpop.f32.mrb[14].mxu0  ;;  %v1731_v26 = vpop.f32.mrb[14].mxu1 }
 0x81a   :  { %v3928_v27 = vadd.f32 %v1660_v21, %v4456_v23  ;;  %v1662_v31 = vpop.f32.mrb[15].mxu0  ;;  %v1733_v36 = vpop.f32.mrb[15].mxu1  ;;  %v3944_v33 = vadd.f32 %v1731_v26, %v4466_v28  ;;  %v2552_v21 = vld [vmem:[#allocation9 + $0x118] sm:$0xff]  ;;  %v3790_v26 = vpack.c.bf16 %v2536_v11, %v2535_v9 }
 0x81b   :  { %v3929_v37 = vadd.f32 %v1662_v31, %v4461_v25  ;;  %v3945_v39 = vadd.f32 %v1733_v36, %v4473_v42  ;;  %v3822_v36 = vpack.c.bf16 %v2568_v34, %v2567_v14 }
 0x81c   :  { %v1740_v38 = vmul.f32 0.5, %v3928_v27 }
 0x81d   :  { %v1744_v41 = vmul.f32 0.5, %v3929_v37  ;;  %v1749_v40 = vmul.f32 0.5, %v3945_v39  ;;  %v3792_v37 = vpack.c.bf16 %v2520_v17, %v2519_v16  ;;  %v2537_v39 = vld [vmem:[#allocation9 + $0xa0] sm:$0xff] }
 0x81e   :  { %4060 = vtanh.f32 %v1740_v38 }
 0x81f   :  { %4062 = vtanh.f32 %v1744_v41 }
 0x820   :  { %4064 = vtanh.f32 %v3944_v33  ;;  %v3824_v33 = vpack.c.bf16 %v2552_v21, %v2551_v18  ;;  %v2541_v18 = vld [vmem:[#allocation9 + $0xc0] sm:$0xff]  ;;  %v2542_v21 = vld [vmem:[#allocation9 + $0xc8] sm:$0xff] }
 0x821   :  { %4066 = vtanh.f32 %v1749_v40  ;;  %v2569_v40 = vld [vmem:[#allocation9 + $0x1a0] sm:$0xff] }
 0x828   :  { %v4061_v47 = vpop.eup %4060 }
 0x829   :  { %v4063_v51 = vpop.eup %4062  ;;  %v1742_v53 = vmul.f32 0.5, %v4061_v47  ;;  %v2570_v47 = vld [vmem:[#allocation9 + $0x1a8] sm:$0xff] }
 0x82a   :  { %v1746_v54 = vmul.f32 0.5, %v4063_v51  ;;  %v4065_v58 = vpop.eup %4064  ;;  %v2521_v51 = vld [vmem:[#allocation9 + $0x20] sm:$0xff] }
 0x82b   :  { %v1743_v23 = vadd.f32 0.5, %v1742_v53  ;;  %v4067_v8 = vpop.eup %4066  ;;  %v2522_v53 = vld [vmem:[#allocation9 + $0x28] sm:$0xff] }
 0x82c   :  { %v1747_v1 = vadd.f32 0.5, %v1746_v54  ;;  %v1751_v28 = vmul.f32 0.5, %v4067_v8  ;;  %v2553_v54 = vld [vmem:[#allocation9 + $0x120] sm:$0xff]  ;;  %v3826_v8 = vpack.c.bf16 %v2570_v47, %v2569_v40  ;;  %v2558_v40 = vld [vmem:[#allocation9 + $0x148] sm:$0xff] }
 0x82d   :  { %v1754_v5 = vmul.f32 %v4065_v58, %v1743_v23  ;;  %v2554_v23 = vld [vmem:[#allocation9 + $0x128] sm:$0xff] }
 0x82e   :  { %v1753_v25 = vmul.f32 %v1747_v1, %v4642_v63  ;;  %v1752_v45 = vadd.f32 0.5, %v1751_v28  ;;  %v2517_v63 = vld [vmem:[#allocation9] sm:$0xff]  ;;  %v2539_v28 = vld [vmem:[#allocation9 + $0xb0] sm:$0xff] }
 0x82f   :  { %v3788_v62 = vpack.c.bf16 %v2518_v55, %v2517_v63  ;;  %v2571_v63 = vld [vmem:[#allocation9 + $0x1b0] sm:$0xff]  ;;  %v2572_v55 = vld [vmem:[#allocation9 + $0x1b8] sm:$0xff] }
 0x830   :  { %v1755_v4 = vadd.f32 %v1754_v5, %v1753_v25  ;;  %v3830_v17 = vpack.c.bf16 %v2572_v55, %v2571_v63  ;;  %v2576_v63 = vld [vmem:[#allocation9 + $0x1d8] sm:$0xff]  ;;  %v2527_v55 = vld [vmem:[#allocation9 + $0x50] sm:$0xff] }
 0x832   :  { %4068 = vtanh.f32 %v1755_v4 }
 0x839   :  { %v4686_v44 = vpop.f32.mrb[16].mxu0  ;;  %v4688_v12 = vpop.f32.mrb[16].mxu1 }
 0x83a   :  { %v4690_v42 = vpop.f32.mrb[17].mxu0  ;;  %v4692_v13 = vpop.f32.mrb[17].mxu1 }
 0x83c   :  { %v4069_v46 = vpop.eup %4068 }
 0x83d   :  { %v4694_v49 = vmul.f32 %v4069_v46, %v1752_v45  ;;  %v4696_v50 = vpop.f32.mrb[18].mxu0  ;;  %v4698_v52 = vpop.f32.mrb[18].mxu1  ;;  %v2540_v45 = vld [vmem:[#allocation9 + $0xb8] sm:$0xff]  ;;  %v3828_v46 = vpack.c.bf16 %v2554_v23, %v2553_v54 }
 0x83e   :  { %v4700_v56 = vpop.f32.mrb[19].mxu0  ;;  %v4702_v57 = vpop.f32.mrb[19].mxu1  ;;  %v3798_v16 = vpack.c.bf16 %v2540_v45, %v2539_v28  ;;  %v2543_v28 = vld [vmem:[#allocation9 + $0xd0] sm:$0xff]  ;;  %v2544_v45 = vld [vmem:[#allocation9 + $0xd8] sm:$0xff] }
 0x83f   :  { %2044 = vmatmul.mubr.f32.gmra.mrb[30].mxu0 %v4694_v49  ;;  %2157 = vmatmul.mubr.f32.gmra.mrb[30].mxu1 %v4694_v49 }
 0x840   :  { %2227 = vmatprep.mubr.f32.mxu0 %v4214_v0  ;;  %2340 = vmatprep.mubr.f32.mxu1 %v4214_v0 }
 0x841   :  { %v4707_v3 = vpop.f32.mrb[20].mxu0  ;;  %v4709_v6 = vpop.f32.mrb[20].mxu1 }
 0x842   :  { %v4712_v29 = vpop.f32.mrb[21].mxu0  ;;  %v4714_v15 = vpop.f32.mrb[21].mxu1 }
 0x843   :  { %2228 = vmatmul.mubr.f32.vlgmr.msra.gmra.mrb[32].mxu0 %v4476_v2  ;;  %2341 = vmatmul.mubr.f32.vlgmr.msra.gmra.mrb[32].mxu1 %v4476_v2  ;;  %v2538_v2 = vld [vmem:[#allocation9 + $0xa8] sm:$0xff] }
 0x844   :  { %3789 = vmatpush3.bf16.msra.mxu0 %v3788_v62  ;;  %3821 = vmatpush3.bf16.msra.mxu1 %v3820_v7  ;;  %v3794_v5 = vpack.c.bf16 %v2538_v2, %v2537_v39  ;;  %v2555_v62 = vld [vmem:[#allocation9 + $0x130] sm:$0xff]  ;;  %v2556_v7 = vld [vmem:[#allocation9 + $0x138] sm:$0xff]  ;;  %v2526_v39 = vld [vmem:[#allocation9 + $0x48] sm:$0xff] }
 0x845   :  { %v4718_v27 = vpop.f32.mrb[22].mxu0  ;;  %v4720_v31 = vpop.f32.mrb[22].mxu1  ;;  %2233 = vmatprep.mubr.f32.mxu0 %v4214_v0  ;;  %2346 = vmatprep.mubr.f32.mxu1 %v4214_v0  ;;  %v2557_v2 = vld [vmem:[#allocation9 + $0x140] sm:$0xff] }
 0x846   :  { %v4723_v38 = vpop.f32.mrb[23].mxu0  ;;  %v4725_v41 = vpop.f32.mrb[23].mxu1  ;;  %3791 = vmatprep.subr.bf16.mxu0 %v3790_v26  ;;  %3823 = vmatprep.subr.bf16.mxu1 %v3822_v36  ;;  %v3800_v26 = vpack.c.bf16 %v2524_v61, %v2523_v60  ;;  %v3832_v36 = vpack.c.bf16 %v2556_v7, %v2555_v62  ;;  %v2528_v60 = vld [vmem:[#allocation9 + $0x58] sm:$0xff]  ;;  %v2559_v61 = vld [vmem:[#allocation9 + $0x150] sm:$0xff] }
 0x847   :  { %2234 = vmatmul.mubr.f32.gmra.mrb[34].mxu0 %v4504_v48  ;;  %2347 = vmatmul.mubr.f32.gmra.mrb[34].mxu1 %v4504_v48  ;;  %v3796_v48 = vpack.c.bf16 %v2522_v53, %v2521_v51  ;;  %v4761_v53 = vld [vmem:[%s5150_s5] sm:$0xff]  ;;  %v2560_v62 = vld [vmem:[#allocation9 + $0x158] sm:$0xff] }
 0x848   :  { %3793 = vmatpush3.bf16.msra.mxu0 %v3792_v37  ;;  %3825 = vmatpush3.bf16.msra.mxu1 %v3824_v33  ;;  %v2573_v37 = vld [vmem:[#allocation9 + $0x1c0] sm:$0xff]  ;;  %v4772_v7 = vrot.slane %v4761_v53, %v117_v22  ;;  %v4784_v22 = vrot.slane %v4761_v53, %v113_v20  ;;  %v2562_v20 = vld [vmem:[#allocation9 + $0x168] sm:$0xff] }
 0x849   :  { %v4730_v58 = vpop.f32.mrb[24].mxu0  ;;  %v4732_v1 = vpop.f32.mrb[24].mxu1  ;;  %2239 = vmatprep.mubr.f32.mxu0 %v4214_v0  ;;  %2352 = vmatprep.mubr.f32.mxu1 %v4214_v0  ;;  %v2525_v33 = vld [vmem:[#allocation9 + $0x40] sm:$0xff] }
 0x84a   :  { %v4734_v25 = vpop.f32.mrb[25].mxu0  ;;  %v4736_v4 = vpop.f32.mrb[25].mxu1  ;;  %3795 = vmatprep.subr.bf16.mxu0 %v3794_v5  ;;  %3827 = vmatprep.subr.bf16.mxu1 %v3826_v8  ;;  %v3802_v5 = vpack.c.bf16 %v2542_v21, %v2541_v18  ;;  %v2545_v21 = vld [vmem:[#allocation9 + $0xe0] sm:$0xff] }
 0x84b   :  { %2240 = vmatmul.mubr.f32.gmra.mrb[36].mxu0 %v4532_v30  ;;  %2353 = vmatmul.mubr.f32.gmra.mrb[36].mxu1 %v4532_v30  ;;  %v2574_v30 = vld [vmem:[#allocation9 + $0x1c8] sm:$0xff] }
 0x84c   :  { %3797 = vmatpush3.bf16.msra.mxu0 %v3796_v48  ;;  %3829 = vmatpush3.bf16.msra.mxu1 %v3828_v46  ;;  %v3834_v8 = vpack.c.bf16 %v2574_v30, %v2573_v37  ;;  %v3836_v48 = vpack.c.bf16 %v2558_v40, %v2557_v2  ;;  %v2575_v46 = vld [vmem:[#allocation9 + $0x1d0] sm:$0xff]  ;;  %v2577_v37 = vld [vmem:[#allocation9 + $0x1e0] sm:$0xff]  ;;  %v2578_v30 = vld [vmem:[#allocation9 + $0x1e8] sm:$0xff]  ;;  %v4795_v40 = vadd.f32 %v4690_v42, %v4772_v7 }
 0x84d   :  { %v4742_v9 = vpop.f32.mrb[26].mxu0  ;;  %v4744_v11 = vpop.f32.mrb[26].mxu1  ;;  %2245 = vmatprep.mubr.f32.mxu0 %v4214_v0  ;;  %2358 = vmatprep.mubr.f32.mxu1 %v4214_v0  ;;  %v3838_v18 = vpack.c.bf16 %v2576_v63, %v2575_v46  ;;  %v2561_v2 = vld [vmem:[#allocation9 + $0x160] sm:$0xff]  ;;  %v2580_v42 = vld [vmem:[#allocation9 + $0x1f8] sm:$0xff] }
 0x84e   :  { %v4746_v14 = vpop.f32.mrb[27].mxu0  ;;  %v4748_v34 = vpop.f32.mrb[27].mxu1  ;;  %3799 = vmatprep.subr.bf16.mxu0 %v3798_v16  ;;  %3831 = vmatprep.subr.bf16.mxu1 %v3830_v17  ;;  %v4779_v16 = vrot.slane %v4761_v53, %v125_v32  ;;  %v3806_v17 = vpack.c.bf16 %v2544_v45, %v2543_v28  ;;  %v4789_v32 = vrot.slane %v4761_v53, %v121_v24  ;;  %v4803_v24 = vld [vmem:[#allocation9 + $0x1f0] sm:$0xff]  ;;  %v2532_v46 = vld [vmem:[#allocation9 + $0x78] sm:$0xff] }
 0x84f   :  { %2246 = vmatmul.mubr.f32.gmra.mrb[38].mxu0 %v4560_v10  ;;  %2359 = vmatmul.mubr.f32.gmra.mrb[38].mxu1 %v4560_v10  ;;  %v3804_v10 = vpack.c.bf16 %v2526_v39, %v2525_v33  ;;  %v2529_v33 = vld [vmem:[#allocation9 + $0x60] sm:$0xff]  ;;  %v2530_v39 = vld [vmem:[#allocation9 + $0x68] sm:$0xff] }
 0x850   :  { %3801 = vmatpush3.bf16.msra.mxu0 %v3800_v26  ;;  %3833 = vmatpush3.bf16.msra.mxu1 %v3832_v36  ;;  %v2546_v26 = vld [vmem:[#allocation9 + $0xe8] sm:$0xff]  ;;  %v3808_v36 = vpack.c.bf16 %v2528_v60, %v2527_v55  ;;  %v4807_v28 = vadd.f32 %v4692_v13, %v4779_v16  ;;  %v3812_v63 = vpack.c.bf16 %v2530_v39, %v2529_v33  ;;  %v4815_v60 = vld [vmem:[#allocation9 + $0x170] sm:$0xff]  ;;  %v4817_v13 = vld [vmem:[#allocation9 + $0x178] sm:$0xff] }
 0x851   :  { %v4754_v47 = vpop.f32.mrb[28].mxu0  ;;  %v4756_v51 = vpop.f32.mrb[28].mxu1  ;;  %2251 = vmatprep.mubr.f32.mxu0 %v4214_v0  ;;  %2364 = vmatprep.mubr.f32.mxu1 %v4214_v0  ;;  %v3810_v45 = vpack.c.bf16 %v2546_v26, %v2545_v21  ;;  %v3844_v55 = vpack.c.bf16 %v2562_v20, %v2561_v2  ;;  %v2390_v21 = vmul.f32 0.01, %v4795_v40  ;;  %v4836_v26 = vadd.f32 %v4700_v56, %v4772_v7  ;;  %v4855_v39 = vld [vmem:[#allocation9 + $0x308] sm:$0xff] }
 0x852   :  { %v4763_v54 = vpop.f32.mrb[29].mxu0  ;;  %v4765_v23 = vpop.f32.mrb[29].mxu1  ;;  %3803 = vmatprep.subr.bf16.mxu0 %v3802_v5  ;;  %3835 = vmatprep.subr.bf16.mxu1 %v3834_v8  ;;  %v4799_v5 = vld [vmem:[#allocation9 + $0xf0] sm:$0xff]  ;;  %v4801_v8 = vld [vmem:[#allocation9 + $0xf8] sm:$0xff]  ;;  %v3846_v56 = vpack.c.bf16 %v2580_v42, %v4803_v24  ;;  %v3848_v20 = vpack.c.bf16 %v4817_v13, %v4815_v60  ;;  %v4873_v42 = vadd.f32 %v4696_v50, %v4784_v22 }
 0x853   :  { %2252 = vmatmul.mubr.f32.gmra.mrb[40].mxu0 %v4588_v59  ;;  %2365 = vmatmul.mubr.f32.gmra.mrb[40].mxu1 %v4588_v59  ;;  %v3840_v59 = vpack.c.bf16 %v2560_v62, %v2559_v61  ;;  %v4819_v61 = vld [vmem:[#allocation9 + $0x280] sm:$0xff]  ;;  %v4823_v62 = vadd.f32 %v4688_v12, %v4789_v32  ;;  %v3814_v12 = vpack.c.bf16 %v4801_v8, %v4799_v5  ;;  %v4864_v8 = vld [vmem:[#allocation9 + $0x290] sm:$0xff]  ;;  %v4866_v24 = vld [vmem:[#allocation9 + $0x298] sm:$0xff]  ;;  %v2398_v13 = vmul.f32 0.01, %v4836_v26 }
 0x854   :  { %3805 = vmatpush3.bf16.msra.mxu0 %v3804_v10  ;;  %3837 = vmatpush3.bf16.msra.mxu1 %v3836_v48  ;;  %v3842_v10 = vpack.c.bf16 %v2578_v30, %v2577_v37  ;;  %v4809_v48 = vld [vmem:[#allocation9 + $0x70] sm:$0xff]  ;;  %v2392_v37 = vmul.f32 0.01, %v4807_v28  ;;  %v4849_v30 = vadd.f32 %v4702_v57, %v4779_v16  ;;  %v4887_v60 = vld [vmem:[#allocation9 + $0x218] sm:$0xff]  ;;  %v2454_v50 = vmax.f32 %v4795_v40, %v2390_v21 }
 0x855   :  { %2257 = vmatprep.mubr.f32.mxu0 %v4214_v0  ;;  %2370 = vmatprep.mubr.f32.mxu1 %v4214_v0  ;;  %v3816_v33 = vpack.c.bf16 %v2532_v46, %v4809_v48  ;;  %v4877_v48 = vadd.f32 %v4698_v52, %v4789_v32  ;;  %v4893_v52 = vadd.f32 %v4712_v29, %v4772_v7  ;;  %v4914_v21 = vld [vmem:[#allocation9 + $0x318] sm:$0xff] }
 0x856   :  { %3807 = vmatprep.subr.bf16.mxu0 %v3806_v17  ;;  %3839 = vmatprep.subr.bf16.mxu1 %v3838_v18  ;;  %v4829_v17 = vld [vmem:[#allocation9 + $0x380] sm:$0xff]  ;;  %v4831_v18 = vld [vmem:[#allocation9 + $0x388] sm:$0xff]  ;;  %v4903_v40 = vadd.f32 %v4714_v15, %v4779_v16  ;;  %v3854_v29 = vpack.c.bf16 %v4866_v24, %v4864_v8  ;;  %v4945_v8 = vadd.f32 %v4725_v41, %v4779_v16 }
 0x857   :  { %2258 = vmatmul.mubr.f32.gmra.mrb[42].mxu0 %v4616_v43  ;;  %2371 = vmatmul.mubr.f32.gmra.mrb[42].mxu1 %v4616_v43  ;;  %v4813_v43 = vadd.f32 %v4686_v44, %v4784_v22  ;;  %v4827_v44 = vld [vmem:[#allocation9 + $0x288] sm:$0xff]  ;;  %v3882_v5 = vpack.c.bf16 %v4831_v18, %v4829_v17  ;;  %v4907_v17 = vld [vmem:[#allocation9 + $0x310] sm:$0xff]  ;;  %v4916_v15 = vld [vmem:[#allocation9 + $0x2a0] sm:$0xff] }
 0x858   :  { %3809 = vmatpush3.bf16.msra.mxu0 %v3808_v36  ;;  %3841 = vmatpush3.bf16.msra.mxu1 %v3840_v59  ;;  %v4842_v36 = vld [vmem:[#allocation9 + $0x200] sm:$0xff]  ;;  %v4844_v59 = vld [vmem:[#allocation9 + $0x208] sm:$0xff]  ;;  %v3850_v57 = vpack.c.bf16 %v4827_v44, %v4819_v61  ;;  %v2456_v61 = vmax.f32 %v4807_v28, %v2392_v37  ;;  %v2400_v44 = vmul.f32 0.01, %v4849_v30  ;;  %v4925_v37 = vadd.f32 %v4707_v3, %v4784_v22 }
 0x859   :  { %2263 = vmatprep.mubr.f32.mxu0 %v4214_v0  ;;  %2376 = vmatprep.mubr.f32.mxu1 %v4214_v0  ;;  %v2389_v2 = vmul.f32 0.01, %v4813_v43  ;;  %v3852_v46 = vpack.c.bf16 %v4844_v59, %v4842_v36  ;;  %v2397_v59 = vmul.f32 0.01, %v4873_v42  ;;  %v4951_v24 = vld [vmem:[#allocation9 + $0x228] sm:$0xff] }
 0x85a   :  { %3811 = vmatprep.subr.bf16.mxu0 %v3810_v45  ;;  %3843 = vmatprep.subr.bf16.mxu1 %v3842_v10  ;;  %v4868_v45 = vld [vmem:[#allocation9 + $0x390] sm:$0xff]  ;;  %v2391_v10 = vmul.f32 0.01, %v4823_v62  ;;  %v2464_v3 = vmax.f32 %v4849_v30, %v2400_v44  ;;  %v4978_v44 = vld [vmem:[#allocation9 + $0x3b8] sm:$0xff] }
 0x85b   :  { %2264 = vmatmul.mubr.f32.gmra.mrb[44].mxu0 %v4645_v35  ;;  %2377 = vmatmul.mubr.f32.gmra.mrb[44].mxu1 %v4645_v35  ;;  %v4853_v35 = vld [vmem:[#allocation9 + $0x300] sm:$0xff] }
 0x85c   :  { %3813 = vmatpush3.bf16.msra.mxu0 %v3812_v63  ;;  %3845 = vmatpush3.bf16.msra.mxu1 %v3844_v55  ;;  %v4883_v63 = vld [vmem:[#allocation9 + $0x398] sm:$0xff]  ;;  %v4885_v55 = vld [vmem:[#allocation9 + $0x210] sm:$0xff]  ;;  %v2455_v36 = vmax.f32 %v4823_v62, %v2391_v10  ;;  %v2406_v62 = vmul.f32 0.01, %v4893_v52  ;;  %v2461_v10 = vmax.f32 %v4873_v42, %v2397_v59  ;;  %v5008_v59 = vadd.f32 %v4730_v58, %v4784_v22 }
 0x85d   :  { %2269 = vmatprep.mubr.f32.mxu0 %v4214_v0  ;;  %2382 = vmatprep.mubr.f32.mxu1 %v4214_v0  ;;  %v3884_v0 = vpack.c.bf16 %v4855_v39, %v4853_v35  ;;  %v3886_v28 = vpack.c.bf16 %v4883_v63, %v4868_v45  ;;  %v3856_v18 = vpack.c.bf16 %v4887_v60, %v4885_v55  ;;  %v4965_v45 = vld [vmem:[#allocation9 + $0x2b0] sm:$0xff] }
 0x85e   :  { %3815 = vmatprep.subr.bf16.mxu0 %v3814_v12  ;;  %3847 = vmatprep.subr.bf16.mxu1 %v3846_v56  ;;  %v4918_v12 = vld [vmem:[#allocation9 + $0x2a8] sm:$0xff]  ;;  %v4927_v56 = vld [vmem:[#allocation9 + $0x3a0] sm:$0xff]  ;;  %v2462_v35 = vmax.f32 %v4836_v26, %v2398_v13  ;;  %v4934_v39 = vadd.f32 %v4709_v6, %v4789_v32  ;;  %v3888_v6 = vpack.c.bf16 %v4914_v21, %v4907_v17  ;;  %v4974_v13 = vld [vmem:[#allocation9 + $0x2b8] sm:$0xff] }
 0x85f   :  { %2270 = vmatmul.mubr.f32.gmra.mrb[46].mxu0 %v4694_v49  ;;  %2383 = vmatmul.mubr.f32.gmra.mrb[46].mxu1 %v4694_v49  ;;  %v2453_v49 = vmax.f32 %v4813_v43, %v2389_v2  ;;  %v2399_v43 = vmul.f32 0.01, %v4877_v48  ;;  %v4939_v2 = vadd.f32 %v4723_v38, %v4772_v7  ;;  %v4949_v26 = vld [vmem:[#allocation9 + $0x220] sm:$0xff]  ;;  %v4955_v38 = vadd.f32 %v4718_v27, %v4784_v22 }
 0x860   :  { %3817 = vmatpush3.bf16.msra.mxu0 %v3816_v33  ;;  %2716 = vmatprep.mubr.f32.mxu0 %v2454_v50  ;;  %v4929_v33 = vld [vmem:[#allocation9 + $0x3a8] sm:$0xff]  ;;  %v3858_v30 = vpack.c.bf16 %v4918_v12, %v4916_v15  ;;  %v2405_v27 = vmul.f32 0.01, %v4925_v37  ;;  %v4972_v50 = vadd.f32 %v4720_v31, %v4789_v32  ;;  %v2407_v17 = vmul.f32 0.01, %v4934_v39  ;;  %v5002_v12 = vld [vmem:[#allocation9 + $0x330] sm:$0xff] }
 0x861   :  { %3849 = vmatpush3.bf16.msra.mxu1 %v3848_v20  ;;  %2821 = vmatprep.mubr.f32.mxu1 %v2456_v61  ;;  %v2408_v20 = vmul.f32 0.01, %v4903_v40  ;;  %v3890_v41 = vpack.c.bf16 %v4929_v33, %v4927_v56  ;;  %v2463_v63 = vmax.f32 %v4877_v48, %v2399_v43  ;;  %v4976_v61 = vld [vmem:[#allocation9 + $0x3b0] sm:$0xff]  ;;  %v2470_v42 = vmax.f32 %v4893_v52, %v2406_v62  ;;  %v2620_v56 = vld [vmem:[#allocation9 + $0x338] sm:$0xff]  ;;  %v2605_v33 = vld [vmem:[#allocation9 + $0x2c0] sm:$0xff] }
 0x862   :  { %3851 = vmatprep.subr.bf16.mxu0 %v3850_v57  ;;  %3883 = vmatprep.subr.bf16.mxu1 %v3882_v5  ;;  %v4961_v57 = vld [vmem:[#allocation9 + $0x320] sm:$0xff]  ;;  %v4963_v5 = vld [vmem:[#allocation9 + $0x328] sm:$0xff]  ;;  %v2414_v48 = vmul.f32 0.01, %v4939_v2  ;;  %v4991_v21 = vadd.f32 %v4736_v4, %v4779_v16  ;;  %v3860_v52 = vpack.c.bf16 %v4951_v24, %v4949_v26  ;;  %v2413_v15 = vmul.f32 0.01, %v4955_v38 }
 0x863   :  { %2717 = vmatmul.mubr.f32.vlgmr.msra.gmra.mrb[48].mxu0 %v2453_v49  ;;  %v4985_v49 = vadd.f32 %v4734_v25, %v4772_v7  ;;  %v2472_v31 = vmax.f32 %v4903_v40, %v2408_v20  ;;  %v3892_v25 = vpack.c.bf16 %v4963_v5, %v4961_v57  ;;  %v3894_v40 = vpack.c.bf16 %v4978_v44, %v4976_v61  ;;  %v2587_v4 = vld [vmem:[#allocation9 + $0x230] sm:$0xff]  ;;  %v2589_v26 = vld [vmem:[#allocation9 + $0x240] sm:$0xff]  ;;  %v2590_v24 = vld [vmem:[#allocation9 + $0x248] sm:$0xff] }
 0x864   :  { %2822 = vmatmul.mubr.f32.vlgmr.msra.gmra.mrb[48].mxu1 %v2455_v36  ;;  %2721 = vmatprep.mubr.f32.mxu0 %v2462_v35  ;;  %v2415_v36 = vmul.f32 0.01, %v4972_v50  ;;  %v5012_v43 = vadd.f32 %v4732_v1, %v4789_v32  ;;  %v2606_v35 = vld [vmem:[#allocation9 + $0x2c8] sm:$0xff]  ;;  %v2478_v62 = vmax.f32 %v4939_v2, %v2414_v48  ;;  %v2036_v58 = vadd.f32 %v4746_v14, %v4772_v7 }
 0x865   :  { %2826 = vmatprep.mubr.f32.mxu1 %v2464_v3  ;;  %3853 = vmatpush3.bf16.msra.mxu0 %v3852_v46  ;;  %v2416_v46 = vmul.f32 0.01, %v4945_v8  ;;  %v2422_v3 = vmul.f32 0.01, %v4985_v49  ;;  %v2424_v20 = vmul.f32 0.01, %v4991_v21  ;;  %v2149_v55 = vadd.f32 %v4748_v34, %v4779_v16 }
 0x866   :  { %3885 = vmatpush3.bf16.msra.mxu1 %v3884_v0  ;;  %3855 = vmatprep.subr.bf16.mxu0 %v3854_v29  ;;  %v3862_v0 = vpack.c.bf16 %v4974_v13, %v4965_v45  ;;  %v2588_v29 = vld [vmem:[#allocation9 + $0x238] sm:$0xff]  ;;  %v3896_v2 = vpack.c.bf16 %v2620_v56, %v5002_v12  ;;  %v3866_v14 = vpack.c.bf16 %v2606_v35, %v2605_v33  ;;  %v2423_v34 = vmul.f32 0.01, %v5012_v43  ;;  %v2622_v57 = vld [vmem:[#allocation9 + $0x348] sm:$0xff] }
 0x867   :  { %2722 = vmatmul.mubr.f32.gmra.mrb[50].mxu0 %v2461_v10  ;;  %3887 = vmatprep.subr.bf16.mxu1 %v3886_v28  ;;  %v2469_v28 = vmax.f32 %v4925_v37, %v2405_v27  ;;  %v2471_v37 = vmax.f32 %v4934_v39, %v2407_v17  ;;  %v2480_v1 = vmax.f32 %v4945_v8, %v2416_v46  ;;  %v2430_v10 = vmul.f32 0.01, %v2036_v58  ;;  %v2608_v12 = vld [vmem:[#allocation9 + $0x2d8] sm:$0xff] }
 0x868   :  { %2827 = vmatmul.mubr.f32.gmra.mrb[50].mxu1 %v2463_v63  ;;  %2726 = vmatprep.mubr.f32.mxu0 %v2470_v42  ;;  %v3864_v60 = vpack.c.bf16 %v2588_v29, %v2587_v4  ;;  %v2477_v39 = vmax.f32 %v4955_v38, %v2413_v15  ;;  %v2479_v8 = vmax.f32 %v4972_v50, %v2415_v36  ;;  %v2621_v38 = vld [vmem:[#allocation9 + $0x340] sm:$0xff]  ;;  %v2432_v50 = vmul.f32 0.01, %v2149_v55  ;;  %v2607_v29 = vld [vmem:[#allocation9 + $0x2d0] sm:$0xff]  ;;  %v2592_v56 = vld [vmem:[#allocation9 + $0x258] sm:$0xff] }
 0x869   :  { %2831 = vmatprep.mubr.f32.mxu1 %v2472_v31  ;;  %3857 = vmatpush3.bf16.msra.mxu0 %v3856_v18  ;;  %v2637_v18 = vld [vmem:[#allocation9 + $0x3c0] sm:$0xff]  ;;  %v2486_v5 = vmax.f32 %v4985_v49, %v2422_v3  ;;  %v2147_v45 = vadd.f32 %v4744_v11, %v4789_v32  ;;  %v2042_v63 = vadd.f32 %v4763_v54, %v4772_v7 }
 0x86a   :  { %3889 = vmatpush3.bf16.msra.mxu1 %v3888_v6  ;;  %3859 = vmatprep.subr.bf16.mxu0 %v3858_v30  ;;  %v2638_v6 = vld [vmem:[#allocation9 + $0x3c8] sm:$0xff]  ;;  %v2421_v30 = vmul.f32 0.01, %v5008_v59  ;;  %v2488_v27 = vmax.f32 %v4991_v21, %v2424_v20  ;;  %v3868_v61 = vpack.c.bf16 %v2590_v24, %v2589_v26  ;;  %v3900_v44 = vpack.c.bf16 %v2622_v57, %v2621_v38  ;;  %v2641_v20 = vld [vmem:[#allocation9 + $0x3e0] sm:$0xff]  ;;  %v2644_v38 = vld [vmem:[#allocation9 + $0x3f8] sm:$0xff] }
 0x86b   :  { %2727 = vmatmul.mubr.f32.gmra.mrb[52].mxu0 %v2469_v28  ;;  %3891 = vmatprep.subr.bf16.mxu1 %v3890_v41  ;;  %v2034_v41 = vadd.f32 %v4742_v9, %v4784_v22  ;;  %v2155_v9 = vadd.f32 %v4765_v23, %v4779_v16  ;;  %v3898_v13 = vpack.c.bf16 %v2638_v6, %v2637_v18  ;;  %v2431_v48 = vmul.f32 0.01, %v2147_v45  ;;  %v2639_v28 = vld [vmem:[#allocation9 + $0x3d0] sm:$0xff]  ;;  %v2593_v18 = vld [vmem:[#allocation9 + $0x260] sm:$0xff]  ;;  %v2626_v26 = vld [vmem:[#allocation9 + $0x368] sm:$0xff] }
 0x86c   :  { %2832 = vmatmul.mubr.f32.gmra.mrb[52].mxu1 %v2471_v37  ;;  %2731 = vmatprep.mubr.f32.mxu0 %v2478_v62  ;;  %v2485_v11 = vmax.f32 %v5008_v59, %v2421_v30  ;;  %v2487_v17 = vmax.f32 %v5012_v43, %v2423_v34  ;;  %v2040_v42 = vadd.f32 %v4754_v47, %v4784_v22  ;;  %v2438_v31 = vmul.f32 0.01, %v2042_v63  ;;  %v2640_v59 = vld [vmem:[#allocation9 + $0x3d8] sm:$0xff]  ;;  %v2591_v43 = vld [vmem:[#allocation9 + $0x250] sm:$0xff]  ;;  %v2625_v6 = vld [vmem:[#allocation9 + $0x360] sm:$0xff] }
 0x86d   :  { %2836 = vmatprep.mubr.f32.mxu1 %v2480_v1  ;;  %3861 = vmatpush3.bf16.msra.mxu0 %v3860_v52  ;;  %v2429_v54 = vmul.f32 0.01, %v2034_v41  ;;  %v2494_v49 = vmax.f32 %v2036_v58, %v2430_v10  ;;  %v2153_v23 = vadd.f32 %v4756_v51, %v4789_v32  ;;  %v2496_v46 = vmax.f32 %v2149_v55, %v2432_v50  ;;  %v2623_v37 = vld [vmem:[#allocation9 + $0x350] sm:$0xff]  ;;  %v2624_v62 = vld [vmem:[#allocation9 + $0x358] sm:$0xff]  ;;  %v2609_v58 = vld [vmem:[#allocation9 + $0x2e0] sm:$0xff] }
 0x86e   :  { %3893 = vmatpush3.bf16.msra.mxu1 %v3892_v25  ;;  %3863 = vmatprep.subr.bf16.mxu0 %v3862_v0  ;;  %v2440_v21 = vmul.f32 0.01, %v2155_v9  ;;  %v2437_v15 = vmul.f32 0.01, %v2040_v42  ;;  %v2495_v47 = vmax.f32 %v2147_v45, %v2431_v48  ;;  %v2502_v0 = vmax.f32 %v2042_v63, %v2438_v31  ;;  %v2610_v1 = vld [vmem:[#allocation9 + $0x2e8] sm:$0xff]  ;;  %v2612_v30 = vld [vmem:[#allocation9 + $0x2f8] sm:$0xff] }
 0x86f   :  { %2732 = vmatmul.mubr.f32.gmra.mrb[54].mxu0 %v2477_v39  ;;  %3895 = vmatprep.subr.bf16.mxu1 %v3894_v40  ;;  %v2493_v52 = vmax.f32 %v2034_v41, %v2429_v54  ;;  %v2439_v25 = vmul.f32 0.01, %v2153_v23  ;;  %v3870_v36 = vpack.c.bf16 %v2608_v12, %v2607_v29  ;;  %v3902_v33 = vpack.c.bf16 %v2640_v59, %v2639_v28  ;;  %v2594_v39 = vld [vmem:[#allocation9 + $0x268] sm:$0xff]  ;;  %v2643_v34 = vld [vmem:[#allocation9 + $0x3f0] sm:$0xff] }
 0x870   :  { %2837 = vmatmul.mubr.f32.gmra.mrb[54].mxu1 %v2479_v8  ;;  %2736 = vmatprep.mubr.f32.mxu0 %v2486_v5  ;;  %v2504_v40 = vmax.f32 %v2155_v9, %v2440_v21  ;;  %v2501_v51 = vmax.f32 %v2040_v42, %v2437_v15  ;;  %v3872_v35 = vpack.c.bf16 %v2592_v56, %v2591_v43  ;;  %v2611_v8 = vld [vmem:[#allocation9 + $0x2f0] sm:$0xff]  ;;  %v2596_v5 = vld [vmem:[#allocation9 + $0x278] sm:$0xff]  ;;  %v1915_v9 = vsub.s32 4, %v4447_v19 }
 0x871   :  { %2841 = vmatprep.mubr.f32.mxu1 %v2488_v27  ;;  %3865 = vmatpush3.bf16.msra.mxu0 %v3864_v60  ;;  %v2503_v4 = vmax.f32 %v2153_v23, %v2439_v25  ;;  %v3904_v3 = vpack.c.bf16 %v2624_v62, %v2623_v37  ;;  %v3874_v55 = vpack.c.bf16 %v2610_v1, %v2609_v58  ;;  %v2642_v60 = vld [vmem:[#allocation9 + $0x3e8] sm:$0xff]  ;;  %v2595_v57 = vld [vmem:[#allocation9 + $0x270] sm:$0xff]  ;;  %v2628_v27 = vld [vmem:[#allocation9 + $0x378] sm:$0xff] }
 0x872   :  { %3897 = vmatpush3.bf16.msra.mxu1 %v3896_v2  ;;  %3867 = vmatprep.subr.bf16.mxu0 %v3866_v14  ;;  %v3906_v2 = vpack.c.bf16 %v2642_v60, %v2641_v20  ;;  %v3876_v14 = vpack.c.bf16 %v2594_v39, %v2593_v18  ;;  %v3908_v24 = vpack.c.bf16 %v2626_v26, %v2625_v6  ;;  %v2627_v63 = vld [vmem:[#allocation9 + $0x370] sm:$0xff] }
 0x873   :  { %2737 = vmatmul.mubr.f32.gmra.mrb[56].mxu0 %v2485_v11  ;;  %3899 = vmatprep.subr.bf16.mxu1 %v3898_v13  ;;  %v3878_v41 = vpack.c.bf16 %v2612_v30, %v2611_v8  ;;  %v3910_v45 = vpack.c.bf16 %v2644_v38, %v2643_v34  ;;  %v3880_v10 = vpack.c.bf16 %v2596_v5, %v2595_v57  ;;  %v1923_v13 = vsub.s32 6, %v4447_v19 }
 0x874   :  { %2842 = vmatmul.mubr.f32.gmra.mrb[56].mxu1 %v2487_v17  ;;  %2741 = vmatprep.mubr.f32.mxu0 %v2494_v49  ;;  %v3912_v50 = vpack.c.bf16 %v2628_v27, %v2627_v63  ;;  %v5053_v48 = vrot.slane %v4761_v53, %v1915_v9 }
 0x875   :  { %2846 = vmatprep.mubr.f32.mxu1 %v2496_v46  ;;  %3869 = vmatpush3.bf16.msra.mxu0 %v3868_v61  ;;  %v1919_v61 = vsub.s32 5, %v4447_v19  ;;  %v5058_v46 = vrot.slane %v4761_v53, %v1923_v13 }
 0x876   :  { %3901 = vmatpush3.bf16.msra.mxu1 %v3900_v44  ;;  %3871 = vmatprep.subr.bf16.mxu0 %v3870_v36  ;;  %v1927_v44 = vsub.s32 7, %v4447_v19 }
 0x877   :  { %2742 = vmatmul.mubr.f32.gmra.mrb[58].mxu0 %v2493_v52  ;;  %3903 = vmatprep.subr.bf16.mxu1 %v3902_v33  ;;  %v5061_v21 = vrot.slane %v4761_v53, %v1919_v61 }
 0x878   :  { %2847 = vmatmul.mubr.f32.gmra.mrb[58].mxu1 %v2495_v47  ;;  %2746 = vmatprep.mubr.f32.mxu0 %v2502_v0 }
 0x879   :  { %2851 = vmatprep.mubr.f32.mxu1 %v2504_v40  ;;  %3873 = vmatpush3.bf16.msra.mxu0 %v3872_v35 }
 0x87a   :  { %3905 = vmatpush3.bf16.msra.mxu1 %v3904_v3  ;;  %3875 = vmatprep.subr.bf16.mxu0 %v3874_v55 }
 0x87b   :  { %2747 = vmatmul.mubr.f32.gmra.mrb[60].mxu0 %v2501_v51  ;;  %3907 = vmatprep.subr.bf16.mxu1 %v3906_v2 }
 0x87c   :  { %2852 = vmatmul.mubr.f32.gmra.mrb[60].mxu1 %v2503_v4 }
 0x87d   :  { %3877 = vmatpush3.bf16.msra.mxu0 %v3876_v14 }
 0x87e   :  { %3909 = vmatpush3.bf16.msra.mxu1 %v3908_v24  ;;  %3879 = vmatprep.subr.bf16.mxu0 %v3878_v41 }
 0x87f   :  { %3911 = vmatprep.subr.bf16.mxu1 %v3910_v45 }
 0x881   :  { %3881 = vmatpush3.bf16.msra.mxu0 %v3880_v10 }
 0x882   :  { %3913 = vmatpush3.bf16.msra.mxu1 %v3912_v50 }
 0x912   :  { %v2045_v11 = vpop.f32.mrb[30].mxu0  ;;  %v2158_v54 = vpop.f32.mrb[30].mxu1 }
 0x913   :  { %v2046_v17 = vadd.f32 %v2045_v11, %v4784_v22  ;;  %v2047_v42 = vpop.f32.mrb[31].mxu0  ;;  %v2159_v49 = vadd.f32 %v2158_v54, %v4789_v32  ;;  %v2160_v31 = vpop.f32.mrb[31].mxu1  ;;  %v5065_v22 = vrot.slane %v4761_v53, %v1927_v44 }
 0x914   :  { %v2048_v23 = vadd.f32 %v2047_v42, %v4772_v7  ;;  %v2161_v52 = vadd.f32 %v2160_v31, %v4779_v16 }
 0x915   :  { %v2445_v19 = vmul.f32 0.01, %v2046_v17  ;;  %v2447_v15 = vmul.f32 0.01, %v2159_v49 }
 0x916   :  { %v2446_v47 = vmul.f32 0.01, %v2048_v23  ;;  %v2229_v25 = vpop.f32.mrb[32].mxu0  ;;  %v2448_v0 = vmul.f32 0.01, %v2161_v52  ;;  %v2342_v7 = vpop.f32.mrb[32].mxu1 }
 0x917   :  { %v2230_v32 = vadd.f32 %v2229_v25, %v5053_v48  ;;  %v2231_v40 = vpop.f32.mrb[33].mxu0  ;;  %v2343_v4 = vadd.f32 %v2342_v7, %v5058_v46  ;;  %v2344_v12 = vpop.f32.mrb[33].mxu1  ;;  %v2509_v28 = vmax.f32 %v2046_v17, %v2445_v19  ;;  %v2511_v59 = vmax.f32 %v2159_v49, %v2447_v15 }
 0x918   :  { %v2510_v51 = vmax.f32 %v2048_v23, %v2446_v47  ;;  %v2232_v29 = vadd.f32 %v2231_v40, %v5061_v21  ;;  %v2512_v36 = vmax.f32 %v2161_v52, %v2448_v0  ;;  %v2345_v53 = vadd.f32 %v2344_v12, %v5065_v22 }
 0x919   :  { %v2393_v16 = vmul.f32 0.01, %v2230_v32  ;;  %v2395_v43 = vmul.f32 0.01, %v2343_v4 }
 0x91a   :  { %v2394_v56 = vmul.f32 0.01, %v2232_v29  ;;  %v2235_v33 = vpop.f32.mrb[34].mxu0  ;;  %2751 = vmatprep.mubr.f32.mxu0 %v2510_v51  ;;  %v2396_v35 = vmul.f32 0.01, %v2345_v53  ;;  %v2348_v62 = vpop.f32.mrb[34].mxu1  ;;  %2856 = vmatprep.mubr.f32.mxu1 %v2512_v36 }
 0x91b   :  { %v2236_v37 = vadd.f32 %v2235_v33, %v5053_v48  ;;  %v2237_v3 = vpop.f32.mrb[35].mxu0  ;;  %2752 = vmatmul.mubr.f32.gmra.mrb[62].mxu0 %v2509_v28  ;;  %v2349_v1 = vadd.f32 %v2348_v62, %v5058_v46  ;;  %v2350_v55 = vpop.f32.mrb[35].mxu1  ;;  %2857 = vmatmul.mubr.f32.gmra.mrb[62].mxu1 %v2511_v59  ;;  %v2457_v60 = vmax.f32 %v2230_v32, %v2393_v16 }
 0x91c   :  { %v2458_v58 = vmax.f32 %v2232_v29, %v2394_v56  ;;  %v2238_v20 = vadd.f32 %v2237_v3, %v5061_v21  ;;  %v2460_v18 = vmax.f32 %v2345_v53, %v2396_v35  ;;  %v2351_v2 = vadd.f32 %v2350_v55, %v5065_v22 }
 0x91d   :  { %v2401_v39 = vmul.f32 0.01, %v2236_v37  ;;  %v2459_v14 = vmax.f32 %v2343_v4, %v2395_v43  ;;  %v2403_v6 = vmul.f32 0.01, %v2349_v1 }
 0x91e   :  { %v2402_v26 = vmul.f32 0.01, %v2238_v20  ;;  %2926 = vmatprep.mubr.f32.mxu0 %v2458_v58  ;;  %v2404_v24 = vmul.f32 0.01, %v2351_v2  ;;  %v2241_v8 = vpop.f32.mrb[36].mxu0  ;;  %3031 = vmatprep.mubr.f32.mxu1 %v2460_v18  ;;  %v2354_v41 = vpop.f32.mrb[36].mxu1 }
 0x91f   :  { %2927 = vmatmul.mubr.f32.vlgmr.msra.gmra.mrb[64].mxu0 %v2457_v60  ;;  %v2242_v34 = vadd.f32 %v2241_v8, %v5053_v48  ;;  %v2243_v38 = vpop.f32.mrb[37].mxu0  ;;  %3032 = vmatmul.mubr.f32.vlgmr.msra.gmra.mrb[64].mxu1 %v2459_v14  ;;  %v2465_v57 = vmax.f32 %v2236_v37, %v2401_v39  ;;  %v2355_v45 = vadd.f32 %v2354_v41, %v5058_v46  ;;  %v2356_v63 = vpop.f32.mrb[37].mxu1 }
 0x920   :  { %v2466_v30 = vmax.f32 %v2238_v20, %v2402_v26  ;;  %v2468_v5 = vmax.f32 %v2351_v2, %v2404_v24  ;;  %v2244_v10 = vadd.f32 %v2243_v38, %v5061_v21  ;;  %v2467_v27 = vmax.f32 %v2349_v1, %v2403_v6 }
 0x921   :  { %v2409_v50 = vmul.f32 0.01, %v2242_v34  ;;  %v2357_v9 = vadd.f32 %v2356_v63, %v5065_v22  ;;  %v2411_v13 = vmul.f32 0.01, %v2355_v45 }
 0x922   :  { %2931 = vmatprep.mubr.f32.mxu0 %v2466_v30  ;;  %v2410_v61 = vmul.f32 0.01, %v2244_v10  ;;  %3036 = vmatprep.mubr.f32.mxu1 %v2468_v5  ;;  %v2247_v11 = vpop.f32.mrb[38].mxu0  ;;  %v2360_v17 = vpop.f32.mrb[38].mxu1 }
 0x923   :  { %2932 = vmatmul.mubr.f32.gmra.mrb[66].mxu0 %v2465_v57  ;;  %v2412_v44 = vmul.f32 0.01, %v2357_v9  ;;  %3037 = vmatmul.mubr.f32.gmra.mrb[66].mxu1 %v2467_v27  ;;  %v2248_v42 = vadd.f32 %v2247_v11, %v5053_v48  ;;  %v2361_v49 = vadd.f32 %v2360_v17, %v5058_v46  ;;  %v2249_v23 = vpop.f32.mrb[39].mxu0  ;;  %v2362_v31 = vpop.f32.mrb[39].mxu1  ;;  %v2473_v19 = vmax.f32 %v2242_v34, %v2409_v50 }
 0x924   :  { %v2474_v54 = vmax.f32 %v2244_v10, %v2410_v61  ;;  %v2250_v15 = vadd.f32 %v2249_v23, %v5061_v21  ;;  %v2363_v47 = vadd.f32 %v2362_v31, %v5065_v22  ;;  %v2475_v25 = vmax.f32 %v2355_v45, %v2411_v13 }
 0x925   :  { %v2476_v52 = vmax.f32 %v2357_v9, %v2412_v44  ;;  %v2417_v0 = vmul.f32 0.01, %v2248_v42  ;;  %v2419_v32 = vmul.f32 0.01, %v2361_v49 }
 0x926   :  { %2936 = vmatprep.mubr.f32.mxu0 %v2474_v54  ;;  %v2418_v7 = vmul.f32 0.01, %v2250_v15  ;;  %v2420_v40 = vmul.f32 0.01, %v2363_v47  ;;  %v2253_v51 = vpop.f32.mrb[40].mxu0  ;;  %v2366_v4 = vpop.f32.mrb[40].mxu1 }
 0x927   :  { %3041 = vmatprep.mubr.f32.mxu1 %v2476_v52  ;;  %2937 = vmatmul.mubr.f32.gmra.mrb[68].mxu0 %v2473_v19  ;;  %v2254_v29 = vadd.f32 %v2253_v51, %v5053_v48  ;;  %v2367_v12 = vadd.f32 %v2366_v4, %v5058_v46  ;;  %v2255_v28 = vpop.f32.mrb[41].mxu0  ;;  %v2368_v36 = vpop.f32.mrb[41].mxu1  ;;  %v2481_v56 = vmax.f32 %v2248_v42, %v2417_v0 }
 0x928   :  { %3042 = vmatmul.mubr.f32.gmra.mrb[68].mxu1 %v2475_v25  ;;  %v2482_v16 = vmax.f32 %v2250_v15, %v2418_v7  ;;  %v2484_v53 = vmax.f32 %v2363_v47, %v2420_v40  ;;  %v2256_v59 = vadd.f32 %v2255_v28, %v5061_v21  ;;  %v2369_v43 = vadd.f32 %v2368_v36, %v5065_v22 }
 0x929   :  { %v2425_v33 = vmul.f32 0.01, %v2254_v29  ;;  %v2427_v35 = vmul.f32 0.01, %v2367_v12  ;;  %v2483_v37 = vmax.f32 %v2361_v49, %v2419_v32 }
 0x92a   :  { %v2426_v62 = vmul.f32 0.01, %v2256_v59  ;;  %v2428_v3 = vmul.f32 0.01, %v2369_v43  ;;  %v2259_v58 = vpop.f32.mrb[42].mxu0  ;;  %v2372_v1 = vpop.f32.mrb[42].mxu1  ;;  %2941 = vmatprep.mubr.f32.mxu0 %v2482_v16  ;;  %3046 = vmatprep.mubr.f32.mxu1 %v2484_v53 }
 0x92b   :  { %v2260_v20 = vadd.f32 %v2259_v58, %v5053_v48  ;;  %v2373_v55 = vadd.f32 %v2372_v1, %v5058_v46  ;;  %v2261_v60 = vpop.f32.mrb[43].mxu0  ;;  %v2374_v18 = vpop.f32.mrb[43].mxu1  ;;  %2942 = vmatmul.mubr.f32.gmra.mrb[70].mxu0 %v2481_v56  ;;  %v2489_v26 = vmax.f32 %v2254_v29, %v2425_v33  ;;  %v2491_v30 = vmax.f32 %v2367_v12, %v2427_v35 }
 0x92c   :  { %v2490_v39 = vmax.f32 %v2256_v59, %v2426_v62  ;;  %v2492_v2 = vmax.f32 %v2369_v43, %v2428_v3  ;;  %v2262_v14 = vadd.f32 %v2261_v60, %v5061_v21  ;;  %v2375_v6 = vadd.f32 %v2374_v18, %v5065_v22  ;;  %3047 = vmatmul.mubr.f32.gmra.mrb[70].mxu1 %v2483_v37 }
 0x92d   :  { %v2433_v24 = vmul.f32 0.01, %v2260_v20  ;;  %v2435_v8 = vmul.f32 0.01, %v2373_v55 }
 0x92e   :  { %v2434_v34 = vmul.f32 0.01, %v2262_v14  ;;  %v2436_v41 = vmul.f32 0.01, %v2375_v6  ;;  %v2265_v38 = vpop.f32.mrb[44].mxu0  ;;  %v2378_v57 = vpop.f32.mrb[44].mxu1  ;;  %2946 = vmatprep.mubr.f32.mxu0 %v2490_v39  ;;  %3051 = vmatprep.mubr.f32.mxu1 %v2492_v2 }
 0x92f   :  { %v2266_v5 = vadd.f32 %v2265_v38, %v5053_v48  ;;  %v2379_v45 = vadd.f32 %v2378_v57, %v5058_v46  ;;  %v2267_v10 = vpop.f32.mrb[45].mxu0  ;;  %v2380_v63 = vpop.f32.mrb[45].mxu1  ;;  %2947 = vmatmul.mubr.f32.gmra.mrb[72].mxu0 %v2489_v26  ;;  %v2497_v61 = vmax.f32 %v2260_v20, %v2433_v24  ;;  %v2499_v17 = vmax.f32 %v2373_v55, %v2435_v8 }
 0x930   :  { %v2498_v27 = vmax.f32 %v2262_v14, %v2434_v34  ;;  %v2500_v50 = vmax.f32 %v2375_v6, %v2436_v41  ;;  %v2268_v9 = vadd.f32 %v2267_v10, %v5061_v21  ;;  %v2381_v13 = vadd.f32 %v2380_v63, %v5065_v22  ;;  %3052 = vmatmul.mubr.f32.gmra.mrb[72].mxu1 %v2491_v30 }
 0x931   :  { %v2441_v44 = vmul.f32 0.01, %v2266_v5  ;;  %v2443_v11 = vmul.f32 0.01, %v2379_v45 }
 0x932   :  { %v2442_v54 = vmul.f32 0.01, %v2268_v9  ;;  %v2444_v42 = vmul.f32 0.01, %v2381_v13  ;;  %v2271_v49 = vpop.f32.mrb[46].mxu0  ;;  %v2384_v23 = vpop.f32.mrb[46].mxu1  ;;  %2951 = vmatprep.mubr.f32.mxu0 %v2498_v27  ;;  %3056 = vmatprep.mubr.f32.mxu1 %v2500_v50 }
 0x933   :  { %v2272_v31 = vadd.f32 %v2271_v49, %v5053_v48  ;;  %v2385_v19 = vadd.f32 %v2384_v23, %v5058_v46  ;;  %v2273_v52 = vpop.f32.mrb[47].mxu0  ;;  %v2386_v15 = vpop.f32.mrb[47].mxu1  ;;  %2952 = vmatmul.mubr.f32.gmra.mrb[74].mxu0 %v2497_v61  ;;  %v2505_v7 = vmax.f32 %v2266_v5, %v2441_v44  ;;  %v2507_v51 = vmax.f32 %v2379_v45, %v2443_v11 }
 0x934   :  { %v2506_v47 = vmax.f32 %v2268_v9, %v2442_v54  ;;  %v2508_v25 = vmax.f32 %v2381_v13, %v2444_v42  ;;  %v2274_v0 = vadd.f32 %v2273_v52, %v5061_v21  ;;  %v2387_v32 = vadd.f32 %v2386_v15, %v5065_v22  ;;  %3057 = vmatmul.mubr.f32.gmra.mrb[74].mxu1 %v2499_v17  ;;  %v5102_v21 = vld [vmem:[%s5152_s7] ss:$0 sm:$0xff]  ;;  %s4215_s7 = smov [#allocation11]  }
 0x935   :  { %v2449_v40 = vmul.f32 0.01, %v2272_v31  ;;  %v2451_v4 = vmul.f32 0.01, %v2385_v19  ;;  %s3117_s29 = sshll.u32 %s4215_s7, 4  ;;  %s3118_s29 = int_to_ptr.vmem [resolvable:$true] %s3117_s29 }
 0x936   :  { %v2450_v29 = vmul.f32 0.01, %v2274_v0  ;;  %v2452_v12 = vmul.f32 0.01, %v2387_v32  ;;  %2956 = vmatprep.mubr.f32.mxu0 %v2506_v47  ;;  %3061 = vmatprep.mubr.f32.mxu1 %v2508_v25  ;;  %v3194_v48 = vpop.f32.mrb[48].mxu0  ;;  %s4174_s2 = scalar_lea.vmem %s3118_s29, 1024  ;;  %p4179_p5 = scmp.lt.s32.totalorder %s3118_s29, %s3118_s29 }
 0x937   :  { %2957 = vmatmul.mubr.f32.gmra.mrb[76].mxu0 %v2505_v7  ;;  %v3250_v36 = vpop.f32.mrb[48].mxu1  ;;  %v3195_v22 = vpop.f32.mrb[49].mxu0  ;;  %v2513_v16 = vmax.f32 %v2272_v31, %v2449_v40  ;;  %v2515_v43 = vmax.f32 %v2385_v19, %v2451_v4  ;;  %p4175_p4 = scmp.ne.s32.totalorder %s3118_s29, %s4174_s2  ;;  %p4180_p6 = scmp.lt.s32.totalorder %s4174_s2, %s4174_s2 }
 0x938   :  { %v2514_v46 = vmax.f32 %v2274_v0, %v2450_v29  ;;  %v2516_v28 = vmax.f32 %v2387_v32, %v2452_v12  ;;  %3062 = vmatmul.mubr.f32.gmra.mrb[76].mxu1 %v2507_v51  ;;  %v3196_v53 = vadd.f32 %v3195_v22, %v3194_v48  ;;  %v3251_v59 = vpop.f32.mrb[49].mxu1 }
 0x939   :  { %v3252_v56 = vadd.f32 %v3251_v59, %v3250_v36  ;;  %p4181_p7 = por %p4180_p6, %p4179_p5 }
 0x93a   :  { %2961 = vmatprep.mubr.f32.mxu0 %v2514_v46  ;;  %3066 = vmatprep.mubr.f32.mxu1 %v2516_v28  ;;  %v2719_v33 = vadd.f32 %v3196_v53, %v5102_v21  ;;  %v3197_v35 = vpop.f32.mrb[50].mxu0 }
 0x93b   :  { %2962 = vmatmul.mubr.f32.gmra.mrb[78].mxu0 %v2513_v16  ;;  %v3253_v37 = vpop.f32.mrb[50].mxu1  ;;  %v3198_v62 = vpop.f32.mrb[51].mxu0  ;;  %p4182_p8 = pnand %p4181_p7, %p4175_p4 }
 0x93c   :  { %3067 = vmatmul.mubr.f32.gmra.mrb[78].mxu1 %v2515_v43  ;;  %v2824_v3 = vadd.f32 %v3252_v56, %v2719_v33  ;;  %v3199_v58 = vadd.f32 %v3198_v62, %v3197_v35  ;;  %v3254_v1 = vpop.f32.mrb[51].mxu1 }
 0x93d   :  { %v3255_v20 = vadd.f32 %v3254_v1, %v3253_v37 }
 0x93e   :  { %v2724_v55 = vadd.f32 %v3199_v58, %v5102_v21  ;;  %v3200_v60 = vpop.f32.mrb[52].mxu0 }
 0x93f   :  { %v3256_v18 = vpop.f32.mrb[52].mxu1  ;;  %v3201_v39 = vpop.f32.mrb[53].mxu0 }
 0x940   :  { %v2829_v2 = vadd.f32 %v3255_v20, %v2724_v55  ;;  %v3202_v14 = vadd.f32 %v3201_v39, %v3200_v60  ;;  %v3257_v6 = vpop.f32.mrb[53].mxu1 }
 0x941   :  { %v3258_v26 = vadd.f32 %v3257_v6, %v3256_v18 }
 0x942   :  { %v2729_v24 = vadd.f32 %v3202_v14, %v5102_v21  ;;  %v3203_v8 = vpop.f32.mrb[54].mxu0 }
 0x943   :  { %v3259_v30 = vpop.f32.mrb[54].mxu1  ;;  %v3204_v34 = vpop.f32.mrb[55].mxu0 }
 0x944   :  { %v5107_v41 = vadd.f32 %v3258_v26, %v2729_v24  ;;  %v3205_v38 = vadd.f32 %v3204_v34, %v3203_v8  ;;  %v3260_v57 = vpop.f32.mrb[55].mxu1 }
 0x945   :  { %v3261_v5 = vadd.f32 %v3260_v57, %v3259_v30 }
 0x946   :  { %v2734_v45 = vadd.f32 %v3205_v38, %v5102_v21  ;;  %v3206_v10 = vpop.f32.mrb[56].mxu0 }
 0x947   :  { %v3262_v63 = vpop.f32.mrb[56].mxu1  ;;  %v3207_v27 = vpop.f32.mrb[57].mxu0 }
 0x948   :  { %v5110_v50 = vadd.f32 %v3261_v5, %v2734_v45  ;;  %v3208_v9 = vadd.f32 %v3207_v27, %v3206_v10  ;;  %v3263_v13 = vpop.f32.mrb[57].mxu1 }
 0x949   :  { %v3264_v61 = vadd.f32 %v3263_v13, %v3262_v63 }
 0x94a   :  { %v2739_v44 = vadd.f32 %v3208_v9, %v5102_v21  ;;  %v3209_v11 = vpop.f32.mrb[58].mxu0 }
 0x94b   :  { %v3265_v17 = vpop.f32.mrb[58].mxu1  ;;  %v3210_v54 = vpop.f32.mrb[59].mxu0 }
 0x94c   :  { %v5113_v42 = vadd.f32 %v3264_v61, %v2739_v44  ;;  %v3211_v49 = vadd.f32 %v3210_v54, %v3209_v11  ;;  %v3266_v23 = vpop.f32.mrb[59].mxu1 }
 0x94d   :  { %v3267_v31 = vadd.f32 %v3266_v23, %v3265_v17 }
 0x94e   :  { %v2744_v19 = vadd.f32 %v3211_v49, %v5102_v21  ;;  %v3212_v52 = vpop.f32.mrb[60].mxu0 }
 0x94f   :  { %v3268_v15 = vpop.f32.mrb[60].mxu1  ;;  %v3213_v47 = vpop.f32.mrb[61].mxu0 }
 0x950   :  { %v5116_v25 = vadd.f32 %v3267_v31, %v2744_v19  ;;  %v3214_v0 = vadd.f32 %v3213_v47, %v3212_v52  ;;  %v3269_v32 = vpop.f32.mrb[61].mxu1 }
 0x951   :  { %v3270_v7 = vadd.f32 %v3269_v32, %v3268_v15 }
 0x952   :  { %v2749_v40 = vadd.f32 %v3214_v0, %v5102_v21 }
 0x954   :  { %v5119_v51 = vadd.f32 %v3270_v7, %v2749_v40 }
 0x9ee   :  { %v3215_v4 = vpop.f32.mrb[62].mxu0  ;;  %v3271_v29 = vpop.f32.mrb[62].mxu1 }
 0x9ef   :  { %v3216_v12 = vpop.f32.mrb[63].mxu0  ;;  %v3272_v46 = vpop.f32.mrb[63].mxu1 }
 0x9f0   :  { %v3217_v48 = vadd.f32 %v3216_v12, %v3215_v4  ;;  %v3273_v28 = vadd.f32 %v3272_v46, %v3271_v29 }
 0x9f2   :  { %v2754_v36 = vadd.f32 %v3217_v48, %v5102_v21  ;;  %v3306_v22 = vpop.f32.mrb[64].mxu0  ;;  %v3362_v16 = vpop.f32.mrb[64].mxu1 }
 0x9f3   :  { %v3307_v53 = vpop.f32.mrb[65].mxu0  ;;  %v3363_v56 = vpop.f32.mrb[65].mxu1 }
 0x9f4   :  { %v5122_v59 = vadd.f32 %v3273_v28, %v2754_v36  ;;  %v3308_v43 = vadd.f32 %v3307_v53, %v3306_v22  ;;  %v3364_v33 = vadd.f32 %v3363_v56, %v3362_v16 }
 0x9f6   :  { %v2929_v35 = vadd.f32 %v3308_v43, %v2824_v3  ;;  %v3309_v37 = vpop.f32.mrb[66].mxu0  ;;  %v3365_v62 = vpop.f32.mrb[66].mxu1 }
 0x9f7   :  { %v3310_v58 = vpop.f32.mrb[67].mxu0  ;;  %v3366_v55 = vpop.f32.mrb[67].mxu1 }
 0x9f8   :  { %v3034_v1 = vadd.f32 %v3364_v33, %v2929_v35  ;;  %v3311_v20 = vadd.f32 %v3310_v58, %v3309_v37  ;;  %v3367_v60 = vadd.f32 %v3366_v55, %v3365_v62 }
 0x9fa   :  { %v3072_v18 = vmul.f32 0.5, %v3034_v1  ;;  %v2934_v39 = vadd.f32 %v3311_v20, %v2829_v2  ;;  %v3312_v14 = vpop.f32.mrb[68].mxu0 }
 0x9fb   :  { %v3368_v6 = vpop.f32.mrb[68].mxu1  ;;  %v3313_v26 = vpop.f32.mrb[69].mxu0 }
 0x9fc   :  { %4070 = vtanh.f32 %v3072_v18  ;;  %v3039_v21 = vadd.f32 %v3367_v60, %v2934_v39  ;;  %v3314_v24 = vadd.f32 %v3313_v26, %v3312_v14  ;;  %v3369_v8 = vpop.f32.mrb[69].mxu1 }
 0x9fd   :  { %v3370_v34 = vadd.f32 %v3369_v8, %v3368_v6 }
 0x9fe   :  { %v3073_v30 = vmul.f32 0.5, %v3039_v21  ;;  %v2939_v3 = vadd.f32 %v3314_v24, %v5107_v41  ;;  %v3315_v38 = vpop.f32.mrb[70].mxu0 }
 0x9ff   :  { %v3371_v5 = vpop.f32.mrb[70].mxu1  ;;  %v3316_v45 = vpop.f32.mrb[71].mxu0 }
 0xa00   :  { %4072 = vtanh.f32 %v3073_v30  ;;  %v3044_v57 = vadd.f32 %v3370_v34, %v2939_v3  ;;  %v3317_v10 = vadd.f32 %v3316_v45, %v3315_v38  ;;  %v3372_v63 = vpop.f32.mrb[71].mxu1 }
 0xa01   :  { %v3373_v2 = vadd.f32 %v3372_v63, %v3371_v5 }
 0xa02   :  { %v3074_v27 = vmul.f32 0.5, %v3044_v57  ;;  %v2944_v9 = vadd.f32 %v3317_v10, %v5110_v50  ;;  %v3318_v13 = vpop.f32.mrb[72].mxu0 }
 0xa03   :  { %v3374_v61 = vpop.f32.mrb[72].mxu1  ;;  %v3319_v44 = vpop.f32.mrb[73].mxu0 }
 0xa04   :  { %4074 = vtanh.f32 %v3074_v27  ;;  %v3049_v17 = vadd.f32 %v3373_v2, %v2944_v9  ;;  %v3320_v54 = vadd.f32 %v3319_v44, %v3318_v13  ;;  %v3375_v49 = vpop.f32.mrb[73].mxu1 }
 0xa05   :  { %v3376_v23 = vadd.f32 %v3375_v49, %v3374_v61 }
 0xa06   :  { %v4071_v11 = vpop.eup %4070  ;;  %v3075_v31 = vmul.f32 0.5, %v3049_v17  ;;  %v2949_v19 = vadd.f32 %v3320_v54, %v5113_v42  ;;  %v3321_v52 = vpop.f32.mrb[74].mxu0 }
 0xa07   :  { %v3088_v41 = vmul.f32 0.5, %v4071_v11  ;;  %v3377_v47 = vpop.f32.mrb[74].mxu1  ;;  %v3322_v0 = vpop.f32.mrb[75].mxu0 }
 0xa08   :  { %4076 = vtanh.f32 %v3075_v31  ;;  %v3054_v50 = vadd.f32 %v3376_v23, %v2949_v19  ;;  %v3323_v7 = vadd.f32 %v3322_v0, %v3321_v52  ;;  %v3378_v40 = vpop.f32.mrb[75].mxu1 }
 0xa09   :  { %v3096_v15 = vadd.f32 0.5, %v3088_v41  ;;  %v3379_v29 = vadd.f32 %v3378_v40, %v3377_v47 }
 0xa0a   :  { %v4073_v32 = vpop.eup %4072  ;;  %v3076_v12 = vmul.f32 0.5, %v3054_v50  ;;  %v2954_v48 = vadd.f32 %v3323_v7, %v5116_v25  ;;  %v3324_v46 = vpop.f32.mrb[76].mxu0 }
 0xa0b   :  { %3104 = vst [vmem:[#allocation11] sm:$0xff] %v3096_v15  ;;  %v3089_v4 = vmul.f32 0.5, %v4073_v32  ;;  %v3380_v36 = vpop.f32.mrb[76].mxu1  ;;  %v3325_v22 = vpop.f32.mrb[77].mxu0 }
 0xa0c   :  { %4078 = vtanh.f32 %v3076_v12  ;;  %v3059_v42 = vadd.f32 %v3379_v29, %v2954_v48  ;;  %v3326_v16 = vadd.f32 %v3325_v22, %v3324_v46  ;;  %v3381_v53 = vpop.f32.mrb[77].mxu1 }
 0xa0d   :  { %v3097_v28 = vadd.f32 0.5, %v3089_v4  ;;  %v3382_v56 = vadd.f32 %v3381_v53, %v3380_v36 }
 0xa0e   :  { %v4075_v43 = vpop.eup %4074  ;;  %v3077_v35 = vmul.f32 0.5, %v3059_v42  ;;  %v2959_v37 = vadd.f32 %v3326_v16, %v5119_v51  ;;  %v3327_v62 = vpop.f32.mrb[78].mxu0 }
 0xa0f   :  { %3105 = vst [vmem:[#allocation11 + $0x8] sm:$0xff] %v3097_v28  ;;  %v3090_v33 = vmul.f32 0.5, %v4075_v43  ;;  %v3383_v58 = vpop.f32.mrb[78].mxu1  ;;  %v3328_v1 = vpop.f32.mrb[79].mxu0 }
 0xa10   :  { %4080 = vtanh.f32 %v3077_v35  ;;  %v3064_v25 = vadd.f32 %v3382_v56, %v2959_v37  ;;  %v3329_v55 = vadd.f32 %v3328_v1, %v3327_v62  ;;  %v3384_v60 = vpop.f32.mrb[79].mxu1 }
 0xa11   :  { %v3098_v20 = vadd.f32 0.5, %v3090_v33  ;;  %v3385_v18 = vadd.f32 %v3384_v60, %v3383_v58 }
 0xa12   :  { %v4077_v39 = vpop.eup %4076  ;;  %v3078_v14 = vmul.f32 0.5, %v3064_v25  ;;  %v2964_v21 = vadd.f32 %v3329_v55, %v5122_v59 }
 0xa13   :  { %3106 = vst [vmem:[#allocation11 + $0x10] sm:$0xff] %v3098_v20  ;;  %v3091_v6 = vmul.f32 0.5, %v4077_v39 }
 0xa14   :  { %4082 = vtanh.f32 %v3078_v14  ;;  %v3069_v26 = vadd.f32 %v3385_v18, %v2964_v21 }
 0xa15   :  { %v3099_v24 = vadd.f32 0.5, %v3091_v6 }
 0xa16   :  { %v4079_v8 = vpop.eup %4078  ;;  %v3079_v51 = vmul.f32 0.5, %v3069_v26 }
 0xa17   :  { %3107 = vst [vmem:[#allocation11 + $0x18] sm:$0xff] %v3099_v24  ;;  %v3092_v30 = vmul.f32 0.5, %v4079_v8 }
 0xa18   :  { %4084 = vtanh.f32 %v3079_v51 }
 0xa19   :  { %v3100_v34 = vadd.f32 0.5, %v3092_v30 }
 0xa1a   :  { %v4081_v3 = vpop.eup %4080 }
 0xa1b   :  { %3108 = vst [vmem:[#allocation11 + $0x20] sm:$0xff] %v3100_v34  ;;  %v3093_v38 = vmul.f32 0.5, %v4081_v3 }
 0xa1d   :  { %v3101_v57 = vadd.f32 0.5, %v3093_v38 }
 0xa1e   :  { %v4083_v5 = vpop.eup %4082 }
 0xa1f   :  { %3109 = vst [vmem:[#allocation11 + $0x28] sm:$0xff] %v3101_v57  ;;  %v3094_v45 = vmul.f32 0.5, %v4083_v5 }
 0xa21   :  { %v3102_v10 = vadd.f32 0.5, %v3094_v45 }
 0xa22   :  { %v4085_v63 = vpop.eup %4084 }
 0xa23   :  { %3110 = vst [vmem:[#allocation11 + $0x30] sm:$0xff] %v3102_v10  ;;  %v3095_v59 = vmul.f32 0.5, %v4085_v63 }
 0xa25   :  { %v3103_v27 = vadd.f32 0.5, %v3095_v59 }
 0xa27   :  { %3111 = vst [vmem:[#allocation11 + $0x38] sm:$0xff] %v3103_v27 }
 0xa28   :  { %4185 = shalt.err (!%p4182_p8)
}
 0xa29   :  { %s4186_s11 = scalar_lea.hbm %s5153_s8, 1024 }
 0xa2a   :  { %p4187_p9 = scmp.ne.s32.totalorder %s5153_s8, %s4186_s11  ;;  %p4190_p10 = scmp.lt.u32.totalorder %s4186_s11, %s5153_s8 }
 0xa2c   :  { %p4192_p11 = pnand %p4190_p10, %p4187_p9 }
 0xa2e   :  { %4195 = shalt.err (!%p4192_p11)
}
 0xa2f   :  { %3123 = dma.vmem_to_hbm [thread:$0]  %s3118_s29, 1024, %s5153_s8, [#allocation5], %s4212_s4, %s4212_s4, %s4213_s9  }
 0xa30   :  { %4202 = dma.done.wait [#allocation5], 1024  }
 0xa31   :  { %4203 = vsyncadd [#allocation5], 4294966272 }
 0xa32   :  { %3127 = vsyncpa [#allocation4], 1 }
 0xa33   :  { %3128 = vsyncpa [#allocation7], 1 }
 0xa34   :  { %3129 = vsyncpa [#allocation10], 1 }
 0xa35   :  { %3130 = vsyncpa [#allocation5], 1 }

</bundles_post_ra>
